<compile_context>
chip_gen: v5e
topology: v5e:2x2
jax: 0.10.0
libtpu: 0.0.40
codegen_flags: <defaults>
</compile_context>

<pallas_src>
import math
import functools

import jax
import jax.numpy as jnp
from jax.experimental import pallas as pl
from jax.experimental.pallas import tpu as pltpu


# ----------------------------- configuration ------------------------------
B = 2           # batch
T = 16          # frame length
D_MODEL = 32
N_HEADS = 2
D_FF = 64
N_LAYERS = 2
KSIZE = 3       # conv kernel size (odd, "same" padding)
OUT_SIZE = 24   # mel / output dim

LANE = 128
def _round_up(v, m): return ((v + m - 1) // m) * m
DP = _round_up(D_MODEL, LANE)            # padded d_model     -> 128
FP = _round_up(D_FF, LANE)               # padded d_ff        -> 128
OP = _round_up(OUT_SIZE, LANE)           # padded output_size -> 128
DH = D_MODEL // N_HEADS                  # real head dim (16)


# ------------------------------- kernel ------------------------------------
def fused_decoder_kernel(x_ref, pe_ref, ab_ref, em_ref,
                         wqkv_ref, bqkv_ref, wo_ref, bo_ref,
                         g1_ref, be1_ref,
                         w1_ref, b1_ref, w2_ref, b2_ref,
                         g2_ref, be2_ref,
                         lw_ref, lb_ref,
                         o_ref,
                         *, n_layers, n_heads, ksize, d_model, d_head, d_pad, scale):
    bt = x_ref.shape[0]

    # ---- prenet: x * sqrt(d_model) + positional encoding (dropout = identity)
    h = x_ref[...] * scale + pe_ref[...]                  # (BT, DP) f32, padded lanes 0
    attn_bias = ab_ref[...]                               # (BT, BT) additive key mask

    lane_idx = jax.lax.broadcasted_iota(jnp.int32, (1, d_pad), 1)
    ch_mask = lane_idx < d_model                          # real-channel mask (LayerNorm)
    head_masks = [(lane_idx >= hh * d_head) & (lane_idx < (hh + 1) * d_head)
                  for hh in range(n_heads)]
    inv_d = 1.0 / d_model
    pad = (ksize - 1) // 2

    def layer_norm(y, g, b):
        # y has zeros in padded lanes; statistics over the real d_model channels
        mu = jnp.sum(y, axis=-1, keepdims=True) * inv_d
        c = jnp.where(ch_mask, y - mu, 0.0)
        var = jnp.sum(c * c, axis=-1, keepdims=True) * inv_d
        return c * jax.lax.rsqrt(var + 1e-5) * g + b

    def conv1d(y, w_ref_full, li_, b):
        # 'same' Conv1d as ONE im2col matmul: K sublane-rolled copies (edge/batch
        # boundaries zeroed by precomputed masks) concatenated along lanes.
        taps = []
        for k in range(ksize):
            off = k - pad
            if off == 0:
                taps.append(y)
            else:
                sh = pltpu.roll(y, shift=(-off) % bt, axis=0)   # non-negative shift
                taps.append(sh * em_ref[k])                      # zero wrapped rows
        im2col = jnp.concatenate(taps, axis=-1).astype(jnp.bfloat16)   # (BT, K*width)
        return jnp.dot(im2col, w_ref_full[li_],
                       preferred_element_type=jnp.float32) + b

    for li in range(n_layers):
        # ---------- multi-head self-attention + residual + LayerNorm ----------
        xb = h.astype(jnp.bfloat16)
        qkv = (jnp.dot(xb, wqkv_ref[li], preferred_element_type=jnp.float32)
               + bqkv_ref[li]).astype(jnp.bfloat16)        # (BT, 3*DP), scale pre-folded
        q = qkv[:, :d_pad]
        k = qkv[:, d_pad:2 * d_pad]
        v = qkv[:, 2 * d_pad:3 * d_pad]

        ctx = None
        for hh in range(n_heads):
            qh = jnp.where(head_masks[hh], q, jnp.zeros_like(q))
            s = jax.lax.dot_general(qh, k, (((1,), (1,)), ((), ())),
                                    preferred_element_type=jnp.float32)   # (BT, BT)
            s = s + attn_bias                              # block-diag + key padding
            s = s - jnp.max(s, axis=-1, keepdims=True)
            p = jnp.exp(s)
            p = p * pl.reciprocal(jnp.sum(p, axis=-1, keepdims=True), approx=True)
            ch = jnp.dot(p.astype(jnp.bfloat16), v, preferred_element_type=jnp.float32)
            ch = jnp.where(head_masks[hh], ch, 0.0)        # keep only head-h lanes
            ctx = ch if ctx is None else ctx + ch
        attn = jnp.dot(ctx.astype(jnp.bfloat16), wo_ref[li],
                       preferred_element_type=jnp.float32) + bo_ref[li]
        h = layer_norm(h + attn, g1_ref[li], be1_ref[li])

        # ---------- convolutional feed-forward + residual + LayerNorm ---------
        ff = jnp.maximum(conv1d(h, w1_ref, li, b1_ref[li]), 0.0)    # ReLU
        cv = conv1d(ff, w2_ref, li, b2_ref[li])
        h = layer_norm(h + cv, g2_ref[li], be2_ref[li])

    # ---- final linear (output lanes >= OUT_SIZE are zero; sliced in wrapper)
    o_ref[...] = jnp.dot(h.astype(jnp.bfloat16), lw_ref[...],
                         preferred_element_type=jnp.float32) + lb_ref[...]


# ------------------------------- wrapper -----------------------------------
def fastspeech2_decoder(x, mask, packed):
    """x: (B, T, D_MODEL) f32; mask: (B, T) f32 (1=valid, 0=pad)."""
    b, t, d = x.shape
    bt = b * t
    scale = math.sqrt(d)

    # lane-dense input, batch folded into sublanes
    xp = jnp.pad(x, ((0, 0), (0, 0), (0, DP - d))).reshape(bt, DP)
    pe_bt = jnp.tile(packed["pe"], (b, 1))                           # (BT, DP)

    # additive attention bias: -1e9 for cross-batch or padded keys
    same_batch = jnp.kron(jnp.eye(b, dtype=jnp.float32),
                          jnp.ones((t, t), jnp.float32))             # (BT, BT)
    key_valid = jnp.tile(mask.astype(jnp.float32).reshape(1, bt), (bt, 1))
    attn_bias = (1.0 - same_batch * key_valid) * (-1e9)              # (BT, BT)

    # conv edge masks: zero rows whose rolled tap wrapped across a seq/batch boundary
    pad_k = (KSIZE - 1) // 2
    r = jnp.arange(t)
    em = []
    for k in range(KSIZE):
        off = k - pad_k
        if off < 0:
            m = (r >= -off)
        elif off > 0:
            m = (r < t - off)
        else:
            m = jnp.ones((t,), bool)
        em.append(jnp.tile(m.astype(jnp.float32), (b,)))
    edge_masks = jnp.stack(em, 0)[:, :, None]                        # (K, BT, 1)

    kernel = functools.partial(
        fused_decoder_kernel,
        n_layers=N_LAYERS, n_heads=N_HEADS, ksize=KSIZE,
        d_model=d, d_head=d // N_HEADS, d_pad=DP, scale=scale)

    vmem = pl.BlockSpec(memory_space=pltpu.MemorySpace.VMEM)
    out = pl.pallas_call(
        kernel,
        out_shape=jax.ShapeDtypeStruct((bt, OP), jnp.float32),
        in_specs=[vmem] * 18,
        out_specs=vmem,
    )(xp, pe_bt, attn_bias, edge_masks,
      packed["wqkv"], packed["bqkv"], packed["wo"], packed["bo"],
      packed["g1"], packed["be1"],
      packed["w1"], packed["b1"], packed["w2"], packed["b2"],
      packed["g2"], packed["be2"],
      packed["lw"], packed["lb"])

    return out.reshape(b, t, OP)[..., :OUT_SIZE]


# --------------------------- parameter handling -----------------------------
def sinusoidal_pe(t, d):
    pos = jnp.arange(t, dtype=jnp.float32)[:, None]
    div = jnp.exp(jnp.arange(0, d, 2, dtype=jnp.float32) * (-math.log(10000.0) / d))
    pe = jnp.zeros((t, d), jnp.float32)
    pe = pe.at[:, 0::2].set(jnp.sin(pos * div))
    pe = pe.at[:, 1::2].set(jnp.cos(pos * div))
    return pe


def make_params(key):
    """Logical (torch-equivalent) parameters."""
    def nrm(k, shape, s=0.05):
        return jax.random.normal(k, shape, jnp.float32) * s

    keys = jax.random.split(key, 2 + N_LAYERS)
    layers = []
    for li in range(N_LAYERS):
        ks = jax.random.split(keys[li], 12)
        layers.append(dict(
            wq=nrm(ks[0], (D_MODEL, D_MODEL)), bq=nrm(ks[1], (1, D_MODEL)),
            wk=nrm(ks[2], (D_MODEL, D_MODEL)), bk=nrm(ks[3], (1, D_MODEL)),
            wv=nrm(ks[4], (D_MODEL, D_MODEL)), bv=nrm(ks[5], (1, D_MODEL)),
            wo=nrm(ks[6], (D_MODEL, D_MODEL)), bo=nrm(ks[7], (1, D_MODEL)),
            ln1_g=jnp.ones((1, D_MODEL), jnp.float32),
            ln1_b=jnp.zeros((1, D_MODEL), jnp.float32),
            # conv weights stored as (K, C_in, C_out)  (= torch (C_out, C_in, K) transposed)
            w1=nrm(ks[8], (KSIZE, D_MODEL, D_FF)), b1=nrm(ks[9], (1, D_FF)),
            w2=nrm(ks[10], (KSIZE, D_FF, D_MODEL)), b2=nrm(ks[11], (1, D_MODEL)),
            ln2_g=jnp.ones((1, D_MODEL), jnp.float32),
            ln2_b=jnp.zeros((1, D_MODEL), jnp.float32),
        ))
    kw, kb = jax.random.split(keys[-1])
    return dict(
        pe=sinusoidal_pe(T, D_MODEL),
        layers=layers,
        lin_w=nrm(kw, (D_MODEL, OUT_SIZE)),   # (d_model, output_size)
        lin_b=nrm(kb, (1, OUT_SIZE)),
    )


def _pad_to(a, shape):
    pads = [(0, s - d) for d, s in zip(a.shape, shape)]
    return jnp.pad(a, pads)   # zero padding (keeps padded lanes/channels at 0)


def pack_params(params):
    """Pad to lane-dense 128 widths, fuse QKV, im2col conv weights, stack layers."""
    inv_sqrt_dh = 1.0 / math.sqrt(DH)

    def stack(fn):
        return jnp.stack([fn(lp) for lp in params["layers"]], axis=0)

    def qkv_w(lp):   # (DP, 3*DP), 1/sqrt(d_head) folded into the Q projection
        return jnp.concatenate([_pad_to(lp["wq"] * inv_sqrt_dh, (DP, DP)),
                                _pad_to(lp["wk"], (DP, DP)),
                                _pad_to(lp["wv"], (DP, DP))], axis=-1)

    def qkv_b(lp):   # (1, 3*DP)
        return jnp.concatenate([_pad_to(lp["bq"] * inv_sqrt_dh, (1, DP)),
                                _pad_to(lp["bk"], (1, DP)),
                                _pad_to(lp["bv"], (1, DP))], axis=-1)

    def conv_w(w, cin_p, cout_p):   # (K, Cin, Cout) -> (K*cin_p, cout_p), tap-major rows
        return jnp.concatenate([_pad_to(w[k], (cin_p, cout_p)) for k in range(KSIZE)],
                               axis=0)

    return dict(
        pe=_pad_to(params["pe"], (T, DP)),
        wqkv=stack(qkv_w).astype(jnp.bfloat16),
        bqkv=stack(qkv_b),
        wo=stack(lambda lp: _pad_to(lp["wo"], (DP, DP))).astype(jnp.bfloat16),
        bo=stack(lambda lp: _pad_to(lp["bo"], (1, DP))),
        g1=stack(lambda lp: _pad_to(lp["ln1_g"], (1, DP))),
        be1=stack(lambda lp: _pad_to(lp["ln1_b"], (1, DP))),
        w1=stack(lambda lp: conv_w(lp["w1"], DP, FP)).astype(jnp.bfloat16),
        b1=stack(lambda lp: _pad_to(lp["b1"], (1, FP))),
        w2=stack(lambda lp: conv_w(lp["w2"], FP, DP)).astype(jnp.bfloat16),
        b2=stack(lambda lp: _pad_to(lp["b2"], (1, DP))),
        g2=stack(lambda lp: _pad_to(lp["ln2_g"], (1, DP))),
        be2=stack(lambda lp: _pad_to(lp["ln2_b"], (1, DP))),
        lw=_pad_to(params["lin_w"], (DP, OP)).astype(jnp.bfloat16),
        lb=_pad_to(params["lin_b"], (1, OP)),
    )


# --------------------------------- main --------------------------------------
if __name__ == "__main__":
    key = jax.random.PRNGKey(0)
    kx, kp = jax.random.split(key)

    x = jax.random.normal(kx, (B, T, D_MODEL), jnp.float32)
    lengths = jnp.array([T, T - 4], jnp.int32)
    mask = (jnp.arange(T)[None, :] < lengths[:, None]).astype(jnp.float32)  # (B, T)

    params = make_params(kp)
    packed = pack_params(params)          # one-time host-side weight prep

    out = fastspeech2_decoder(x, mask, packed)
    out = jax.block_until_ready(out)

    assert out.shape == (B, T, OUT_SIZE), out.shape
    assert bool(jnp.all(jnp.isfinite(out)))
    print("KERNEL_OK")
</pallas_src>

<mosaic_0001>
module attributes {stable_mosaic.version = 11 : i64} {
  func.func @fused_decoder_kernel(%arg0: memref<32x128xf32, #tpu.memory_space<vmem>>, %arg1: memref<32x128xf32, #tpu.memory_space<vmem>>, %arg2: memref<32x32xf32, #tpu.memory_space<vmem>>, %arg3: memref<3x32x1xf32, #tpu.memory_space<vmem>>, %arg4: memref<2x128x384xbf16, #tpu.memory_space<vmem>>, %arg5: memref<2x1x384xf32, #tpu.memory_space<vmem>>, %arg6: memref<2x128x128xbf16, #tpu.memory_space<vmem>>, %arg7: memref<2x1x128xf32, #tpu.memory_space<vmem>>, %arg8: memref<2x1x128xf32, #tpu.memory_space<vmem>>, %arg9: memref<2x1x128xf32, #tpu.memory_space<vmem>>, %arg10: memref<2x384x128xbf16, #tpu.memory_space<vmem>>, %arg11: memref<2x1x128xf32, #tpu.memory_space<vmem>>, %arg12: memref<2x384x128xbf16, #tpu.memory_space<vmem>>, %arg13: memref<2x1x128xf32, #tpu.memory_space<vmem>>, %arg14: memref<2x1x128xf32, #tpu.memory_space<vmem>>, %arg15: memref<2x1x128xf32, #tpu.memory_space<vmem>>, %arg16: memref<128x128xbf16, #tpu.memory_space<vmem>>, %arg17: memref<1x128xf32, #tpu.memory_space<vmem>>, %arg18: memref<32x128xf32, #tpu.memory_space<vmem>>) attributes {dimension_semantics = [], scalar_prefetch = 0 : i64, scratch_operands = 0 : i64, tpu.core_type = #tpu.core_type<tc>} {
    %c0 = arith.constant 0 : index
    %c0_0 = arith.constant 0 : index
    %0 = vector.load %arg0[%c0, %c0_0] : memref<32x128xf32, #tpu.memory_space<vmem>>, vector<32x128xf32>
    %cst = arith.constant 5.65685415 : f32
    %1 = vector.broadcast %cst : f32 to vector<32x128xf32>
    %2 = arith.mulf %0, %1 : vector<32x128xf32>
    %c0_1 = arith.constant 0 : index
    %c0_2 = arith.constant 0 : index
    %3 = vector.load %arg1[%c0_1, %c0_2] : memref<32x128xf32, #tpu.memory_space<vmem>>, vector<32x128xf32>
    %4 = arith.addf %2, %3 : vector<32x128xf32>
    %c0_3 = arith.constant 0 : index
    %c0_4 = arith.constant 0 : index
    %5 = vector.load %arg2[%c0_3, %c0_4] : memref<32x32xf32, #tpu.memory_space<vmem>>, vector<32x32xf32>
    %6 = tpu.iota {dimensions = array<i32: 1>} : vector<1x128xi32>
    %c32_i32 = arith.constant 32 : i32
    %7 = vector.broadcast %c32_i32 : i32 to vector<1x128xi32>
    %8 = arith.cmpi slt, %6, %7 : vector<1x128xi32>
    %c0_i32 = arith.constant 0 : i32
    %9 = vector.broadcast %c0_i32 : i32 to vector<1x128xi32>
    %10 = arith.cmpi sge, %6, %9 : vector<1x128xi32>
    %c16_i32 = arith.constant 16 : i32
    %11 = vector.broadcast %c16_i32 : i32 to vector<1x128xi32>
    %12 = arith.cmpi slt, %6, %11 : vector<1x128xi32>
    %13 = arith.andi %10, %12 : vector<1x128xi1>
    %c16_i32_5 = arith.constant 16 : i32
    %14 = vector.broadcast %c16_i32_5 : i32 to vector<1x128xi32>
    %15 = arith.cmpi sge, %6, %14 : vector<1x128xi32>
    %c32_i32_6 = arith.constant 32 : i32
    %16 = vector.broadcast %c32_i32_6 : i32 to vector<1x128xi32>
    %17 = arith.cmpi slt, %6, %16 : vector<1x128xi32>
    %18 = arith.andi %15, %17 : vector<1x128xi1>
    %19 = arith.truncf %4 : vector<32x128xf32> to vector<32x128xbf16>
    %c0_7 = arith.constant 0 : index
    %c0_8 = arith.constant 0 : index
    %c0_9 = arith.constant 0 : index
    %20 = vector.load %arg4[%c0_7, %c0_8, %c0_9] : memref<2x128x384xbf16, #tpu.memory_space<vmem>>, vector<1x128x384xbf16>
    %21 = vector.shape_cast %20 : vector<1x128x384xbf16> to vector<128x384xbf16>
    %cst_10 = arith.constant dense<0.000000e+00> : vector<32x384xf32>
    %22 = tpu.matmul %19, %21, %cst_10 {dimension_numbers = #tpu.dot_dimension_numbers<[1], [0], [0], [1], [0, 0, 1, 1], [], []>} : vector<32x128xbf16>, vector<128x384xbf16>, vector<32x384xf32> -> vector<32x384xf32>
    %c0_11 = arith.constant 0 : index
    %c0_12 = arith.constant 0 : index
    %c0_13 = arith.constant 0 : index
    %23 = vector.load %arg5[%c0_11, %c0_12, %c0_13] : memref<2x1x384xf32, #tpu.memory_space<vmem>>, vector<1x1x384xf32>
    %24 = vector.shape_cast %23 : vector<1x1x384xf32> to vector<1x384xf32>
    %25 = vector.broadcast %24 : vector<1x384xf32> to vector<32x384xf32>
    %26 = arith.addf %22, %25 : vector<32x384xf32>
    %27 = arith.truncf %26 : vector<32x384xf32> to vector<32x384xbf16>
    %28 = vector.extract_strided_slice %27 {offsets = [0, 0], sizes = [32, 128], strides = [1, 1]} : vector<32x384xbf16> to vector<32x128xbf16>
    %29 = vector.extract_strided_slice %27 {offsets = [0, 128], sizes = [32, 128], strides = [1, 1]} : vector<32x384xbf16> to vector<32x128xbf16>
    %30 = vector.extract_strided_slice %27 {offsets = [0, 256], sizes = [32, 128], strides = [1, 1]} : vector<32x384xbf16> to vector<32x128xbf16>
    %cst_14 = arith.constant 0.000000e+00 : bf16
    %31 = vector.broadcast %cst_14 : bf16 to vector<32x128xbf16>
    %32 = vector.shape_cast %13 : vector<1x128xi1> to vector<1x128xi1>
    %33 = vector.broadcast %32 : vector<1x128xi1> to vector<32x128xi1>
    %34 = arith.select %33, %28, %31 : vector<32x128xi1>, vector<32x128xbf16>
    %cst_15 = arith.constant dense<0.000000e+00> : vector<32x32xf32>
    %35 = tpu.matmul %34, %29, %cst_15 {dimension_numbers = #tpu.dot_dimension_numbers<[1], [1], [0], [0], [0, 0, 1, 0], [], []>} : vector<32x128xbf16>, vector<32x128xbf16>, vector<32x32xf32> -> vector<32x32xf32>
    %36 = arith.addf %35, %5 : vector<32x32xf32>
    %cst_16 = arith.constant dense<0xFF800000> : vector<32xf32>
    %37 = vector.multi_reduction <maximumf>, %36, %cst_16 [1] : vector<32x32xf32> to vector<32xf32>
    %38 = vector.shape_cast %37 : vector<32xf32> to vector<32x1xf32>
    %39 = vector.broadcast %38 : vector<32x1xf32> to vector<32x32xf32>
    %40 = arith.subf %36, %39 : vector<32x32xf32>
    %41 = math.exp %40 : vector<32x32xf32>
    %cst_17 = arith.constant dense<0.000000e+00> : vector<32xf32>
    %42 = vector.multi_reduction <add>, %41, %cst_17 [1] : vector<32x32xf32> to vector<32xf32>
    %43 = vector.shape_cast %42 : vector<32xf32> to vector<32x1xf32>
    %44 = tpu.reciprocal %43 {approx = true} : vector<32x1xf32> -> vector<32x1xf32>
    %45 = vector.broadcast %44 : vector<32x1xf32> to vector<32x32xf32>
    %46 = arith.mulf %41, %45 : vector<32x32xf32>
    %47 = arith.truncf %46 : vector<32x32xf32> to vector<32x32xbf16>
    %cst_18 = arith.constant dense<0.000000e+00> : vector<32x128xf32>
    %48 = tpu.matmul %47, %30, %cst_18 {dimension_numbers = #tpu.dot_dimension_numbers<[1], [0], [0], [1], [0, 0, 1, 1], [], []>} : vector<32x32xbf16>, vector<32x128xbf16>, vector<32x128xf32> -> vector<32x128xf32>
    %cst_19 = arith.constant 0.000000e+00 : f32
    %49 = vector.shape_cast %13 : vector<1x128xi1> to vector<1x128xi1>
    %50 = vector.broadcast %49 : vector<1x128xi1> to vector<32x128xi1>
    %51 = vector.broadcast %cst_19 : f32 to vector<32x128xf32>
    %52 = arith.select %50, %48, %51 : vector<32x128xi1>, vector<32x128xf32>
    %cst_20 = arith.constant 0.000000e+00 : bf16
    %53 = vector.broadcast %cst_20 : bf16 to vector<32x128xbf16>
    %54 = vector.shape_cast %18 : vector<1x128xi1> to vector<1x128xi1>
    %55 = vector.broadcast %54 : vector<1x128xi1> to vector<32x128xi1>
    %56 = arith.select %55, %28, %53 : vector<32x128xi1>, vector<32x128xbf16>
    %cst_21 = arith.constant dense<0.000000e+00> : vector<32x32xf32>
    %57 = tpu.matmul %56, %29, %cst_21 {dimension_numbers = #tpu.dot_dimension_numbers<[1], [1], [0], [0], [0, 0, 1, 0], [], []>} : vector<32x128xbf16>, vector<32x128xbf16>, vector<32x32xf32> -> vector<32x32xf32>
    %58 = arith.addf %57, %5 : vector<32x32xf32>
    %cst_22 = arith.constant dense<0xFF800000> : vector<32xf32>
    %59 = vector.multi_reduction <maximumf>, %58, %cst_22 [1] : vector<32x32xf32> to vector<32xf32>
    %60 = vector.shape_cast %59 : vector<32xf32> to vector<32x1xf32>
    %61 = vector.broadcast %60 : vector<32x1xf32> to vector<32x32xf32>
    %62 = arith.subf %58, %61 : vector<32x32xf32>
    %63 = math.exp %62 : vector<32x32xf32>
    %cst_23 = arith.constant dense<0.000000e+00> : vector<32xf32>
    %64 = vector.multi_reduction <add>, %63, %cst_23 [1] : vector<32x32xf32> to vector<32xf32>
    %65 = vector.shape_cast %64 : vector<32xf32> to vector<32x1xf32>
    %66 = tpu.reciprocal %65 {approx = true} : vector<32x1xf32> -> vector<32x1xf32>
    %67 = vector.broadcast %66 : vector<32x1xf32> to vector<32x32xf32>
    %68 = arith.mulf %63, %67 : vector<32x32xf32>
    %69 = arith.truncf %68 : vector<32x32xf32> to vector<32x32xbf16>
    %cst_24 = arith.constant dense<0.000000e+00> : vector<32x128xf32>
    %70 = tpu.matmul %69, %30, %cst_24 {dimension_numbers = #tpu.dot_dimension_numbers<[1], [0], [0], [1], [0, 0, 1, 1], [], []>} : vector<32x32xbf16>, vector<32x128xbf16>, vector<32x128xf32> -> vector<32x128xf32>
    %cst_25 = arith.constant 0.000000e+00 : f32
    %71 = vector.shape_cast %18 : vector<1x128xi1> to vector<1x128xi1>
    %72 = vector.broadcast %71 : vector<1x128xi1> to vector<32x128xi1>
    %73 = vector.broadcast %cst_25 : f32 to vector<32x128xf32>
    %74 = arith.select %72, %70, %73 : vector<32x128xi1>, vector<32x128xf32>
    %75 = arith.addf %52, %74 : vector<32x128xf32>
    %76 = arith.truncf %75 : vector<32x128xf32> to vector<32x128xbf16>
    %c0_26 = arith.constant 0 : index
    %c0_27 = arith.constant 0 : index
    %c0_28 = arith.constant 0 : index
    %77 = vector.load %arg6[%c0_26, %c0_27, %c0_28] : memref<2x128x128xbf16, #tpu.memory_space<vmem>>, vector<1x128x128xbf16>
    %78 = vector.shape_cast %77 : vector<1x128x128xbf16> to vector<128x128xbf16>
    %cst_29 = arith.constant dense<0.000000e+00> : vector<32x128xf32>
    %79 = tpu.matmul %76, %78, %cst_29 {dimension_numbers = #tpu.dot_dimension_numbers<[1], [0], [0], [1], [0, 0, 1, 1], [], []>} : vector<32x128xbf16>, vector<128x128xbf16>, vector<32x128xf32> -> vector<32x128xf32>
    %c0_30 = arith.constant 0 : index
    %c0_31 = arith.constant 0 : index
    %c0_32 = arith.constant 0 : index
    %80 = vector.load %arg7[%c0_30, %c0_31, %c0_32] : memref<2x1x128xf32, #tpu.memory_space<vmem>>, vector<1x1x128xf32>
    %81 = vector.shape_cast %80 : vector<1x1x128xf32> to vector<1x128xf32>
    %82 = vector.broadcast %81 : vector<1x128xf32> to vector<32x128xf32>
    %83 = arith.addf %79, %82 : vector<32x128xf32>
    %84 = arith.addf %4, %83 : vector<32x128xf32>
    %c0_33 = arith.constant 0 : index
    %c0_34 = arith.constant 0 : index
    %c0_35 = arith.constant 0 : index
    %85 = vector.load %arg8[%c0_33, %c0_34, %c0_35] : memref<2x1x128xf32, #tpu.memory_space<vmem>>, vector<1x1x128xf32>
    %86 = vector.shape_cast %85 : vector<1x1x128xf32> to vector<1x128xf32>
    %c0_36 = arith.constant 0 : index
    %c0_37 = arith.constant 0 : index
    %c0_38 = arith.constant 0 : index
    %87 = vector.load %arg9[%c0_36, %c0_37, %c0_38] : memref<2x1x128xf32, #tpu.memory_space<vmem>>, vector<1x1x128xf32>
    %88 = vector.shape_cast %87 : vector<1x1x128xf32> to vector<1x128xf32>
    %cst_39 = arith.constant dense<0.000000e+00> : vector<32xf32>
    %89 = vector.multi_reduction <add>, %84, %cst_39 [1] : vector<32x128xf32> to vector<32xf32>
    %90 = vector.shape_cast %89 : vector<32xf32> to vector<32x1xf32>
    %cst_40 = arith.constant 3.125000e-02 : f32
    %91 = vector.broadcast %cst_40 : f32 to vector<32x1xf32>
    %92 = arith.mulf %90, %91 : vector<32x1xf32>
    %93 = vector.broadcast %92 : vector<32x1xf32> to vector<32x128xf32>
    %94 = arith.subf %84, %93 : vector<32x128xf32>
    %cst_41 = arith.constant 0.000000e+00 : f32
    %95 = vector.shape_cast %8 : vector<1x128xi1> to vector<1x128xi1>
    %96 = vector.broadcast %95 : vector<1x128xi1> to vector<32x128xi1>
    %97 = vector.broadcast %cst_41 : f32 to vector<32x128xf32>
    %98 = arith.select %96, %94, %97 : vector<32x128xi1>, vector<32x128xf32>
    %99 = arith.mulf %98, %98 : vector<32x128xf32>
    %cst_42 = arith.constant dense<0.000000e+00> : vector<32xf32>
    %100 = vector.multi_reduction <add>, %99, %cst_42 [1] : vector<32x128xf32> to vector<32xf32>
    %101 = vector.shape_cast %100 : vector<32xf32> to vector<32x1xf32>
    %cst_43 = arith.constant 3.125000e-02 : f32
    %102 = vector.broadcast %cst_43 : f32 to vector<32x1xf32>
    %103 = arith.mulf %101, %102 : vector<32x1xf32>
    %cst_44 = arith.constant 9.99999974E-6 : f32
    %104 = vector.broadcast %cst_44 : f32 to vector<32x1xf32>
    %105 = arith.addf %103, %104 : vector<32x1xf32>
    %106 = math.rsqrt %105 : vector<32x1xf32>
    %107 = vector.broadcast %106 : vector<32x1xf32> to vector<32x128xf32>
    %108 = arith.mulf %98, %107 : vector<32x128xf32>
    %109 = vector.broadcast %86 : vector<1x128xf32> to vector<32x128xf32>
    %110 = arith.mulf %108, %109 : vector<32x128xf32>
    %111 = vector.broadcast %88 : vector<1x128xf32> to vector<32x128xf32>
    %112 = arith.addf %110, %111 : vector<32x128xf32>
    %c0_45 = arith.constant 0 : index
    %c0_46 = arith.constant 0 : index
    %c0_47 = arith.constant 0 : index
    %113 = vector.load %arg11[%c0_45, %c0_46, %c0_47] : memref<2x1x128xf32, #tpu.memory_space<vmem>>, vector<1x1x128xf32>
    %114 = vector.shape_cast %113 : vector<1x1x128xf32> to vector<1x128xf32>
    %c1_i32 = arith.constant 1 : i32
    %115 = tpu.dynamic_rotate %112 by %c1_i32 dim 0 : vector<32x128xf32>, i32 -> vector<32x128xf32>
    %c0_48 = arith.constant 0 : index
    %c0_49 = arith.constant 0 : index
    %c0_50 = arith.constant 0 : index
    %116 = vector.load %arg3[%c0_48, %c0_49, %c0_50] : memref<3x32x1xf32, #tpu.memory_space<vmem>>, vector<1x32x1xf32>
    %117 = vector.shape_cast %116 : vector<1x32x1xf32> to vector<32x1xf32>
    %118 = vector.broadcast %117 : vector<32x1xf32> to vector<32x128xf32>
    %119 = arith.mulf %115, %118 : vector<32x128xf32>
    %c31_i32 = arith.constant 31 : i32
    %120 = tpu.dynamic_rotate %112 by %c31_i32 dim 0 : vector<32x128xf32>, i32 -> vector<32x128xf32>
    %c2 = arith.constant 2 : index
    %c0_51 = arith.constant 0 : index
    %c0_52 = arith.constant 0 : index
    %121 = vector.load %arg3[%c2, %c0_51, %c0_52] : memref<3x32x1xf32, #tpu.memory_space<vmem>>, vector<1x32x1xf32>
    %122 = vector.shape_cast %121 : vector<1x32x1xf32> to vector<32x1xf32>
    %123 = vector.broadcast %122 : vector<32x1xf32> to vector<32x128xf32>
    %124 = arith.mulf %120, %123 : vector<32x128xf32>
    %125 = tpu.concatenate %119, %112, %124 in 1 : vector<32x128xf32>, vector<32x128xf32>, vector<32x128xf32> -> vector<32x384xf32>
    %126 = arith.truncf %125 : vector<32x384xf32> to vector<32x384xbf16>
    %c0_53 = arith.constant 0 : index
    %c0_54 = arith.constant 0 : index
    %c0_55 = arith.constant 0 : index
    %127 = vector.load %arg10[%c0_53, %c0_54, %c0_55] : memref<2x384x128xbf16, #tpu.memory_space<vmem>>, vector<1x384x128xbf16>
    %128 = vector.shape_cast %127 : vector<1x384x128xbf16> to vector<384x128xbf16>
    %cst_56 = arith.constant dense<0.000000e+00> : vector<32x128xf32>
    %129 = tpu.matmul %126, %128, %cst_56 {dimension_numbers = #tpu.dot_dimension_numbers<[1], [0], [0], [1], [0, 0, 1, 1], [], []>} : vector<32x384xbf16>, vector<384x128xbf16>, vector<32x128xf32> -> vector<32x128xf32>
    %130 = vector.broadcast %114 : vector<1x128xf32> to vector<32x128xf32>
    %131 = arith.addf %129, %130 : vector<32x128xf32>
    %cst_57 = arith.constant 0.000000e+00 : f32
    %132 = vector.broadcast %cst_57 : f32 to vector<32x128xf32>
    %133 = arith.maximumf %131, %132 : vector<32x128xf32>
    %c0_58 = arith.constant 0 : index
    %c0_59 = arith.constant 0 : index
    %c0_60 = arith.constant 0 : index
    %134 = vector.load %arg13[%c0_58, %c0_59, %c0_60] : memref<2x1x128xf32, #tpu.memory_space<vmem>>, vector<1x1x128xf32>
    %135 = vector.shape_cast %134 : vector<1x1x128xf32> to vector<1x128xf32>
    %c1_i32_61 = arith.constant 1 : i32
    %136 = tpu.dynamic_rotate %133 by %c1_i32_61 dim 0 : vector<32x128xf32>, i32 -> vector<32x128xf32>
    %c0_62 = arith.constant 0 : index
    %c0_63 = arith.constant 0 : index
    %c0_64 = arith.constant 0 : index
    %137 = vector.load %arg3[%c0_62, %c0_63, %c0_64] : memref<3x32x1xf32, #tpu.memory_space<vmem>>, vector<1x32x1xf32>
    %138 = vector.shape_cast %137 : vector<1x32x1xf32> to vector<32x1xf32>
    %139 = vector.broadcast %138 : vector<32x1xf32> to vector<32x128xf32>
    %140 = arith.mulf %136, %139 : vector<32x128xf32>
    %c31_i32_65 = arith.constant 31 : i32
    %141 = tpu.dynamic_rotate %133 by %c31_i32_65 dim 0 : vector<32x128xf32>, i32 -> vector<32x128xf32>
    %c2_66 = arith.constant 2 : index
    %c0_67 = arith.constant 0 : index
    %c0_68 = arith.constant 0 : index
    %142 = vector.load %arg3[%c2_66, %c0_67, %c0_68] : memref<3x32x1xf32, #tpu.memory_space<vmem>>, vector<1x32x1xf32>
    %143 = vector.shape_cast %142 : vector<1x32x1xf32> to vector<32x1xf32>
    %144 = vector.broadcast %143 : vector<32x1xf32> to vector<32x128xf32>
    %145 = arith.mulf %141, %144 : vector<32x128xf32>
    %146 = tpu.concatenate %140, %133, %145 in 1 : vector<32x128xf32>, vector<32x128xf32>, vector<32x128xf32> -> vector<32x384xf32>
    %147 = arith.truncf %146 : vector<32x384xf32> to vector<32x384xbf16>
    %c0_69 = arith.constant 0 : index
    %c0_70 = arith.constant 0 : index
    %c0_71 = arith.constant 0 : index
    %148 = vector.load %arg12[%c0_69, %c0_70, %c0_71] : memref<2x384x128xbf16, #tpu.memory_space<vmem>>, vector<1x384x128xbf16>
    %149 = vector.shape_cast %148 : vector<1x384x128xbf16> to vector<384x128xbf16>
    %cst_72 = arith.constant dense<0.000000e+00> : vector<32x128xf32>
    %150 = tpu.matmul %147, %149, %cst_72 {dimension_numbers = #tpu.dot_dimension_numbers<[1], [0], [0], [1], [0, 0, 1, 1], [], []>} : vector<32x384xbf16>, vector<384x128xbf16>, vector<32x128xf32> -> vector<32x128xf32>
    %151 = vector.broadcast %135 : vector<1x128xf32> to vector<32x128xf32>
    %152 = arith.addf %150, %151 : vector<32x128xf32>
    %153 = arith.addf %112, %152 : vector<32x128xf32>
    %c0_73 = arith.constant 0 : index
    %c0_74 = arith.constant 0 : index
    %c0_75 = arith.constant 0 : index
    %154 = vector.load %arg14[%c0_73, %c0_74, %c0_75] : memref<2x1x128xf32, #tpu.memory_space<vmem>>, vector<1x1x128xf32>
    %155 = vector.shape_cast %154 : vector<1x1x128xf32> to vector<1x128xf32>
    %c0_76 = arith.constant 0 : index
    %c0_77 = arith.constant 0 : index
    %c0_78 = arith.constant 0 : index
    %156 = vector.load %arg15[%c0_76, %c0_77, %c0_78] : memref<2x1x128xf32, #tpu.memory_space<vmem>>, vector<1x1x128xf32>
    %157 = vector.shape_cast %156 : vector<1x1x128xf32> to vector<1x128xf32>
    %cst_79 = arith.constant dense<0.000000e+00> : vector<32xf32>
    %158 = vector.multi_reduction <add>, %153, %cst_79 [1] : vector<32x128xf32> to vector<32xf32>
    %159 = vector.shape_cast %158 : vector<32xf32> to vector<32x1xf32>
    %cst_80 = arith.constant 3.125000e-02 : f32
    %160 = vector.broadcast %cst_80 : f32 to vector<32x1xf32>
    %161 = arith.mulf %159, %160 : vector<32x1xf32>
    %162 = vector.broadcast %161 : vector<32x1xf32> to vector<32x128xf32>
    %163 = arith.subf %153, %162 : vector<32x128xf32>
    %cst_81 = arith.constant 0.000000e+00 : f32
    %164 = vector.shape_cast %8 : vector<1x128xi1> to vector<1x128xi1>
    %165 = vector.broadcast %164 : vector<1x128xi1> to vector<32x128xi1>
    %166 = vector.broadcast %cst_81 : f32 to vector<32x128xf32>
    %167 = arith.select %165, %163, %166 : vector<32x128xi1>, vector<32x128xf32>
    %168 = arith.mulf %167, %167 : vector<32x128xf32>
    %cst_82 = arith.constant dense<0.000000e+00> : vector<32xf32>
    %169 = vector.multi_reduction <add>, %168, %cst_82 [1] : vector<32x128xf32> to vector<32xf32>
    %170 = vector.shape_cast %169 : vector<32xf32> to vector<32x1xf32>
    %cst_83 = arith.constant 3.125000e-02 : f32
    %171 = vector.broadcast %cst_83 : f32 to vector<32x1xf32>
    %172 = arith.mulf %170, %171 : vector<32x1xf32>
    %cst_84 = arith.constant 9.99999974E-6 : f32
    %173 = vector.broadcast %cst_84 : f32 to vector<32x1xf32>
    %174 = arith.addf %172, %173 : vector<32x1xf32>
    %175 = math.rsqrt %174 : vector<32x1xf32>
    %176 = vector.broadcast %175 : vector<32x1xf32> to vector<32x128xf32>
    %177 = arith.mulf %167, %176 : vector<32x128xf32>
    %178 = vector.broadcast %155 : vector<1x128xf32> to vector<32x128xf32>
    %179 = arith.mulf %177, %178 : vector<32x128xf32>
    %180 = vector.broadcast %157 : vector<1x128xf32> to vector<32x128xf32>
    %181 = arith.addf %179, %180 : vector<32x128xf32>
    %182 = arith.truncf %181 : vector<32x128xf32> to vector<32x128xbf16>
    %c1 = arith.constant 1 : index
    %c0_85 = arith.constant 0 : index
    %c0_86 = arith.constant 0 : index
    %183 = vector.load %arg4[%c1, %c0_85, %c0_86] : memref<2x128x384xbf16, #tpu.memory_space<vmem>>, vector<1x128x384xbf16>
    %184 = vector.shape_cast %183 : vector<1x128x384xbf16> to vector<128x384xbf16>
    %cst_87 = arith.constant dense<0.000000e+00> : vector<32x384xf32>
    %185 = tpu.matmul %182, %184, %cst_87 {dimension_numbers = #tpu.dot_dimension_numbers<[1], [0], [0], [1], [0, 0, 1, 1], [], []>} : vector<32x128xbf16>, vector<128x384xbf16>, vector<32x384xf32> -> vector<32x384xf32>
    %c1_88 = arith.constant 1 : index
    %c0_89 = arith.constant 0 : index
    %c0_90 = arith.constant 0 : index
    %186 = vector.load %arg5[%c1_88, %c0_89, %c0_90] : memref<2x1x384xf32, #tpu.memory_space<vmem>>, vector<1x1x384xf32>
    %187 = vector.shape_cast %186 : vector<1x1x384xf32> to vector<1x384xf32>
    %188 = vector.broadcast %187 : vector<1x384xf32> to vector<32x384xf32>
    %189 = arith.addf %185, %188 : vector<32x384xf32>
    %190 = arith.truncf %189 : vector<32x384xf32> to vector<32x384xbf16>
    %191 = vector.extract_strided_slice %190 {offsets = [0, 0], sizes = [32, 128], strides = [1, 1]} : vector<32x384xbf16> to vector<32x128xbf16>
    %192 = vector.extract_strided_slice %190 {offsets = [0, 128], sizes = [32, 128], strides = [1, 1]} : vector<32x384xbf16> to vector<32x128xbf16>
    %193 = vector.extract_strided_slice %190 {offsets = [0, 256], sizes = [32, 128], strides = [1, 1]} : vector<32x384xbf16> to vector<32x128xbf16>
    %cst_91 = arith.constant 0.000000e+00 : bf16
    %194 = vector.broadcast %cst_91 : bf16 to vector<32x128xbf16>
    %195 = vector.shape_cast %13 : vector<1x128xi1> to vector<1x128xi1>
    %196 = vector.broadcast %195 : vector<1x128xi1> to vector<32x128xi1>
    %197 = arith.select %196, %191, %194 : vector<32x128xi1>, vector<32x128xbf16>
    %cst_92 = arith.constant dense<0.000000e+00> : vector<32x32xf32>
    %198 = tpu.matmul %197, %192, %cst_92 {dimension_numbers = #tpu.dot_dimension_numbers<[1], [1], [0], [0], [0, 0, 1, 0], [], []>} : vector<32x128xbf16>, vector<32x128xbf16>, vector<32x32xf32> -> vector<32x32xf32>
    %199 = arith.addf %198, %5 : vector<32x32xf32>
    %cst_93 = arith.constant dense<0xFF800000> : vector<32xf32>
    %200 = vector.multi_reduction <maximumf>, %199, %cst_93 [1] : vector<32x32xf32> to vector<32xf32>
    %201 = vector.shape_cast %200 : vector<32xf32> to vector<32x1xf32>
    %202 = vector.broadcast %201 : vector<32x1xf32> to vector<32x32xf32>
    %203 = arith.subf %199, %202 : vector<32x32xf32>
    %204 = math.exp %203 : vector<32x32xf32>
    %cst_94 = arith.constant dense<0.000000e+00> : vector<32xf32>
    %205 = vector.multi_reduction <add>, %204, %cst_94 [1] : vector<32x32xf32> to vector<32xf32>
    %206 = vector.shape_cast %205 : vector<32xf32> to vector<32x1xf32>
    %207 = tpu.reciprocal %206 {approx = true} : vector<32x1xf32> -> vector<32x1xf32>
    %208 = vector.broadcast %207 : vector<32x1xf32> to vector<32x32xf32>
    %209 = arith.mulf %204, %208 : vector<32x32xf32>
    %210 = arith.truncf %209 : vector<32x32xf32> to vector<32x32xbf16>
    %cst_95 = arith.constant dense<0.000000e+00> : vector<32x128xf32>
    %211 = tpu.matmul %210, %193, %cst_95 {dimension_numbers = #tpu.dot_dimension_numbers<[1], [0], [0], [1], [0, 0, 1, 1], [], []>} : vector<32x32xbf16>, vector<32x128xbf16>, vector<32x128xf32> -> vector<32x128xf32>
    %cst_96 = arith.constant 0.000000e+00 : f32
    %212 = vector.shape_cast %13 : vector<1x128xi1> to vector<1x128xi1>
    %213 = vector.broadcast %212 : vector<1x128xi1> to vector<32x128xi1>
    %214 = vector.broadcast %cst_96 : f32 to vector<32x128xf32>
    %215 = arith.select %213, %211, %214 : vector<32x128xi1>, vector<32x128xf32>
    %cst_97 = arith.constant 0.000000e+00 : bf16
    %216 = vector.broadcast %cst_97 : bf16 to vector<32x128xbf16>
    %217 = vector.shape_cast %18 : vector<1x128xi1> to vector<1x128xi1>
    %218 = vector.broadcast %217 : vector<1x128xi1> to vector<32x128xi1>
    %219 = arith.select %218, %191, %216 : vector<32x128xi1>, vector<32x128xbf16>
    %cst_98 = arith.constant dense<0.000000e+00> : vector<32x32xf32>
    %220 = tpu.matmul %219, %192, %cst_98 {dimension_numbers = #tpu.dot_dimension_numbers<[1], [1], [0], [0], [0, 0, 1, 0], [], []>} : vector<32x128xbf16>, vector<32x128xbf16>, vector<32x32xf32> -> vector<32x32xf32>
    %221 = arith.addf %220, %5 : vector<32x32xf32>
    %cst_99 = arith.constant dense<0xFF800000> : vector<32xf32>
    %222 = vector.multi_reduction <maximumf>, %221, %cst_99 [1] : vector<32x32xf32> to vector<32xf32>
    %223 = vector.shape_cast %222 : vector<32xf32> to vector<32x1xf32>
    %224 = vector.broadcast %223 : vector<32x1xf32> to vector<32x32xf32>
    %225 = arith.subf %221, %224 : vector<32x32xf32>
    %226 = math.exp %225 : vector<32x32xf32>
    %cst_100 = arith.constant dense<0.000000e+00> : vector<32xf32>
    %227 = vector.multi_reduction <add>, %226, %cst_100 [1] : vector<32x32xf32> to vector<32xf32>
    %228 = vector.shape_cast %227 : vector<32xf32> to vector<32x1xf32>
    %229 = tpu.reciprocal %228 {approx = true} : vector<32x1xf32> -> vector<32x1xf32>
    %230 = vector.broadcast %229 : vector<32x1xf32> to vector<32x32xf32>
    %231 = arith.mulf %226, %230 : vector<32x32xf32>
    %232 = arith.truncf %231 : vector<32x32xf32> to vector<32x32xbf16>
    %cst_101 = arith.constant dense<0.000000e+00> : vector<32x128xf32>
    %233 = tpu.matmul %232, %193, %cst_101 {dimension_numbers = #tpu.dot_dimension_numbers<[1], [0], [0], [1], [0, 0, 1, 1], [], []>} : vector<32x32xbf16>, vector<32x128xbf16>, vector<32x128xf32> -> vector<32x128xf32>
    %cst_102 = arith.constant 0.000000e+00 : f32
    %234 = vector.shape_cast %18 : vector<1x128xi1> to vector<1x128xi1>
    %235 = vector.broadcast %234 : vector<1x128xi1> to vector<32x128xi1>
    %236 = vector.broadcast %cst_102 : f32 to vector<32x128xf32>
    %237 = arith.select %235, %233, %236 : vector<32x128xi1>, vector<32x128xf32>
    %238 = arith.addf %215, %237 : vector<32x128xf32>
    %239 = arith.truncf %238 : vector<32x128xf32> to vector<32x128xbf16>
    %c1_103 = arith.constant 1 : index
    %c0_104 = arith.constant 0 : index
    %c0_105 = arith.constant 0 : index
    %240 = vector.load %arg6[%c1_103, %c0_104, %c0_105] : memref<2x128x128xbf16, #tpu.memory_space<vmem>>, vector<1x128x128xbf16>
    %241 = vector.shape_cast %240 : vector<1x128x128xbf16> to vector<128x128xbf16>
    %cst_106 = arith.constant dense<0.000000e+00> : vector<32x128xf32>
    %242 = tpu.matmul %239, %241, %cst_106 {dimension_numbers = #tpu.dot_dimension_numbers<[1], [0], [0], [1], [0, 0, 1, 1], [], []>} : vector<32x128xbf16>, vector<128x128xbf16>, vector<32x128xf32> -> vector<32x128xf32>
    %c1_107 = arith.constant 1 : index
    %c0_108 = arith.constant 0 : index
    %c0_109 = arith.constant 0 : index
    %243 = vector.load %arg7[%c1_107, %c0_108, %c0_109] : memref<2x1x128xf32, #tpu.memory_space<vmem>>, vector<1x1x128xf32>
    %244 = vector.shape_cast %243 : vector<1x1x128xf32> to vector<1x128xf32>
    %245 = vector.broadcast %244 : vector<1x128xf32> to vector<32x128xf32>
    %246 = arith.addf %242, %245 : vector<32x128xf32>
    %247 = arith.addf %181, %246 : vector<32x128xf32>
    %c1_110 = arith.constant 1 : index
    %c0_111 = arith.constant 0 : index
    %c0_112 = arith.constant 0 : index
    %248 = vector.load %arg8[%c1_110, %c0_111, %c0_112] : memref<2x1x128xf32, #tpu.memory_space<vmem>>, vector<1x1x128xf32>
    %249 = vector.shape_cast %248 : vector<1x1x128xf32> to vector<1x128xf32>
    %c1_113 = arith.constant 1 : index
    %c0_114 = arith.constant 0 : index
    %c0_115 = arith.constant 0 : index
    %250 = vector.load %arg9[%c1_113, %c0_114, %c0_115] : memref<2x1x128xf32, #tpu.memory_space<vmem>>, vector<1x1x128xf32>
    %251 = vector.shape_cast %250 : vector<1x1x128xf32> to vector<1x128xf32>
    %cst_116 = arith.constant dense<0.000000e+00> : vector<32xf32>
    %252 = vector.multi_reduction <add>, %247, %cst_116 [1] : vector<32x128xf32> to vector<32xf32>
    %253 = vector.shape_cast %252 : vector<32xf32> to vector<32x1xf32>
    %cst_117 = arith.constant 3.125000e-02 : f32
    %254 = vector.broadcast %cst_117 : f32 to vector<32x1xf32>
    %255 = arith.mulf %253, %254 : vector<32x1xf32>
    %256 = vector.broadcast %255 : vector<32x1xf32> to vector<32x128xf32>
    %257 = arith.subf %247, %256 : vector<32x128xf32>
    %cst_118 = arith.constant 0.000000e+00 : f32
    %258 = vector.shape_cast %8 : vector<1x128xi1> to vector<1x128xi1>
    %259 = vector.broadcast %258 : vector<1x128xi1> to vector<32x128xi1>
    %260 = vector.broadcast %cst_118 : f32 to vector<32x128xf32>
    %261 = arith.select %259, %257, %260 : vector<32x128xi1>, vector<32x128xf32>
    %262 = arith.mulf %261, %261 : vector<32x128xf32>
    %cst_119 = arith.constant dense<0.000000e+00> : vector<32xf32>
    %263 = vector.multi_reduction <add>, %262, %cst_119 [1] : vector<32x128xf32> to vector<32xf32>
    %264 = vector.shape_cast %263 : vector<32xf32> to vector<32x1xf32>
    %cst_120 = arith.constant 3.125000e-02 : f32
    %265 = vector.broadcast %cst_120 : f32 to vector<32x1xf32>
    %266 = arith.mulf %264, %265 : vector<32x1xf32>
    %cst_121 = arith.constant 9.99999974E-6 : f32
    %267 = vector.broadcast %cst_121 : f32 to vector<32x1xf32>
    %268 = arith.addf %266, %267 : vector<32x1xf32>
    %269 = math.rsqrt %268 : vector<32x1xf32>
    %270 = vector.broadcast %269 : vector<32x1xf32> to vector<32x128xf32>
    %271 = arith.mulf %261, %270 : vector<32x128xf32>
    %272 = vector.broadcast %249 : vector<1x128xf32> to vector<32x128xf32>
    %273 = arith.mulf %271, %272 : vector<32x128xf32>
    %274 = vector.broadcast %251 : vector<1x128xf32> to vector<32x128xf32>
    %275 = arith.addf %273, %274 : vector<32x128xf32>
    %c1_122 = arith.constant 1 : index
    %c0_123 = arith.constant 0 : index
    %c0_124 = arith.constant 0 : index
    %276 = vector.load %arg11[%c1_122, %c0_123, %c0_124] : memref<2x1x128xf32, #tpu.memory_space<vmem>>, vector<1x1x128xf32>
    %277 = vector.shape_cast %276 : vector<1x1x128xf32> to vector<1x128xf32>
    %c1_i32_125 = arith.constant 1 : i32
    %278 = tpu.dynamic_rotate %275 by %c1_i32_125 dim 0 : vector<32x128xf32>, i32 -> vector<32x128xf32>
    %c0_126 = arith.constant 0 : index
    %c0_127 = arith.constant 0 : index
    %c0_128 = arith.constant 0 : index
    %279 = vector.load %arg3[%c0_126, %c0_127, %c0_128] : memref<3x32x1xf32, #tpu.memory_space<vmem>>, vector<1x32x1xf32>
    %280 = vector.shape_cast %279 : vector<1x32x1xf32> to vector<32x1xf32>
    %281 = vector.broadcast %280 : vector<32x1xf32> to vector<32x128xf32>
    %282 = arith.mulf %278, %281 : vector<32x128xf32>
    %c31_i32_129 = arith.constant 31 : i32
    %283 = tpu.dynamic_rotate %275 by %c31_i32_129 dim 0 : vector<32x128xf32>, i32 -> vector<32x128xf32>
    %c2_130 = arith.constant 2 : index
    %c0_131 = arith.constant 0 : index
    %c0_132 = arith.constant 0 : index
    %284 = vector.load %arg3[%c2_130, %c0_131, %c0_132] : memref<3x32x1xf32, #tpu.memory_space<vmem>>, vector<1x32x1xf32>
    %285 = vector.shape_cast %284 : vector<1x32x1xf32> to vector<32x1xf32>
    %286 = vector.broadcast %285 : vector<32x1xf32> to vector<32x128xf32>
    %287 = arith.mulf %283, %286 : vector<32x128xf32>
    %288 = tpu.concatenate %282, %275, %287 in 1 : vector<32x128xf32>, vector<32x128xf32>, vector<32x128xf32> -> vector<32x384xf32>
    %289 = arith.truncf %288 : vector<32x384xf32> to vector<32x384xbf16>
    %c1_133 = arith.constant 1 : index
    %c0_134 = arith.constant 0 : index
    %c0_135 = arith.constant 0 : index
    %290 = vector.load %arg10[%c1_133, %c0_134, %c0_135] : memref<2x384x128xbf16, #tpu.memory_space<vmem>>, vector<1x384x128xbf16>
    %291 = vector.shape_cast %290 : vector<1x384x128xbf16> to vector<384x128xbf16>
    %cst_136 = arith.constant dense<0.000000e+00> : vector<32x128xf32>
    %292 = tpu.matmul %289, %291, %cst_136 {dimension_numbers = #tpu.dot_dimension_numbers<[1], [0], [0], [1], [0, 0, 1, 1], [], []>} : vector<32x384xbf16>, vector<384x128xbf16>, vector<32x128xf32> -> vector<32x128xf32>
    %293 = vector.broadcast %277 : vector<1x128xf32> to vector<32x128xf32>
    %294 = arith.addf %292, %293 : vector<32x128xf32>
    %cst_137 = arith.constant 0.000000e+00 : f32
    %295 = vector.broadcast %cst_137 : f32 to vector<32x128xf32>
    %296 = arith.maximumf %294, %295 : vector<32x128xf32>
    %c1_138 = arith.constant 1 : index
    %c0_139 = arith.constant 0 : index
    %c0_140 = arith.constant 0 : index
    %297 = vector.load %arg13[%c1_138, %c0_139, %c0_140] : memref<2x1x128xf32, #tpu.memory_space<vmem>>, vector<1x1x128xf32>
    %298 = vector.shape_cast %297 : vector<1x1x128xf32> to vector<1x128xf32>
    %c1_i32_141 = arith.constant 1 : i32
    %299 = tpu.dynamic_rotate %296 by %c1_i32_141 dim 0 : vector<32x128xf32>, i32 -> vector<32x128xf32>
    %c0_142 = arith.constant 0 : index
    %c0_143 = arith.constant 0 : index
    %c0_144 = arith.constant 0 : index
    %300 = vector.load %arg3[%c0_142, %c0_143, %c0_144] : memref<3x32x1xf32, #tpu.memory_space<vmem>>, vector<1x32x1xf32>
    %301 = vector.shape_cast %300 : vector<1x32x1xf32> to vector<32x1xf32>
    %302 = vector.broadcast %301 : vector<32x1xf32> to vector<32x128xf32>
    %303 = arith.mulf %299, %302 : vector<32x128xf32>
    %c31_i32_145 = arith.constant 31 : i32
    %304 = tpu.dynamic_rotate %296 by %c31_i32_145 dim 0 : vector<32x128xf32>, i32 -> vector<32x128xf32>
    %c2_146 = arith.constant 2 : index
    %c0_147 = arith.constant 0 : index
    %c0_148 = arith.constant 0 : index
    %305 = vector.load %arg3[%c2_146, %c0_147, %c0_148] : memref<3x32x1xf32, #tpu.memory_space<vmem>>, vector<1x32x1xf32>
    %306 = vector.shape_cast %305 : vector<1x32x1xf32> to vector<32x1xf32>
    %307 = vector.broadcast %306 : vector<32x1xf32> to vector<32x128xf32>
    %308 = arith.mulf %304, %307 : vector<32x128xf32>
    %309 = tpu.concatenate %303, %296, %308 in 1 : vector<32x128xf32>, vector<32x128xf32>, vector<32x128xf32> -> vector<32x384xf32>
    %310 = arith.truncf %309 : vector<32x384xf32> to vector<32x384xbf16>
    %c1_149 = arith.constant 1 : index
    %c0_150 = arith.constant 0 : index
    %c0_151 = arith.constant 0 : index
    %311 = vector.load %arg12[%c1_149, %c0_150, %c0_151] : memref<2x384x128xbf16, #tpu.memory_space<vmem>>, vector<1x384x128xbf16>
    %312 = vector.shape_cast %311 : vector<1x384x128xbf16> to vector<384x128xbf16>
    %cst_152 = arith.constant dense<0.000000e+00> : vector<32x128xf32>
    %313 = tpu.matmul %310, %312, %cst_152 {dimension_numbers = #tpu.dot_dimension_numbers<[1], [0], [0], [1], [0, 0, 1, 1], [], []>} : vector<32x384xbf16>, vector<384x128xbf16>, vector<32x128xf32> -> vector<32x128xf32>
    %314 = vector.broadcast %298 : vector<1x128xf32> to vector<32x128xf32>
    %315 = arith.addf %313, %314 : vector<32x128xf32>
    %316 = arith.addf %275, %315 : vector<32x128xf32>
    %c1_153 = arith.constant 1 : index
    %c0_154 = arith.constant 0 : index
    %c0_155 = arith.constant 0 : index
    %317 = vector.load %arg14[%c1_153, %c0_154, %c0_155] : memref<2x1x128xf32, #tpu.memory_space<vmem>>, vector<1x1x128xf32>
    %318 = vector.shape_cast %317 : vector<1x1x128xf32> to vector<1x128xf32>
    %c1_156 = arith.constant 1 : index
    %c0_157 = arith.constant 0 : index
    %c0_158 = arith.constant 0 : index
    %319 = vector.load %arg15[%c1_156, %c0_157, %c0_158] : memref<2x1x128xf32, #tpu.memory_space<vmem>>, vector<1x1x128xf32>
    %320 = vector.shape_cast %319 : vector<1x1x128xf32> to vector<1x128xf32>
    %cst_159 = arith.constant dense<0.000000e+00> : vector<32xf32>
    %321 = vector.multi_reduction <add>, %316, %cst_159 [1] : vector<32x128xf32> to vector<32xf32>
    %322 = vector.shape_cast %321 : vector<32xf32> to vector<32x1xf32>
    %cst_160 = arith.constant 3.125000e-02 : f32
    %323 = vector.broadcast %cst_160 : f32 to vector<32x1xf32>
    %324 = arith.mulf %322, %323 : vector<32x1xf32>
    %325 = vector.broadcast %324 : vector<32x1xf32> to vector<32x128xf32>
    %326 = arith.subf %316, %325 : vector<32x128xf32>
    %cst_161 = arith.constant 0.000000e+00 : f32
    %327 = vector.shape_cast %8 : vector<1x128xi1> to vector<1x128xi1>
    %328 = vector.broadcast %327 : vector<1x128xi1> to vector<32x128xi1>
    %329 = vector.broadcast %cst_161 : f32 to vector<32x128xf32>
    %330 = arith.select %328, %326, %329 : vector<32x128xi1>, vector<32x128xf32>
    %331 = arith.mulf %330, %330 : vector<32x128xf32>
    %cst_162 = arith.constant dense<0.000000e+00> : vector<32xf32>
    %332 = vector.multi_reduction <add>, %331, %cst_162 [1] : vector<32x128xf32> to vector<32xf32>
    %333 = vector.shape_cast %332 : vector<32xf32> to vector<32x1xf32>
    %cst_163 = arith.constant 3.125000e-02 : f32
    %334 = vector.broadcast %cst_163 : f32 to vector<32x1xf32>
    %335 = arith.mulf %333, %334 : vector<32x1xf32>
    %cst_164 = arith.constant 9.99999974E-6 : f32
    %336 = vector.broadcast %cst_164 : f32 to vector<32x1xf32>
    %337 = arith.addf %335, %336 : vector<32x1xf32>
    %338 = math.rsqrt %337 : vector<32x1xf32>
    %339 = vector.broadcast %338 : vector<32x1xf32> to vector<32x128xf32>
    %340 = arith.mulf %330, %339 : vector<32x128xf32>
    %341 = vector.broadcast %318 : vector<1x128xf32> to vector<32x128xf32>
    %342 = arith.mulf %340, %341 : vector<32x128xf32>
    %343 = vector.broadcast %320 : vector<1x128xf32> to vector<32x128xf32>
    %344 = arith.addf %342, %343 : vector<32x128xf32>
    %345 = arith.truncf %344 : vector<32x128xf32> to vector<32x128xbf16>
    %c0_165 = arith.constant 0 : index
    %c0_166 = arith.constant 0 : index
    %346 = vector.load %arg16[%c0_165, %c0_166] : memref<128x128xbf16, #tpu.memory_space<vmem>>, vector<128x128xbf16>
    %cst_167 = arith.constant dense<0.000000e+00> : vector<32x128xf32>
    %347 = tpu.matmul %345, %346, %cst_167 {dimension_numbers = #tpu.dot_dimension_numbers<[1], [0], [0], [1], [0, 0, 1, 1], [], []>} : vector<32x128xbf16>, vector<128x128xbf16>, vector<32x128xf32> -> vector<32x128xf32>
    %c0_168 = arith.constant 0 : index
    %c0_169 = arith.constant 0 : index
    %348 = vector.load %arg17[%c0_168, %c0_169] : memref<1x128xf32, #tpu.memory_space<vmem>>, vector<1x128xf32>
    %349 = vector.broadcast %348 : vector<1x128xf32> to vector<32x128xf32>
    %350 = arith.addf %347, %349 : vector<32x128xf32>
    %c0_170 = arith.constant 0 : index
    %c0_171 = arith.constant 0 : index
    %351 = vector.load %arg18[%c0_170, %c0_171] : memref<32x128xf32, #tpu.memory_space<vmem>>, vector<32x128xf32>
    tpu.vector_store %arg18[%c0_170, %c0_171], %350 {strides = array<i32>} : memref<32x128xf32, #tpu.memory_space<vmem>>, vector<32x128xf32>,
    return
  }
}

</mosaic_0001>

<bundles_post_ra>
// kernel: tpu_custom_call.1
= control target key start
LH: loop header
LB: loop body
LE: loop exit
PB: predicated region body
PF: predicated region fallthrough
CT: control target
= control target key end

     0   :  { %s5083_s0 = inlined_call_operand.vmem [shape: f32[32,128], index: 0, kind: input, shape index: {}]   ;;  %s5084_s1 = inlined_call_operand.hbm [shape: f32[32,128], index: 1, kind: input, shape index: {}]   ;;  %s5085_s2 = inlined_call_operand.hbm [shape: f32[32,32], index: 2, kind: input, shape index: {}]   ;;  %s5086_s3 = inlined_call_operand.vmem [shape: f32[3,32,1], index: 3, kind: input, shape index: {}]   ;;  %s5087_s4 = inlined_call_operand.hbm [shape: bf16[2,128,384], index: 4, kind: input, shape index: {}]   ;;  %s5088_s5 = inlined_call_operand.vmem [shape: f32[2,1,384], index: 5, kind: input, shape index: {}]   ;;  %s5089_s6 = inlined_call_operand.hbm [shape: bf16[2,128,128], index: 6, kind: input, shape index: {}]   ;;  %s5090_s7 = inlined_call_operand.vmem [shape: f32[2,1,128], index: 7, kind: input, shape index: {}]   ;;  %s5091_s8 = inlined_call_operand.vmem [shape: f32[2,1,128], index: 8, kind: input, shape index: {}]   ;;  %s5092_s9 = inlined_call_operand.vmem [shape: f32[2,1,128], index: 9, kind: input, shape index: {}]   ;;  %s5093_s10 = inlined_call_operand.hbm [shape: bf16[2,384,128], index: 10, kind: input, shape index: {}]   ;;  %s5094_s11 = inlined_call_operand.vmem [shape: f32[2,1,128], index: 11, kind: input, shape index: {}]   ;;  %s5095_s12 = inlined_call_operand.hbm [shape: bf16[2,384,128], index: 12, kind: input, shape index: {}]   ;;  %s5096_s13 = inlined_call_operand.vmem [shape: f32[2,1,128], index: 13, kind: input, shape index: {}]   ;;  %s5097_s14 = inlined_call_operand.vmem [shape: f32[2,1,128], index: 14, kind: input, shape index: {}]   ;;  %s5098_s15 = inlined_call_operand.hbm [shape: f32[2,1,128], index: 15, kind: input, shape index: {}]   ;;  %s5099_s16 = inlined_call_operand.vmem [shape: bf16[128,128], index: 16, kind: input, shape index: {}]   ;;  %s5100_s17 = inlined_call_operand.hbm [shape: f32[1,128], index: 17, kind: input, shape index: {}]   ;;  %s5101_s18 = inlined_call_operand.hbm [shape: f32[32,128], index: 18, kind: output, shape index: {}]  }
   0x1   :  { %5106 = sst [smem:[#allocation23_spill]] %s5083_s0 }
   0x2   :  { %5107 = sst [smem:[#allocation24_spill]] %s5084_s1 }
   0x3   :  { %5108 = sst [smem:[#allocation25_spill]] %s5085_s2 }
   0x4   :  { %23 = vsyncpa [#allocation3], 0 }
   0x5   :  { %24 = vsyncpa [#allocation6], 0 }
   0x6   :  { %25 = vsyncpa [#allocation9], 0 }
   0x7   :  { %26 = vsyncpa [#allocation12], 0 }
   0x8   :  { %27 = vsyncpa [#allocation15], 0 }
   0x9   :  { %28 = vsyncpa [#allocation4], 0  ;;  %s5109_s29 = sld [smem:[#allocation25_spill]]  ;;  %s4325_s0 = smov [#allocation5]  }
   0xa   :  { %s50_s19 = sshll.u32 %s4325_s0, 4  ;;  %s78_s21 = sshll.u32 %s5089_s6, 4  ;;  %s51_s19 = int_to_ptr.vmem [resolvable:$true] %s50_s19  ;;  %s79_s21 = int_to_ptr.hbm [resolvable:$true] %s78_s21 }
   0xb   :  { %s5103_s22 = smov 128   ;;  %s4327_s2 = smov 8  }
   0xc   :  { %s4328_s23 = smov [#allocation8]   ;;  %s5105_s25 = smov 64  }
   0xd   :  { %s80_s24 = sshll.u32 %s4328_s23, 4  ;;  %s4330_s26 = smov 4   ;;  %s81_s24 = int_to_ptr.vmem [resolvable:$true] %s80_s24 }
   0xe   :  { %86 = dma.hbm_to_vmem [thread:$0]  %s79_s21, 2048, %s81_s24, [#allocation9], %s5105_s25, %s5105_s25, %s4330_s26  }
   0xf   :  { %s48_s30 = sshll.u32 %s5109_s29, 4  ;;  %s112_s6 = sshll.u32 %s5095_s12, 4  ;;  %s49_s30 = int_to_ptr.hbm [resolvable:$true] %s48_s30  ;;  %s113_s6 = int_to_ptr.hbm [resolvable:$true] %s112_s6 }
  0x10   :  { %56 = dma.hbm_to_vmem [thread:$0]  %s49_s30, 512, %s51_s19, [#allocation6], %s5103_s22, %s5103_s22, %s4327_s2  }
  0x11   :  { %s4331_s29 = smov [#allocation11]   ;;  %s5110_s19 = sld [smem:[#allocation24_spill]] }
  0x12   :  { %s114_s0 = sshll.u32 %s4331_s29, 4  ;;  %s4332_s23 = smov [#allocation2]   ;;  %s115_s0 = int_to_ptr.vmem [resolvable:$true] %s114_s0 }
  0x13   :  { %120 = dma.hbm_to_vmem [thread:$0]  %s113_s6, 6144, %s115_s0, [#allocation12], %s5105_s25, %s5105_s25, %s4330_s26  }
  0x14   :  { %s37_s22 = sshll.u32 %s4332_s23, 4  ;;  %s63_s27 = sshll.u32 %s5087_s4, 4  ;;  %s38_s22 = int_to_ptr.vmem [resolvable:$true] %s37_s22  ;;  %s64_s27 = int_to_ptr.hbm [resolvable:$true] %s63_s27 }
  0x15   :  { %s5111_s12 = smov 128   ;;  %s4333_s28 = smov [#allocation7]  }
  0x16   :  { %s65_s29 = sshll.u32 %s4333_s28, 4  ;;  %s97_s6 = sshll.u32 %s5093_s10, 4  ;;  %s66_s29 = int_to_ptr.vmem [resolvable:$true] %s65_s29  ;;  %s98_s6 = int_to_ptr.hbm [resolvable:$true] %s97_s6 }
  0x17   :  { %s35_s20 = sshll.u32 %s5110_s19, 4  ;;  %s4334_s0 = smov 192   ;;  %s36_s20 = int_to_ptr.hbm [resolvable:$true] %s35_s20 }
  0x18   :  { %43 = dma.hbm_to_vmem [thread:$0]  %s36_s20, 512, %s38_s22, [#allocation3], %s5111_s12, %s5111_s12, %s4327_s2  }
  0x19   :  { %s4335_s19 = smov 12   ;;  %s4336_s23 = smov [#allocation10]  }
  0x1a   :  { %71 = dma.hbm_to_vmem [thread:$0]  %s64_s27, 6144, %s66_s29, [#allocation6], %s4334_s0, %s4334_s0, %s4335_s19  }
  0x1b   :  { %s99_s21 = sshll.u32 %s4336_s23, 4  ;;  %s129_s25 = sshll.u32 %s5098_s15, 4  ;;  %s100_s21 = int_to_ptr.vmem [resolvable:$true] %s99_s21  ;;  %s130_s25 = int_to_ptr.hbm [resolvable:$true] %s129_s25 }
  0x1c   :  { %s5112_s22 = smov 64   ;;  %s4337_s20 = smov [#allocation13]  }
  0x1d   :  { %105 = dma.hbm_to_vmem [thread:$0]  %s98_s6, 6144, %s100_s21, [#allocation9], %s5112_s22, %s5112_s22, %s4330_s26  }
  0x1e   :  { %s131_s28 = sshll.u32 %s4337_s20, 4  ;;  %s145_s27 = sshll.u32 %s5100_s17, 4  ;;  %s132_s28 = int_to_ptr.vmem [resolvable:$true] %s131_s28  ;;  %s146_s27 = int_to_ptr.hbm [resolvable:$true] %s145_s27 }
  0x1f   :  { %s4338_s29 = smov 16   ;;  %s4339_s30 = smov 1  }
  0x20   :  { %137 = dma.hbm_to_vmem [thread:$0]  %s130_s25, 32, %s132_s28, [#allocation12], %s4338_s29, %s4338_s29, %s4339_s30  }
  0x21   :  { %s4340_s0 = smov [#allocation14]  }
  0x22   :  { %s147_s19 = sshll.u32 %s4340_s0, 4  ;;  %s148_s19 = int_to_ptr.vmem [resolvable:$true] %s147_s19 }
  0x23   :  { %150 = dma.hbm_to_vmem [thread:$0]  %s146_s27, 16, %s148_s19, [#allocation15]  }
  0x24   :  { %4313 = dma.done.wait [#allocation3], 512  }
  0x25   :  { %4314 = vsyncadd [#allocation3], 4294966784 }
  0x26   :  { %4315 = dma.done.wait [#allocation6], 6656  }
  0x27   :  { %4316 = vsyncadd [#allocation6], 4294960640 }
  0x28   :  { %4317 = dma.done.wait [#allocation9], 8192  }
  0x29   :  { %4318 = vsyncadd [#allocation9], 4294959104 }
  0x2a   :  { %4319 = dma.done.wait [#allocation12], 6176  }
  0x2b   :  { %4320 = vsyncadd [#allocation12], 4294961120 }
  0x2c   :  { %4321 = dma.done.wait [#allocation15], 16  }
  0x2d   :  { %4322 = vsyncadd [#allocation15], 4294967280  ;;  %v3188_v0 = vld [vmem:[#allocation7 + $0xa8] sm:$0xf]  ;;  %v3815_v1 = vld [vmem:[#allocation7 + $0xb0] sm:$0xf0] }
  0x2e   :  { %v3814_v2 = vld [vmem:[#allocation7 + $0xac] sm:$0xf]  ;;  %v3189_v3 = vor.u32 %v3815_v1, %v3188_v0  ;;  %v3190_v4 = vld [vmem:[#allocation7 + $0xb4] sm:$0xf0]  ;;  %v3176_v5 = vld [vmem:[#allocation7 + $0x90] sm:$0xf] }
  0x2f   :  { %v3812_v6 = vld [vmem:[#allocation7 + $0x98] sm:$0xf0]  ;;  %v3193_v7 = vor.u32 %v3814_v2, %v3190_v4  ;;  %v3811_v8 = vld [vmem:[#allocation7 + $0x94] sm:$0xf]  ;;  %v3178_v9 = vld [vmem:[#allocation7 + $0x9c] sm:$0xf0] }
  0x30   :  { %382 = vmatpush.bf16.msra.mxu0 %v3189_v3  ;;  %v3177_v10 = vor.u32 %v3812_v6, %v3176_v5  ;;  %v3181_v11 = vor.u32 %v3811_v8, %v3178_v9  ;;  %v3164_v12 = vld [vmem:[#allocation7 + $0x78] sm:$0xf]  ;;  %v3809_v13 = vld [vmem:[#allocation7 + $0x80] sm:$0xf0]  ;;  %v3808_v14 = vld [vmem:[#allocation7 + $0x7c] sm:$0xf] }
  0x31   :  { %401 = vmatpush.bf16.msra.mxu1 %v3193_v7  ;;  %v3166_v15 = vld [vmem:[#allocation7 + $0x84] sm:$0xf0]  ;;  %v3165_v16 = vor.u32 %v3809_v13, %v3164_v12  ;;  %v3152_v18 = vld [vmem:[#allocation7 + $0x60] sm:$0xf]  ;;  %v3806_v19 = vld [vmem:[#allocation7 + $0x68] sm:$0xf0] }
  0x32   :  { %v3169_v17 = vor.u32 %v3808_v14, %v3166_v15  ;;  %v3805_v20 = vld [vmem:[#allocation7 + $0x64] sm:$0xf]  ;;  %v3154_v21 = vld [vmem:[#allocation7 + $0x6c] sm:$0xf0]  ;;  %v3153_v22 = vor.u32 %v3806_v19, %v3152_v18  ;;  %v3140_v24 = vld [vmem:[#allocation7 + $0x48] sm:$0xf] }
  0x33   :  { %v3157_v23 = vor.u32 %v3805_v20, %v3154_v21  ;;  %v3803_v25 = vld [vmem:[#allocation7 + $0x50] sm:$0xf0]  ;;  %v3802_v26 = vld [vmem:[#allocation7 + $0x4c] sm:$0xf]  ;;  %v3142_v27 = vld [vmem:[#allocation7 + $0x54] sm:$0xf0] }
  0x34   :  { %383 = vmatpush.bf16.msra.mxu0 %v3177_v10  ;;  %v3128_v28 = vld [vmem:[#allocation7 + $0x30] sm:$0xf]  ;;  %v3800_v29 = vld [vmem:[#allocation7 + $0x38] sm:$0xf0]  ;;  %v3141_v30 = vor.u32 %v3803_v25, %v3140_v24  ;;  %v3799_v31 = vld [vmem:[#allocation7 + $0x34] sm:$0xf]  ;;  %v3145_v33 = vor.u32 %v3802_v26, %v3142_v27 }
  0x35   :  { %402 = vmatpush.bf16.msra.mxu1 %v3181_v11  ;;  %v3130_v32 = vld [vmem:[#allocation7 + $0x3c] sm:$0xf0]  ;;  %v3129_v34 = vor.u32 %v3800_v29, %v3128_v28  ;;  %s5113_s25 = sld [smem:[#allocation23_spill]]  ;;  %v3116_v38 = vld [vmem:[#allocation7 + $0x18] sm:$0xf]  ;;  %v193_v46 = vld [vmem:[#allocation2 + $0x8] sm:$0xff] }
  0x36   :  { %v3133_v37 = vor.u32 %v3799_v31, %v3130_v32  ;;  %v3797_v39 = vld [vmem:[#allocation7 + $0x20] sm:$0xf0]  ;;  %v3796_v40 = vld [vmem:[#allocation7 + $0x1c] sm:$0xf]  ;;  %v3118_v41 = vld [vmem:[#allocation7 + $0x24] sm:$0xf0] }
  0x37   :  { %v3117_v44 = vor.u32 %v3797_v39, %v3116_v38  ;;  %v192_v45 = vld [vmem:[#allocation2] sm:$0xff]  ;;  %v3121_v47 = vor.u32 %v3796_v40, %v3118_v41  ;;  %v3794_v49 = vld [vmem:[#allocation7 + $0x8] sm:$0xf0]  ;;  %v3106_v51 = vld [vmem:[#allocation7 + $0xc] sm:$0xf0]  ;;  %vm497_vm6 = vcmask 261120  }
  0x38   :  { %384 = vmatpush.bf16.msra.mxu0 %v3165_v16  ;;  %v3104_v48 = vld [vmem:[#allocation7] sm:$0xf]  ;;  %v3793_v50 = vld [vmem:[#allocation7 + $0x4] sm:$0xf]  ;;  %v194_v61 = vld [vmem:[#allocation2 + $0x10] sm:$0xff]  ;;  %v204_v16 = vlaneseq  ;;  %s3085_s6 = sshll.u32 %s5101_s18, 4  ;;  %s3086_s6 = int_to_ptr.hbm [resolvable:$true] %s3085_s6 }
  0x39   :  { %403 = vmatpush.bf16.msra.mxu1 %v3169_v17  ;;  %v3105_v54 = vor.u32 %v3794_v49, %v3104_v48  ;;  %v3109_v55 = vor.u32 %v3793_v50, %v3106_v51  ;;  %v195_v62 = vld [vmem:[#allocation2 + $0x18] sm:$0xff]  ;;  %v4512_v7 = vld [vmem:[%s5088_s5] sm:$0x7] }
  0x3a   :  { %v248_v9 = vperm.slane %v4512_v7, 0  ;;  %v249_v10 = vperm.slane %v4512_v7, 1 }
  0x3b   :  { %v184_v35 = vld [vmem:[%s5113_s25] sm:$0xff]  ;;  %v185_v36 = vld [vmem:[%s5113_s25 + $0x8] sm:$0xff]  ;;  %v186_v57 = vld [vmem:[%s5113_s25 + $0x10] sm:$0xff] }
  0x3c   :  { %385 = vmatpush.bf16.msra.mxu0 %v3153_v22  ;;  %v188_v42 = vmul.f32 5.656854, %v184_v35  ;;  %v189_v43 = vmul.f32 5.656854, %v185_v36  ;;  %v187_v58 = vld [vmem:[%s5113_s25 + $0x18] sm:$0xff]  ;;  %v4517_v22 = vand.u32 127, %v204_v16 }
  0x3d   :  { %404 = vmatpush.bf16.msra.mxu1 %v3157_v23  ;;  %v190_v59 = vmul.f32 5.656854, %v186_v57  ;;  %v191_v60 = vmul.f32 5.656854, %v187_v58 }
  0x3e   :  { %v4483_v52 = vadd.f32 %v192_v45, %v188_v42  ;;  %v4485_v53 = vadd.f32 %v193_v46, %v189_v43  ;;  %vm206_vm0 = vcmp.lt.s32.totalorder %v4517_v22, 32  ;;  %vm210_vm1 = vcmp.ge.s32.totalorder %v4517_v22, 16 }
  0x3f   :  { %v4499_v63 = vadd.f32 %v194_v61, %v190_v59  ;;  %v4501_v0 = vadd.f32 %v195_v62, %v191_v60  ;;  %vm208_vm2 = vcmp.lt.s32.totalorder %v4517_v22, 16  ;;  %vm4524_vm3 = vmand %vm210_vm1, %vm206_vm0  ;;  %v200_v59 = vld [vmem:[#allocation5] sm:$0xff]  ;;  %v3196_v62 = vld [vmem:[#allocation7 + $0xb0] sm:$0xf] }
  0x40   :  { %386 = vmatpush.bf16.msra.mxu0 %v3141_v30  ;;  %v4489_v56 = vpack.c.bf16 %v4485_v53, %v4483_v52  ;;  %vm4531_vm4 = vmpackc.low %vm208_vm2, %vm208_vm2  ;;  %v3958_v22 = vld [vmem:[%s5099_s16 + $0x28] sm:$0xff] }
  0x41   :  { %405 = vmatpush.bf16.msra.mxu1 %v3145_v33  ;;  %v4505_v1 = vpack.c.bf16 %v4501_v0, %v4499_v63  ;;  %vm4538_vm5 = vmpackc.low %vm4524_vm3, %vm4524_vm3 }
  0x44   :  { %387 = vmatpush.bf16.msra.mxu0 %v3129_v34 }
  0x45   :  { %406 = vmatpush.bf16.msra.mxu1 %v3133_v37 }
  0x48   :  { %388 = vmatpush.bf16.msra.mxu0 %v3117_v44 }
  0x49   :  { %407 = vmatpush.bf16.msra.mxu1 %v3121_v47 }
  0x4c   :  { %389 = vmatpush.bf16.msra.mxu0 %v3105_v54 }
  0x4d   :  { %408 = vmatpush.bf16.msra.mxu1 %v3109_v55 }
  0x4f   :  { %390 = vmatmul.bf16.vlgmr.msra.gmra.mxu0 %v4489_v56 }
  0x50   :  { %409 = vmatmul.bf16.vlgmr.msra.gmra.mxu1 %v4489_v56 }
  0x5f   :  { %395 = vmatmul.bf16.gmra.mxu0 %v4505_v1 }
  0x60   :  { %414 = vmatmul.bf16.gmra.mxu1 %v4505_v1 }
  0xcc   :  { %v391_v2 = vpop.f32.mrf.mxu0 }
  0xcd   :  { %v410_v3 = vpop.f32.mrf.mxu1  ;;  %v392_v23 = vadd.f32 %v391_v2, %v248_v9  ;;  %v3816_v2 = vld [vmem:[#allocation7 + $0xb8] sm:$0xf0] }
  0xce   :  { %v411_v24 = vadd.f32 %v410_v3, %v249_v10  ;;  %v3184_v3 = vld [vmem:[#allocation7 + $0x98] sm:$0xf] }
  0xd0   :  { %v439_v29 = vpack.c.bf16 %v411_v24, %v392_v23 }
  0xd2   :  { %v470_v32 = vunpack.c.h.b16 %v439_v29  ;;  %v450_v38 = vsel %vm4531_vm4, %v439_v29, 0  ;;  %v588_v39 = vsel %vm4538_vm5, %v439_v29, 0 }
  0xd3   :  { %v458_v42 = vunpack.c.l.b16 %v450_v38  ;;  %v596_v43 = vunpack.c.l.b16 %v588_v39 }
  0xd4   :  { %v393_v4 = vpop.f32.mrf.mxu0 }
  0xd5   :  { %v412_v5 = vpop.f32.mrf.mxu1  ;;  %v394_v19 = vadd.f32 %v393_v4, %v248_v9 }
  0xd6   :  { %v413_v20 = vadd.f32 %v412_v5, %v249_v10  ;;  %v3197_v5 = vor.u32 %v3816_v2, %v3196_v62 }
  0xd8   :  { %v441_v27 = vpack.c.bf16 %v413_v20, %v394_v19  ;;  %420 = vmatpush.bf16.msra.mxu2 %v3197_v5  ;;  %v3160_v19 = vld [vmem:[#allocation7 + $0x68] sm:$0xf]  ;;  %v3807_v20 = vld [vmem:[#allocation7 + $0x70] sm:$0xf0] }
  0xd9   :  { %v3161_v23 = vor.u32 %v3807_v20, %v3160_v19 }
  0xda   :  { %v471_v30 = vunpack.c.h.b16 %v441_v27  ;;  %v451_v36 = vsel %vm4531_vm4, %v441_v27, 0  ;;  %v589_v37 = vsel %vm4538_vm5, %v441_v27, 0 }
  0xdb   :  { %v459_v40 = vunpack.c.l.b16 %v451_v36  ;;  %v597_v41 = vunpack.c.l.b16 %v589_v37  ;;  %v3801_v36 = vld [vmem:[#allocation7 + $0x40] sm:$0xf0] }
  0xdc   :  { %v396_v6 = vpop.f32.mrf.mxu0  ;;  %v474_v35 = vpack.c.b16 %v471_v30, %v470_v32  ;;  %v202_v32 = vld [vmem:[#allocation5 + $0x10] sm:$0xff] }
  0xdd   :  { %v415_v8 = vpop.f32.mrf.mxu1  ;;  %v397_v11 = vadd.f32 %v396_v6, %v248_v9  ;;  %v462_v44 = vpack.c.b16 %v459_v40, %v458_v42  ;;  %v600_v45 = vpack.c.b16 %v597_v41, %v596_v43  ;;  %v3813_v6 = vld [vmem:[#allocation7 + $0xa0] sm:$0xf0]  ;;  %v203_v40 = vld [vmem:[#allocation5 + $0x18] sm:$0xff]  ;;  %v3124_v41 = vld [vmem:[#allocation7 + $0x20] sm:$0xf] }
  0xde   :  { %v416_v12 = vadd.f32 %v415_v8, %v249_v10  ;;  %v3185_v8 = vor.u32 %v3813_v6, %v3184_v3  ;;  %v3798_v42 = vld [vmem:[#allocation7 + $0x28] sm:$0xf0] }
  0xe0   :  { %v443_v17 = vpack.c.bf16 %v416_v12, %v397_v11  ;;  %v3172_v11 = vld [vmem:[#allocation7 + $0x80] sm:$0xf]  ;;  %v3810_v12 = vld [vmem:[#allocation7 + $0x88] sm:$0xf0]  ;;  %421 = vmatpush.bf16.msra.mxu2 %v3185_v8 }
  0xe2   :  { %v472_v25 = vunpack.c.h.b16 %v443_v17  ;;  %v452_v48 = vsel %vm4531_vm4, %v443_v17, 0  ;;  %v590_v49 = vsel %vm4538_vm5, %v443_v17, 0 }
  0xe3   :  { %v460_v54 = vunpack.c.l.b16 %v452_v48  ;;  %v598_v55 = vunpack.c.l.b16 %v590_v49  ;;  %v3125_v48 = vor.u32 %v3798_v42, %v3124_v41  ;;  %v3112_v49 = vld [vmem:[#allocation7 + $0x8] sm:$0xf] }
  0xe4   :  { %v398_v13 = vpop.f32.mrf.mxu0 }
  0xe5   :  { %v399_v14 = vadd.f32 %v398_v13, %v248_v9  ;;  %v417_v15 = vpop.f32.mrf.mxu1 }
  0xe6   :  { %v418_v18 = vadd.f32 %v417_v15, %v249_v10  ;;  %v201_v10 = vld [vmem:[#allocation5 + $0x8] sm:$0xff] }
  0xe8   :  { %v445_v21 = vpack.c.bf16 %v418_v18, %v399_v14  ;;  %v3173_v18 = vor.u32 %v3810_v12, %v3172_v11 }
  0xea   :  { %v473_v26 = vunpack.c.h.b16 %v445_v21  ;;  %v453_v46 = vsel %vm4531_vm4, %v445_v21, 0  ;;  %v591_v47 = vsel %vm4538_vm5, %v445_v21, 0  ;;  %422 = vmatpush.bf16.msra.mxu2 %v3173_v18 }
  0xeb   :  { %v461_v50 = vunpack.c.l.b16 %v453_v46  ;;  %v599_v51 = vunpack.c.l.b16 %v591_v47 }
  0xec   :  { %v475_v28 = vpack.c.b16 %v473_v26, %v472_v25  ;;  %v3148_v25 = vld [vmem:[#allocation7 + $0x50] sm:$0xf]  ;;  %v3804_v26 = vld [vmem:[#allocation7 + $0x58] sm:$0xf0] }
  0xed   :  { %v463_v57 = vpack.c.b16 %v461_v50, %v460_v54  ;;  %v601_v58 = vpack.c.b16 %v599_v51, %v598_v55  ;;  %v3149_v30 = vor.u32 %v3804_v26, %v3148_v25  ;;  %v3795_v50 = vld [vmem:[#allocation7 + $0x10] sm:$0xf0] }
  0xee   :  { %484 = vmatpush.bf16.xpose.msra.mxu3 %v475_v28  ;;  %610 = vmatpush.bf16.xpose.msrb.mxu0 %v475_v28  ;;  %v3113_v54 = vor.u32 %v3795_v50, %v3112_v49 }
  0xef   :  { %423 = vmatpush.bf16.msra.mxu2 %v3161_v23 }
  0xf3   :  { %424 = vmatpush.bf16.msra.mxu2 %v3149_v30 }
  0xf6   :  { %485 = vmatpush.bf16.xpose.msra.mxu3 %v474_v35  ;;  %611 = vmatpush.bf16.xpose.msrb.mxu0 %v474_v35  ;;  %v3136_v35 = vld [vmem:[#allocation7 + $0x38] sm:$0xf] }
  0xf7   :  { %v3137_v38 = vor.u32 %v3801_v36, %v3136_v35 }
  0xf9   :  { %425 = vmatpush.bf16.msra.mxu2 %v3137_v38 }
  0xfd   :  { %486 = vmatmul.bf16.vlgmr.msra.gmra.mxu3 %v462_v44  ;;  %612 = vmatmul.bf16.vlgmr.msrb.gmra.mxu0 %v600_v45 }
  0xfe   :  { %426 = vmatpush.bf16.msra.mxu2 %v3125_v48 }
 0x102   :  { %427 = vmatpush.bf16.msra.mxu2 %v3113_v54 }
 0x105   :  { %428 = vmatmul.bf16.vlgmr.msra.gmra.mxu2 %v4489_v56 }
 0x10d   :  { %491 = vmatmul.bf16.gmra.mxu3 %v463_v57  ;;  %617 = vmatmul.bf16.gmra.mxu0 %v601_v58 }
 0x115   :  { %433 = vmatmul.bf16.gmra.mxu2 %v4505_v1 }
 0x17a   :  { %v613_v60 = vpop.f32.mrf.mxu0 }
 0x17b   :  { %v4558_v61 = vadd.f32 %v613_v60, %v200_v59 }
 0x17d   :  { %v623_v4 = vsel %vm497_vm6, %v4558_v61, -inf }
 0x17e   :  { %624 = vmax.xlane.f32.xlu1 %v623_v4 }
 0x180   :  { %v487_v9 = vpop.f32.mrf.mxu3 }
 0x181   :  { %v488_v13 = vadd.f32 %v487_v9, %v200_v59 }
 0x182   :  { %v615_v14 = vpop.f32.mrf.mxu0 }
 0x183   :  { %v4562_v15 = vadd.f32 %v615_v14, %v201_v10  ;;  %v498_v17 = vsel %vm497_vm6, %v488_v13, -inf }
 0x184   :  { %499 = vmax.xlane.f32.xlu0 %v498_v17 }
 0x185   :  { %v626_v21 = vsel %vm497_vm6, %v4562_v15, -inf }
 0x186   :  { %627 = vmax.xlane.f32.xlu1 %v626_v21 }
 0x188   :  { %v489_v24 = vpop.f32.mrf.mxu3  ;;  %v429_v42 = vpop.f32.mrf.mxu2 }
 0x189   :  { %v490_v27 = vadd.f32 %v489_v24, %v201_v10 }
 0x18a   :  { %v618_v28 = vpop.f32.mrf.mxu0 }
 0x18b   :  { %v501_v29 = vsel %vm497_vm6, %v490_v27, -inf  ;;  %v619_v37 = vadd.f32 %v618_v28, %v202_v32 }
 0x18c   :  { %502 = vmax.xlane.f32.xlu0 %v501_v29 }
 0x18d   :  { %v629_v47 = vsel %vm497_vm6, %v619_v37, -inf }
 0x190   :  { %v492_v39 = vpop.f32.mrf.mxu3 }
 0x191   :  { %v493_v43 = vadd.f32 %v492_v39, %v202_v32 }
 0x192   :  { %v620_v44 = vpop.f32.mrf.mxu0 }
 0x193   :  { %v621_v45 = vadd.f32 %v620_v44, %v203_v40  ;;  %v504_v46 = vsel %vm497_vm6, %v493_v43, -inf  ;;  %v250_v44 = vperm.slane %v4512_v7, 2 }
 0x194   :  { %505 = vmax.xlane.f32.xlu2 %v504_v46  ;;  %630 = vmax.xlane.f32.xlu0 %v629_v47 }
 0x195   :  { %v632_v51 = vsel %vm497_vm6, %v621_v45, -inf  ;;  %v430_v47 = vadd.f32 %v429_v42, %v250_v44  ;;  %v3820_v42 = vld [vmem:[#allocation8 + $0x18] sm:$0xff] }
 0x196   :  { %633 = vmax.xlane.f32.xlu1 %v632_v51 }
 0x197   :  { %v440_v51 = vpack.c.bf16 %v430_v47, %v430_v47 }
 0x198   :  { %v494_v55 = vpop.f32.mrf.mxu3 }
 0x199   :  { %v495_v57 = vadd.f32 %v494_v55, %v203_v40 }
 0x19b   :  { %v507_v58 = vsel %vm497_vm6, %v495_v57, -inf }
 0x19c   :  { %508 = vmax.xlane.f32.xlu2 %v507_v58 }
 0x1f1   :  { %v625_v59 = vpop.xlane.xlu1 %624 }
 0x1f2   :  { %v635_v60 = vsub.f32 %v4558_v61, %v625_v59  ;;  %v548_v59 = vunpack.c.l.b16 %v440_v51 }
 0x1f4   :  { %v639_v62 = vmul.f32 1.442695, %v635_v60 }
 0x1f6   :  { %3997 = vpow2.f32 %v639_v62 }
 0x1f7   :  { %v500_v2 = vpop.xlane.xlu0 %499 }
 0x1f8   :  { %v510_v3 = vsub.f32 %v488_v13, %v500_v2 }
 0x1f9   :  { %v628_v4 = vpop.xlane.xlu1 %627 }
 0x1fa   :  { %v514_v5 = vmul.f32 1.442695, %v510_v3  ;;  %v636_v6 = vsub.f32 %v4562_v15, %v628_v4 }
 0x1fc   :  { %v4576_v8 = vpop.eup %3997  ;;  %3999 = vpow2.f32 %v514_v5  ;;  %v641_v56 = vmul.f32 1.442695, %v636_v6  ;;  %v3824_v5 = vld [vmem:[#allocation8 + $0x38] sm:$0xff]  ;;  %v3823_v6 = vld [vmem:[#allocation8 + $0x30] sm:$0xff] }
 0x1fd   :  { %v647_v9 = vsel %vm497_vm6, %v4576_v8, 0.0  ;;  %772 = vmatpush.bf16.msrb.mxu2 %v3824_v5 }
 0x1fe   :  { %648 = vadd.xlane.f32.xlu1 %v647_v9  ;;  %4001 = vpow2.f32 %v641_v56 }
 0x1ff   :  { %v503_v1 = vpop.xlane.xlu0 %502 }
 0x200   :  { %v511_v10 = vsub.f32 %v490_v27, %v503_v1  ;;  %v3822_v1 = vld [vmem:[#allocation8 + $0x28] sm:$0xff] }
 0x201   :  { %773 = vmatpush.bf16.msrb.mxu2 %v3823_v6  ;;  %v3982_v6 = vld [vmem:[%s5090_s7] ss:$0 sm:$0xff] }
 0x202   :  { %v4580_v11 = vpop.eup %3999  ;;  %v516_v61 = vmul.f32 1.442695, %v511_v10 }
 0x203   :  { %v522_v12 = vsel %vm497_vm6, %v4580_v11, 0.0 }
 0x204   :  { %4003 = vpow2.f32 %v516_v61  ;;  %523 = vadd.xlane.f32.xlu2 %v522_v12  ;;  %v4584_v15 = vpop.eup %4001 }
 0x205   :  { %v650_v25 = vsel %vm497_vm6, %v4584_v15, 0.0  ;;  %774 = vmatpush.bf16.msrb.mxu2 %v3822_v1 }
 0x207   :  { %v506_v13 = vpop.xlane.xlu2 %505  ;;  %v631_v14 = vpop.xlane.xlu0 %630 }
 0x208   :  { %v512_v17 = vsub.f32 %v493_v43, %v506_v13  ;;  %v637_v18 = vsub.f32 %v619_v37, %v631_v14  ;;  %v431_v43 = vpop.f32.mrf.mxu2 }
 0x209   :  { %v634_v19 = vpop.xlane.xlu1 %633  ;;  %v432_v48 = vadd.f32 %v431_v43, %v250_v44  ;;  %v3819_v43 = vld [vmem:[#allocation8 + $0x10] sm:$0xff] }
 0x20a   :  { %v4586_v20 = vpop.eup %4003  ;;  %v518_v21 = vmul.f32 1.442695, %v512_v17  ;;  %v643_v23 = vmul.f32 1.442695, %v637_v18  ;;  %v638_v24 = vsub.f32 %v621_v45, %v634_v19 }
 0x20b   :  { %v525_v26 = vsel %vm497_vm6, %v4586_v20, 0.0  ;;  %v442_v54 = vpack.c.bf16 %v432_v48, %v432_v48 }
 0x20c   :  { %4005 = vpow2.f32 %v518_v21  ;;  %651 = vadd.xlane.f32.xlu2 %v650_v25  ;;  %526 = vadd.xlane.f32.xlu0 %v525_v26  ;;  %v645_v27 = vmul.f32 1.442695, %v638_v24 }
 0x20d   :  { %4007 = vpow2.f32 %v643_v23  ;;  %v549_v60 = vunpack.c.l.b16 %v442_v54 }
 0x20e   :  { %4009 = vpow2.f32 %v645_v27 }
 0x20f   :  { %v509_v28 = vpop.xlane.xlu2 %508  ;;  %v552_v3 = vpack.c.b16 %v549_v60, %v548_v59 }
 0x210   :  { %v513_v29 = vsub.f32 %v495_v57, %v509_v28  ;;  %v434_v45 = vpop.f32.mrf.mxu2 }
 0x211   :  { %v435_v46 = vadd.f32 %v434_v45, %v250_v44 }
 0x212   :  { %v4592_v30 = vpop.eup %4005  ;;  %v520_v32 = vmul.f32 1.442695, %v513_v29 }
 0x213   :  { %v4594_v35 = vpop.eup %4007  ;;  %v528_v36 = vsel %vm497_vm6, %v4592_v30, 0.0  ;;  %v444_v49 = vpack.c.bf16 %v435_v46, %v435_v46 }
 0x214   :  { %4011 = vpow2.f32 %v520_v32  ;;  %529 = vadd.xlane.f32.xlu0 %v528_v36  ;;  %v653_v37 = vsel %vm497_vm6, %v4594_v35, 0.0  ;;  %v4600_v38 = vpop.eup %4009 }
 0x215   :  { %654 = vadd.xlane.f32.xlu2 %v653_v37  ;;  %v656_v41 = vsel %vm497_vm6, %v4600_v38, 0.0  ;;  %v550_v57 = vunpack.c.l.b16 %v444_v49 }
 0x218   :  { %v436_v50 = vpop.f32.mrf.mxu2 }
 0x219   :  { %v437_v55 = vadd.f32 %v436_v50, %v250_v44  ;;  %v3818_v44 = vld [vmem:[#allocation8 + $0x8] sm:$0xff] }
 0x21a   :  { %v4602_v39 = vpop.eup %4011 }
 0x21b   :  { %v531_v40 = vsel %vm497_vm6, %v4602_v39, 0.0  ;;  %v446_v58 = vpack.c.bf16 %v437_v55, %v437_v55 }
 0x21c   :  { %532 = vadd.xlane.f32.xlu1 %v531_v40  ;;  %657 = vadd.xlane.f32.xlu0 %v656_v41  ;;  %v3821_v41 = vld [vmem:[#allocation8 + $0x20] sm:$0xff] }
 0x21d   :  { %v551_v62 = vunpack.c.l.b16 %v446_v58  ;;  %775 = vmatpush.bf16.msrb.mxu2 %v3821_v41 }
 0x21f   :  { %v553_v2 = vpack.c.b16 %v551_v62, %v550_v57 }
 0x221   :  { %568 = vmatpush.bf16.msrb.mxu3 %v553_v2  ;;  %681 = vmatpush.bf16.msrb.mxu1 %v553_v2 }
 0x222   :  { %776 = vmatpush.bf16.msrb.mxu2 %v3820_v42 }
 0x225   :  { %569 = vmatpush.bf16.msrb.mxu3 %v552_v3  ;;  %682 = vmatpush.bf16.msrb.mxu1 %v552_v3 }
 0x226   :  { %777 = vmatpush.bf16.msrb.mxu2 %v3819_v43  ;;  %v909_v43 = vld [vmem:[%s5086_s3] sm:$0xff] }
 0x22a   :  { %778 = vmatpush.bf16.msrb.mxu2 %v3818_v44  ;;  %v3237_v44 = vld [vmem:[%s5086_s3 + $0x58] sm:$0xff] }
 0x271   :  { %v649_v4 = vpop.xlane.xlu1 %648 }
 0x272   :  { %4013 = vrcp.f32 %v649_v4 }
 0x277   :  { %v524_v7 = vpop.xlane.xlu2 %523 }
 0x278   :  { %4015 = vrcp.f32 %v524_v7  ;;  %v4014_v10 = vpop.eup %4013 }
 0x279   :  { %v663_v14 = vmul.f32 %v4014_v10, %v4576_v8 }
 0x27e   :  { %v4016_v61 = vpop.eup %4015 }
 0x27f   :  { %v652_v9 = vpop.xlane.xlu2 %651  ;;  %v527_v56 = vpop.xlane.xlu0 %526  ;;  %v538_v19 = vmul.f32 %v4016_v61, %v4580_v11 }
 0x280   :  { %4017 = vrcp.f32 %v652_v9 }
 0x281   :  { %4019 = vrcp.f32 %v527_v56 }
 0x286   :  { %v4018_v12 = vpop.eup %4017 }
 0x287   :  { %v4020_v13 = vpop.eup %4019  ;;  %v664_v17 = vmul.f32 %v4018_v12, %v4584_v15  ;;  %v530_v18 = vpop.xlane.xlu0 %529 }
 0x288   :  { %v539_v21 = vmul.f32 %v4020_v13, %v4586_v20  ;;  %v655_v25 = vpop.xlane.xlu2 %654  ;;  %4021 = vrcp.f32 %v530_v18 }
 0x289   :  { %v667_v23 = vpack.c.bf16 %v664_v17, %v663_v14  ;;  %4023 = vrcp.f32 %v655_v25  ;;  %v4341_v25 = vmov 0  }
 0x28a   :  { %v542_v24 = vpack.c.bf16 %v539_v21, %v538_v19  ;;  %3979 = vset.pattern.permute.xlu0 %v4341_v25  ;;  %3980 = vset.pattern.permute.xlu1 %v4341_v25 }
 0x28b   :  { %3200 = vmatmul.msk.bf16.vlgmr.msrb.gmra.mxu1 %vm497_vm6, %v667_v23  ;;  %3981 = vset.pattern.permute.xlu2 %v4341_v25 }
 0x28c   :  { %3198 = vmatmul.msk.bf16.vlgmr.msrb.gmra.mxu3 %vm497_vm6, %v542_v24 }
 0x28e   :  { %v4022_v8 = vpop.eup %4021 }
 0x28f   :  { %v533_v26 = vpop.xlane.xlu1 %532  ;;  %v658_v27 = vpop.xlane.xlu0 %657  ;;  %v540_v11 = vmul.f32 %v4022_v8, %v4592_v30  ;;  %v3817_v30 = vld [vmem:[#allocation8] sm:$0xff] }
 0x290   :  { %4025 = vrcp.f32 %v533_v26  ;;  %v4024_v15 = vpop.eup %4023  ;;  %779 = vmatpush.bf16.msrb.mxu2 %v3817_v30  ;;  %v3234_v30 = vld [vmem:[%s5086_s3 + $0x40] sm:$0xff] }
 0x291   :  { %4027 = vrcp.f32 %v658_v27  ;;  %v665_v32 = vmul.f32 %v4024_v15, %v4594_v35 }
 0x296   :  { %v4026_v28 = vpop.eup %4025 }
 0x297   :  { %v4028_v29 = vpop.eup %4027  ;;  %v541_v20 = vmul.f32 %v4026_v28, %v4602_v39 }
 0x298   :  { %v666_v36 = vmul.f32 %v4028_v29, %v4600_v38 }
 0x299   :  { %v543_v37 = vpack.c.bf16 %v541_v20, %v540_v11 }
 0x29a   :  { %v668_v40 = vpack.c.bf16 %v666_v36, %v665_v32 }
 0x29c   :  { %3199 = vmatmul.msk.bf16.gmra.mxu3 %vm497_vm6, %v543_v37  ;;  %3201 = vmatmul.msk.bf16.gmra.mxu1 %vm497_vm6, %v668_v40 }
 0x308   :  { %v684_v39 = vpop.f32.mrf.mxu1 }
 0x309   :  { %v694_v47 = vsel %vm4524_vm3, %v684_v39, 0.0  ;;  %v3235_v39 = vld [vmem:[%s5086_s3 + $0x48] sm:$0xff] }
 0x30f   :  { %v571_v35 = vpop.f32.mrf.mxu3 }
 0x310   :  { %v686_v45 = vpop.f32.mrf.mxu1  ;;  %v581_v38 = vsel %vm208_vm2, %v571_v35, 0.0  ;;  %v910_v35 = vld [vmem:[%s5086_s3 + $0x8] sm:$0xff] }
 0x311   :  { %v695_v48 = vsel %vm4524_vm3, %v686_v45, 0.0  ;;  %v698_v50 = vadd.f32 %v694_v47, %v581_v38  ;;  %v912_v45 = vld [vmem:[%s5086_s3 + $0x18] sm:$0xff]  ;;  %v911_v38 = vld [vmem:[%s5086_s3 + $0x10] sm:$0xff] }
 0x312   :  { %v3840_v47 = vld [vmem:[#allocation10 + $0x78] sm:$0xff] }
 0x313   :  { %1195 = vmatpush.bf16.msra.mxu0 %v3840_v47  ;;  %v3984_v47 = vld [vmem:[%s5092_s9] ss:$0 sm:$0xff] }
 0x317   :  { %v573_v46 = vpop.f32.mrf.mxu3 }
 0x318   :  { %v582_v49 = vsel %vm208_vm2, %v573_v46, 0.0  ;;  %v3236_v46 = vld [vmem:[%s5086_s3 + $0x50] sm:$0xff] }
 0x319   :  { %v699_v51 = vadd.f32 %v695_v48, %v582_v49  ;;  %v689_v54 = vpop.f32.mrf.mxu1  ;;  %v3839_v48 = vld [vmem:[#allocation10 + $0x70] sm:$0xff]  ;;  %v3838_v49 = vld [vmem:[#allocation10 + $0x68] sm:$0xff] }
 0x31a   :  { %v696_v62 = vsel %vm4524_vm3, %v689_v54, 0.0  ;;  %1196 = vmatpush.bf16.msra.mxu0 %v3839_v48  ;;  %v3836_v54 = vld [vmem:[#allocation10 + $0x58] sm:$0xff] }
 0x31b   :  { %v702_v55 = vpack.c.bf16 %v699_v51, %v698_v50  ;;  %v3837_v50 = vld [vmem:[#allocation10 + $0x60] sm:$0xff]  ;;  %v3848_v51 = vld [vmem:[#allocation10 + $0xb8] sm:$0xff] }
 0x31c   :  { %1214 = vmatpush.bf16.msra.mxu1 %v3848_v51 }
 0x31d   :  { %780 = vmatmul.bf16.vlgmr.msrb.gmra.mxu2 %v702_v55  ;;  %v3847_v55 = vld [vmem:[#allocation10 + $0xb0] sm:$0xff] }
 0x31e   :  { %1197 = vmatpush.bf16.msra.mxu0 %v3838_v49 }
 0x31f   :  { %v576_v57 = vpop.f32.mrf.mxu3 }
 0x320   :  { %v583_v59 = vsel %vm208_vm2, %v576_v57, 0.0  ;;  %1215 = vmatpush.bf16.msra.mxu1 %v3847_v55  ;;  %v3835_v57 = vld [vmem:[#allocation10 + $0x50] sm:$0xff] }
 0x321   :  { %v691_v58 = vpop.f32.mrf.mxu1  ;;  %v700_v7 = vadd.f32 %v696_v62, %v583_v59  ;;  %v3846_v59 = vld [vmem:[#allocation10 + $0xa8] sm:$0xff]  ;;  %v3831_v62 = vld [vmem:[#allocation10 + $0x30] sm:$0xff] }
 0x322   :  { %v697_v2 = vsel %vm4524_vm3, %v691_v58, 0.0  ;;  %1198 = vmatpush.bf16.msra.mxu0 %v3837_v50  ;;  %v3832_v58 = vld [vmem:[#allocation10 + $0x38] sm:$0xff] }
 0x323   :  { %1176 = vmatpush.bf16.msra.mxu3 %v3832_v58 }
 0x324   :  { %1216 = vmatpush.bf16.msra.mxu1 %v3846_v59 }
 0x326   :  { %1199 = vmatpush.bf16.msra.mxu0 %v3836_v54 }
 0x327   :  { %v578_v60 = vpop.f32.mrf.mxu3  ;;  %1177 = vmatpush.bf16.msra.mxu3 %v3831_v62 }
 0x328   :  { %v584_v3 = vsel %vm208_vm2, %v578_v60, 0.0  ;;  %v3834_v60 = vld [vmem:[#allocation10 + $0x48] sm:$0xff] }
 0x329   :  { %v701_v4 = vadd.f32 %v697_v2, %v584_v3  ;;  %v3845_v2 = vld [vmem:[#allocation10 + $0xa0] sm:$0xff] }
 0x32a   :  { %1200 = vmatpush.bf16.msra.mxu0 %v3835_v57  ;;  %1217 = vmatpush.bf16.msra.mxu1 %v3845_v2 }
 0x32b   :  { %v703_v5 = vpack.c.bf16 %v701_v4, %v700_v7  ;;  %v3833_v4 = vld [vmem:[#allocation10 + $0x40] sm:$0xff] }
 0x32d   :  { %785 = vmatmul.bf16.gmra.mxu2 %v703_v5 }
 0x32e   :  { %1201 = vmatpush.bf16.msra.mxu0 %v3834_v60 }
 0x332   :  { %1202 = vmatpush.bf16.msra.mxu0 %v3833_v4 }
 0x3a0   :  { %v781_v9 = vpop.f32.mrf.mxu2 }
 0x3a1   :  { %v782_v56 = vadd.f32 %v3982_v6, %v781_v9  ;;  %v3844_v9 = vld [vmem:[#allocation10 + $0x98] sm:$0xff] }
 0x3a2   :  { %1218 = vmatpush.bf16.msra.mxu1 %v3844_v9 }
 0x3a3   :  { %v791_v1 = vadd.f32 %v782_v56, %v4483_v52  ;;  %v3829_v56 = vld [vmem:[#allocation10 + $0x20] sm:$0xff] }
 0x3a5   :  { %797 = vadd.xlane.f32.xlu1 %v791_v1 }
 0x3a8   :  { %v783_v10 = vpop.f32.mrf.mxu2 }
 0x3a9   :  { %v784_v61 = vadd.f32 %v3982_v6, %v783_v10 }
 0x3ab   :  { %v792_v12 = vadd.f32 %v784_v61, %v4485_v53 }
 0x3ad   :  { %799 = vadd.xlane.f32.xlu2 %v792_v12 }
 0x3b0   :  { %v786_v13 = vpop.f32.mrf.mxu2 }
 0x3b1   :  { %v787_v14 = vadd.f32 %v3982_v6, %v786_v13 }
 0x3b3   :  { %v793_v17 = vadd.f32 %v787_v14, %v4499_v63  ;;  %v3828_v14 = vld [vmem:[#allocation10 + $0x18] sm:$0xff] }
 0x3b5   :  { %801 = vadd.xlane.f32.xlu1 %v793_v17 }
 0x3b8   :  { %v788_v18 = vpop.f32.mrf.mxu2 }
 0x3b9   :  { %v789_v19 = vadd.f32 %v3982_v6, %v788_v18  ;;  %v3830_v6 = vld [vmem:[#allocation10 + $0x28] sm:$0xff] }
 0x3ba   :  { %1178 = vmatpush.bf16.msra.mxu3 %v3830_v6 }
 0x3bb   :  { %v794_v21 = vadd.f32 %v789_v19, %v4501_v0 }
 0x3bd   :  { %803 = vadd.xlane.f32.xlu0 %v794_v21 }
 0x3be   :  { %1179 = vmatpush.bf16.msra.mxu3 %v3829_v56 }
 0x3c2   :  { %1180 = vmatpush.bf16.msra.mxu3 %v3828_v14 }
 0x418   :  { %v798_v23 = vpop.xlane.xlu1 %797 }
 0x419   :  { %v805_v24 = vmul.f32 0.03125, %v798_v23  ;;  %v3841_v23 = vld [vmem:[#allocation10 + $0x80] sm:$0xff] }
 0x41b   :  { %v809_v52 = vsub.f32 %v791_v1, %v805_v24  ;;  %v3843_v1 = vld [vmem:[#allocation10 + $0x90] sm:$0xff] }
 0x41c   :  { %1219 = vmatpush.bf16.msra.mxu1 %v3843_v1 }
 0x41d   :  { %v4646_v53 = vsel %vm206_vm0, %v809_v52, 0.0 }
 0x41e   :  { %v819_v63 = vmul.f32 %v4646_v53, %v4646_v53 }
 0x420   :  { %v800_v26 = vpop.xlane.xlu2 %799  ;;  %823 = vadd.xlane.f32.xlu2 %v819_v63 }
 0x421   :  { %v806_v27 = vmul.f32 0.03125, %v800_v26 }
 0x423   :  { %v810_v8 = vsub.f32 %v792_v12, %v806_v27 }
 0x425   :  { %v4652_v0 = vsel %vm206_vm0, %v810_v8, 0.0  ;;  %v3826_v8 = vld [vmem:[#allocation10 + $0x8] sm:$0xff] }
 0x426   :  { %v820_v15 = vmul.f32 %v4652_v0, %v4652_v0 }
 0x428   :  { %825 = vadd.xlane.f32.xlu0 %v820_v15  ;;  %v802_v28 = vpop.xlane.xlu1 %801 }
 0x429   :  { %v807_v29 = vmul.f32 0.03125, %v802_v28 }
 0x42b   :  { %v811_v11 = vsub.f32 %v793_v17, %v807_v29  ;;  %v3842_v17 = vld [vmem:[#allocation10 + $0x88] sm:$0xff] }
 0x42c   :  { %1220 = vmatpush.bf16.msra.mxu1 %v3842_v17 }
 0x42d   :  { %v4658_v20 = vsel %vm206_vm0, %v811_v11, 0.0  ;;  %v3825_v11 = vld [vmem:[#allocation10] sm:$0xff] }
 0x42e   :  { %v821_v32 = vmul.f32 %v4658_v20, %v4658_v20 }
 0x430   :  { %v804_v36 = vpop.xlane.xlu0 %803  ;;  %827 = vadd.xlane.f32.xlu2 %v821_v32  ;;  %1221 = vmatpush.bf16.msra.mxu1 %v3841_v23 }
 0x431   :  { %v808_v37 = vmul.f32 0.03125, %v804_v36 }
 0x433   :  { %v812_v40 = vsub.f32 %v794_v21, %v808_v37  ;;  %v3827_v21 = vld [vmem:[#allocation10 + $0x10] sm:$0xff] }
 0x434   :  { %1181 = vmatpush.bf16.msra.mxu3 %v3827_v21 }
 0x435   :  { %v4664_v41 = vsel %vm206_vm0, %v812_v40, 0.0 }
 0x436   :  { %v822_v42 = vmul.f32 %v4664_v41, %v4664_v41 }
 0x438   :  { %829 = vadd.xlane.f32.xlu1 %v822_v42  ;;  %1182 = vmatpush.bf16.msra.mxu3 %v3826_v8 }
 0x43c   :  { %915 = vperm.xlu0 %3979, %v909_v43   ;;  %1183 = vmatpush.bf16.msra.mxu3 %v3825_v11 }
 0x444   :  { %968 = vperm.xlu0 %3979, %v3237_v44   ;;  %v3983_v44 = vld [vmem:[%s5091_s8] ss:$0 sm:$0xff] }
 0x448   :  { %953 = vperm.xlu2 %3981, %v3234_v30  }
 0x450   :  { %958 = vperm.xlu2 %3981, %v3235_v39  }
 0x451   :  { %920 = vperm.xlu1 %3980, %v910_v35  }
 0x458   :  { %930 = vperm.xlu2 %3981, %v912_v45  }
 0x459   :  { %925 = vperm.xlu1 %3980, %v911_v38  }
 0x461   :  { %963 = vperm.xlu1 %3980, %v3236_v46  }
 0x493   :  { %v824_v3 = vpop.xlane.xlu2 %823 }
 0x494   :  { %v831_v7 = vmul.f32 0.03125, %v824_v3 }
 0x496   :  { %v835_v5 = vadd.f32 1e-05, %v831_v7 }
 0x498   :  { %4029 = vrsqrt.f32 %v835_v5  ;;  %vm845_vm8 = vweird.f32 %v835_v5 }
 0x49b   :  { %v826_v10 = vpop.xlane.xlu0 %825 }
 0x49c   :  { %v832_v61 = vmul.f32 0.03125, %v826_v10 }
 0x49e   :  { %v4030_v12 = vpop.eup %4029  ;;  %v836_v13 = vadd.f32 1e-05, %v832_v61 }
 0x49f   :  { %v840_v18 = vmul.f32 %v4030_v12, %v835_v5  ;;  %vm846_vm7 = vweird.f32 %v4030_v12 }
 0x4a0   :  { %4031 = vrsqrt.f32 %v836_v13  ;;  %vm847_vm9 = vmor %vm845_vm8, %vm846_vm7  ;;  %vm855_vm11 = vweird.f32 %v836_v13 }
 0x4a1   :  { %v841_v19 = vmul.f32 %v4030_v12, %v840_v18 }
 0x4a3   :  { %v842_v24 = vmul.f32 0.5, %v841_v19  ;;  %v828_v25 = vpop.xlane.xlu2 %827 }
 0x4a4   :  { %v833_v52 = vmul.f32 0.03125, %v828_v25 }
 0x4a5   :  { %v843_v63 = vsub.f32 1.5, %v842_v24 }
 0x4a6   :  { %v4032_v26 = vpop.eup %4031  ;;  %v837_v27 = vadd.f32 1e-05, %v833_v52 }
 0x4a7   :  { %v844_v15 = vmul.f32 %v4030_v12, %v843_v63  ;;  %v850_v28 = vmul.f32 %v4032_v26, %v836_v13  ;;  %vm856_vm10 = vweird.f32 %v4032_v26 }
 0x4a8   :  { %4033 = vrsqrt.f32 %v837_v27  ;;  %vm857_vm12 = vmor %vm855_vm11, %vm856_vm10  ;;  %vm865_vm14 = vweird.f32 %v837_v27 }
 0x4a9   :  { %v851_v29 = vmul.f32 %v4032_v26, %v850_v28  ;;  %v848_v32 = vsel %vm847_vm9, %v4030_v12, %v844_v15 }
 0x4aa   :  { %v879_v30 = vmul.f32 %v848_v32, %v4646_v53 }
 0x4ab   :  { %v852_v36 = vmul.f32 0.5, %v851_v29  ;;  %v830_v37 = vpop.xlane.xlu1 %829  ;;  %v4704_v58 = vpop.permute.xlu2 %953 }
 0x4ac   :  { %v834_v40 = vmul.f32 0.03125, %v830_v37  ;;  %v886_v48 = vmul.f32 %v3983_v44, %v879_v30 }
 0x4ad   :  { %v853_v42 = vsub.f32 1.5, %v852_v36 }
 0x4ae   :  { %v4034_v43 = vpop.eup %4033  ;;  %v838_v39 = vadd.f32 1e-05, %v834_v40  ;;  %v4700_v55 = vadd.f32 %v3984_v47, %v886_v48  ;;  %v4733_v52 = vpop.permute.xlu0 %915 }
 0x4af   :  { %v854_v35 = vmul.f32 %v4032_v26, %v853_v42  ;;  %v860_v45 = vmul.f32 %v4034_v43, %v837_v27  ;;  %vm866_vm13 = vweird.f32 %v4034_v43 }
 0x4b0   :  { %4035 = vrsqrt.f32 %v838_v39  ;;  %vm867_vm15 = vmor %vm865_vm14, %vm866_vm13  ;;  %v937_v1 = vrot.slane %v4700_v55, 1  ;;  %vm875_vm8 = vweird.f32 %v838_v39 }
 0x4b1   :  { %v858_v38 = vsel %vm857_vm12, %v4032_v26, %v854_v35  ;;  %v861_v46 = vmul.f32 %v4034_v43, %v860_v45 }
 0x4b2   :  { %v880_v49 = vmul.f32 %v858_v38, %v4652_v0  ;;  %v4709_v0 = vshrl.u32 %v204_v16, 7 }
 0x4b3   :  { %v862_v50 = vmul.f32 0.5, %v861_v46  ;;  %v4720_v61 = vpop.permute.xlu2 %958 }
 0x4b4   :  { %v887_v51 = vmul.f32 %v3983_v44, %v880_v49  ;;  %vm941_vm1 = vcmp.lt.s32.totalorder %v4709_v0, 7  ;;  %vm904_vm10 = vcmp.lt.s32.totalorder %v4709_v0, 1  ;;  %v3864_v49 = vld [vmem:[#allocation11 + $0x78] sm:$0xff] }
 0x4b5   :  { %v863_v54 = vsub.f32 1.5, %v862_v50  ;;  %1482 = vmatpush.bf16.msrb.mxu3 %v3864_v49  ;;  %v3863_v50 = vld [vmem:[#allocation11 + $0x70] sm:$0xff] }
 0x4b6   :  { %v4036_v53 = vpop.eup %4035  ;;  %v4702_v57 = vadd.f32 %v3984_v47, %v887_v51  ;;  %v4748_v36 = vpop.permute.xlu0 %968  ;;  %v3862_v51 = vld [vmem:[#allocation11 + $0x68] sm:$0xff] }
 0x4b7   :  { %v864_v59 = vmul.f32 %v4034_v43, %v863_v54  ;;  %v870_v60 = vmul.f32 %v4036_v53, %v838_v39  ;;  %vm876_vm7 = vweird.f32 %v4036_v53  ;;  %v3861_v54 = vld [vmem:[#allocation11 + $0x60] sm:$0xff] }
 0x4b8   :  { %v976_v62 = vpack.c.bf16 %v4702_v57, %v4700_v55  ;;  %v938_v6 = vrot.slane %v4702_v57, 1  ;;  %vm877_vm9 = vmor %vm875_vm8, %vm876_vm7  ;;  %v899_v25 = vrot.slane %v4702_v57, 7 }
 0x4b9   :  { %v868_v2 = vsel %vm867_vm15, %v4034_v43, %v864_v59  ;;  %v871_v3 = vmul.f32 %v4036_v53, %v870_v60  ;;  %1483 = vmatpush.bf16.msrb.mxu3 %v3863_v50  ;;  %v3860_v59 = vld [vmem:[#allocation11 + $0x58] sm:$0xff]  ;;  %v3871_v60 = vld [vmem:[#allocation11 + $0xb0] sm:$0xff] }
 0x4ba   :  { %v881_v7 = vmul.f32 %v868_v2, %v4658_v20  ;;  %1203 = vmatmul.bf16.vlgmr.msra.gmra.mxu0 %v976_v62  ;;  %v944_v16 = vsel %vm941_vm1, %v937_v1, %v938_v6  ;;  %v3859_v62 = vld [vmem:[#allocation11 + $0x50] sm:$0xff]  ;;  %v3856_v2 = vld [vmem:[#allocation11 + $0x38] sm:$0xff] }
 0x4bb   :  { %v872_v4 = vmul.f32 0.5, %v871_v3  ;;  %v971_v17 = vmul.f32 %v4704_v58, %v944_v16  ;;  %v4759_v39 = vpop.permute.xlu2 %930  ;;  %v3870_v3 = vld [vmem:[#allocation11 + $0xa8] sm:$0xff]  ;;  %1463 = vmatpush.bf16.msra.mxu2 %v3856_v2  ;;  %v3867_v16 = vld [vmem:[#allocation11 + $0x90] sm:$0xff] }
 0x4bc   :  { %v888_v5 = vmul.f32 %v3983_v44, %v881_v7  ;;  %v3858_v7 = vld [vmem:[#allocation11 + $0x48] sm:$0xff] }
 0x4bd   :  { %v873_v9 = vsub.f32 1.5, %v872_v4  ;;  %1484 = vmatpush.bf16.msrb.mxu3 %v3862_v51  ;;  %v3855_v4 = vld [vmem:[#allocation11 + $0x30] sm:$0xff] }
 0x4be   :  { %v4714_v56 = vadd.f32 %v3984_v47, %v888_v5  ;;  %v3869_v5 = vld [vmem:[#allocation11 + $0xa0] sm:$0xff] }
 0x4bf   :  { %v874_v10 = vmul.f32 %v4036_v53, %v873_v9  ;;  %1464 = vmatpush.bf16.msra.mxu2 %v3855_v4  ;;  %v3854_v9 = vld [vmem:[#allocation11 + $0x28] sm:$0xff] }
 0x4c0   :  { %v939_v20 = vrot.slane %v4714_v56, 1  ;;  %v900_v30 = vrot.slane %v4714_v56, 7 }
 0x4c1   :  { %v878_v12 = vsel %vm877_vm9, %v4036_v53, %v874_v10  ;;  %v3872_v53 = vld [vmem:[#allocation11 + $0xb8] sm:$0xff]  ;;  %1485 = vmatpush.bf16.msrb.mxu3 %v3861_v54  ;;  %v3853_v10 = vld [vmem:[#allocation11 + $0x20] sm:$0xff] }
 0x4c2   :  { %v882_v13 = vmul.f32 %v878_v12, %v4664_v41  ;;  %v943_v14 = vsel %vm941_vm1, %v938_v6, %v939_v20  ;;  %v898_v41 = vrot.slane %v4700_v55, 7  ;;  %v906_v38 = vsel %vm904_vm10, %v899_v25, %v900_v30  ;;  %1501 = vmatpush.bf16.msrb.mxu0 %v3872_v53  ;;  %v3857_v6 = vld [vmem:[#allocation11 + $0x40] sm:$0xff]  ;;  %v3866_v12 = vld [vmem:[#allocation11 + $0x88] sm:$0xff] }
 0x4c3   :  { %v972_v18 = vmul.f32 %v4720_v61, %v943_v14  ;;  %v4727_v19 = vpop.permute.xlu1 %920  ;;  %1465 = vmatpush.bf16.msra.mxu2 %v3854_v9  ;;  %v3865_v14 = vld [vmem:[#allocation11 + $0x80] sm:$0xff] }
 0x4c4   :  { %v889_v21 = vmul.f32 %v3983_v44, %v882_v13  ;;  %v907_v8 = vsel %vm904_vm10, %v898_v41, %v899_v25  ;;  %v3851_v13 = vld [vmem:[#allocation11 + $0x10] sm:$0xff] }
 0x4c5   :  { %v977_v23 = vpack.c.bf16 %v972_v18, %v971_v17  ;;  %v934_v28 = vmul.f32 %v4727_v19, %v907_v8  ;;  %1486 = vmatpush.bf16.msrb.mxu3 %v3860_v59 }
 0x4c6   :  { %v4729_v24 = vadd.f32 %v3984_v47, %v889_v21  ;;  %1502 = vmatpush.bf16.msrb.mxu0 %v3871_v60  ;;  %v3985_v21 = vld [vmem:[%s5094_s11] ss:$0 sm:$0xff] }
 0x4c7   :  { %1222 = vmatmul.bf16.vlgmr.msra.gmra.mxu1 %v977_v23  ;;  %1466 = vmatpush.bf16.msra.mxu2 %v3853_v10  ;;  %v3850_v23 = vld [vmem:[#allocation11 + $0x8] sm:$0xff] }
 0x4c8   :  { %v901_v63 = vrot.slane %v4729_v24, 7  ;;  %v979_v26 = vpack.c.bf16 %v4729_v24, %v4714_v56  ;;  %v940_v32 = vrot.slane %v4729_v24, 1 }
 0x4c9   :  { %1487 = vmatpush.bf16.msrb.mxu3 %v3859_v62 }
 0x4ca   :  { %v908_v27 = vsel %vm904_vm10, %v901_v63, %v898_v41  ;;  %1208 = vmatmul.bf16.gmra.mxu0 %v979_v26  ;;  %v945_v37 = vsel %vm941_vm1, %v940_v32, %v937_v1  ;;  %v942_v42 = vsel %vm941_vm1, %v939_v20, %v940_v32  ;;  %v905_v45 = vsel %vm904_vm10, %v900_v30, %v901_v63  ;;  %v3868_v1 = vld [vmem:[#allocation11 + $0x98] sm:$0xff]  ;;  %v3849_v63 = vld [vmem:[#allocation11] sm:$0xff] }
 0x4cb   :  { %v933_v15 = vmul.f32 %v4733_v52, %v908_v27  ;;  %v4745_v29 = vpop.permute.xlu1 %925  ;;  %v974_v44 = vmul.f32 %v4748_v36, %v945_v37  ;;  %v936_v47 = vmul.f32 %v4759_v39, %v905_v45  ;;  %1503 = vmatpush.bf16.msrb.mxu0 %v3870_v3  ;;  %v3852_v20 = vld [vmem:[#allocation11 + $0x18] sm:$0xff] }
 0x4cc   :  { %v935_v46 = vmul.f32 %v4745_v29, %v906_v38  ;;  %1467 = vmatpush.bf16.msra.mxu2 %v3852_v20 }
 0x4cd   :  { %v975_v11 = vpack.c.bf16 %v934_v28, %v933_v15  ;;  %1488 = vmatpush.bf16.msrb.mxu3 %v3858_v7 }
 0x4ce   :  { %v978_v48 = vpack.c.bf16 %v936_v47, %v935_v46 }
 0x4cf   :  { %1184 = vmatmul.bf16.vlgmr.msra.gmra.mxu3 %v975_v11  ;;  %1504 = vmatpush.bf16.msrb.mxu0 %v3869_v5 }
 0x4d0   :  { %1468 = vmatpush.bf16.msra.mxu2 %v3851_v13 }
 0x4d1   :  { %1489 = vmatpush.bf16.msrb.mxu3 %v3857_v6 }
 0x4d3   :  { %v4752_v40 = vpop.permute.xlu1 %963  ;;  %1505 = vmatpush.bf16.msrb.mxu0 %v3868_v1 }
 0x4d4   :  { %v973_v43 = vmul.f32 %v4752_v40, %v942_v42  ;;  %1469 = vmatpush.bf16.msra.mxu2 %v3850_v23 }
 0x4d6   :  { %v980_v35 = vpack.c.bf16 %v974_v44, %v973_v43 }
 0x4d7   :  { %1506 = vmatpush.bf16.msrb.mxu0 %v3867_v16 }
 0x4d8   :  { %1227 = vmatmul.bf16.gmra.mxu1 %v980_v35  ;;  %1470 = vmatpush.bf16.msra.mxu2 %v3849_v63 }
 0x4db   :  { %1507 = vmatpush.bf16.msrb.mxu0 %v3866_v12 }
 0x4df   :  { %1189 = vmatmul.bf16.gmra.mxu3 %v978_v48  ;;  %1508 = vmatpush.bf16.msrb.mxu0 %v3865_v14 }
 0x537   :  { %v1204_v17 = vpop.f32.mrf.mxu0 }
 0x53f   :  { %v1206_v26 = vpop.f32.mrf.mxu0 }
 0x544   :  { %v1223_v18 = vpop.f32.mrf.mxu1 }
 0x547   :  { %v1209_v44 = vpop.f32.mrf.mxu0 }
 0x54c   :  { %v1225_v8 = vpop.f32.mrf.mxu1 }
 0x54f   :  { %v1211_v60 = vpop.f32.mrf.mxu0 }
 0x552   :  { %v1185_v25 = vpop.f32.mrf.mxu3 }
 0x553   :  { %v1186_v41 = vadd.f32 %v3985_v21, %v1185_v25 }
 0x555   :  { %v1205_v27 = vadd.f32 %v1204_v17, %v1186_v41  ;;  %v1228_v38 = vpop.f32.mrf.mxu1 }
 0x557   :  { %v1224_v11 = vadd.f32 %v1223_v18, %v1205_v27 }
 0x559   :  { %v1233_v42 = vmax.f32 %v1224_v11, 0.0 }
 0x55a   :  { %v1187_v15 = vpop.f32.mrf.mxu3 }
 0x55b   :  { %v1188_v28 = vadd.f32 %v3985_v21, %v1187_v15  ;;  %v1250_v49 = vrot.slane %v1233_v42, 1  ;;  %v1238_v1 = vrot.slane %v1233_v42, 7 }
 0x55d   :  { %v1207_v32 = vadd.f32 %v1206_v26, %v1188_v28  ;;  %v1230_v3 = vpop.f32.mrf.mxu1 }
 0x55f   :  { %v1226_v37 = vadd.f32 %v1225_v8, %v1207_v32 }
 0x561   :  { %v1234_v43 = vmax.f32 %v1226_v37, 0.0 }
 0x562   :  { %v1190_v30 = vpop.f32.mrf.mxu3 }
 0x563   :  { %v1191_v35 = vadd.f32 %v3985_v21, %v1190_v30  ;;  %v1263_v45 = vpack.c.bf16 %v1234_v43, %v1233_v42  ;;  %v1251_v47 = vrot.slane %v1234_v43, 1  ;;  %v1239_v5 = vrot.slane %v1234_v43, 7  ;;  %v3986_v42 = vld [vmem:[%s5096_s13] ss:$0 sm:$0xff] }
 0x565   :  { %v1210_v46 = vadd.f32 %v1209_v44, %v1191_v35  ;;  %1490 = vmatmul.bf16.vlgmr.msrb.gmra.mxu3 %v1263_v45  ;;  %v1256_v59 = vsel %vm941_vm1, %v1250_v49, %v1251_v47  ;;  %v1244_v12 = vsel %vm904_vm10, %v1238_v1, %v1239_v5 }
 0x566   :  { %v1258_v7 = vmul.f32 %v1256_v59, %v4704_v58  ;;  %v1247_v18 = vmul.f32 %v1244_v12, %v4727_v19 }
 0x567   :  { %v1229_v48 = vadd.f32 %v1228_v38, %v1210_v46 }
 0x569   :  { %v1235_v50 = vmax.f32 %v1229_v48, 0.0 }
 0x56a   :  { %v1192_v51 = vpop.f32.mrf.mxu3 }
 0x56b   :  { %v1252_v54 = vrot.slane %v1235_v50, 1  ;;  %v1193_v53 = vadd.f32 %v3985_v21, %v1192_v51  ;;  %v1240_v26 = vrot.slane %v1235_v50, 7 }
 0x56d   :  { %v1212_v62 = vadd.f32 %v1211_v60, %v1193_v53  ;;  %v1255_v2 = vsel %vm941_vm1, %v1251_v47, %v1252_v54  ;;  %v1243_v15 = vsel %vm904_vm10, %v1239_v5, %v1240_v26 }
 0x56e   :  { %v1259_v4 = vmul.f32 %v1255_v2, %v4720_v61  ;;  %v1248_v11 = vmul.f32 %v1243_v15, %v4745_v29 }
 0x56f   :  { %v1231_v6 = vadd.f32 %v1230_v3, %v1212_v62 }
 0x570   :  { %v1264_v9 = vpack.c.bf16 %v1259_v4, %v1258_v7 }
 0x571   :  { %v1236_v10 = vmax.f32 %v1231_v6, 0.0 }
 0x572   :  { %1509 = vmatmul.bf16.vlgmr.msrb.gmra.mxu0 %v1264_v9 }
 0x573   :  { %v1241_v16 = vrot.slane %v1236_v10, 7  ;;  %v1266_v20 = vpack.c.bf16 %v1236_v10, %v1235_v50  ;;  %v1253_v14 = vrot.slane %v1236_v10, 1 }
 0x575   :  { %1495 = vmatmul.bf16.gmra.mxu3 %v1266_v20  ;;  %v1245_v13 = vsel %vm904_vm10, %v1241_v16, %v1238_v1  ;;  %v1254_v23 = vsel %vm941_vm1, %v1252_v54, %v1253_v14  ;;  %v1257_v25 = vsel %vm941_vm1, %v1253_v14, %v1250_v49  ;;  %v1242_v8 = vsel %vm904_vm10, %v1240_v26, %v1241_v16 }
 0x576   :  { %v1246_v17 = vmul.f32 %v1245_v13, %v4733_v52  ;;  %v1260_v41 = vmul.f32 %v1254_v23, %v4752_v40  ;;  %v1261_v63 = vmul.f32 %v1257_v25, %v4748_v36  ;;  %v1249_v28 = vmul.f32 %v1242_v8, %v4759_v39 }
 0x578   :  { %v1262_v21 = vpack.c.bf16 %v1247_v18, %v1246_v17  ;;  %v1267_v27 = vpack.c.bf16 %v1261_v63, %v1260_v41  ;;  %v1265_v32 = vpack.c.bf16 %v1249_v28, %v1248_v11  ;;  %v3517_v11 = vld [vmem:[#allocation7 + $0x168] sm:$0xf] }
 0x57a   :  { %1471 = vmatmul.bf16.vlgmr.msra.gmra.mxu2 %v1262_v21 }
 0x582   :  { %1514 = vmatmul.bf16.gmra.mxu0 %v1267_v27 }
 0x58a   :  { %1476 = vmatmul.bf16.gmra.mxu2 %v1265_v32  ;;  %v3895_v32 = vld [vmem:[#allocation7 + $0x170] sm:$0xf0] }
 0x5e8   :  { %v1491_v37 = vpop.f32.mrf.mxu3 }
 0x5ef   :  { %v1510_v43 = vpop.f32.mrf.mxu0 }
 0x5f0   :  { %v1493_v38 = vpop.f32.mrf.mxu3 }
 0x5f7   :  { %v1512_v47 = vpop.f32.mrf.mxu0 }
 0x5f8   :  { %v1496_v53 = vpop.f32.mrf.mxu3 }
 0x5fd   :  { %v1472_v44 = vpop.f32.mrf.mxu2 }
 0x5fe   :  { %v1473_v30 = vadd.f32 %v3986_v42, %v1472_v44  ;;  %v3525_v44 = vld [vmem:[#allocation7 + $0x170] sm:$0xf] }
 0x5ff   :  { %v1515_v62 = vpop.f32.mrf.mxu0 }
 0x600   :  { %v1492_v35 = vadd.f32 %v1491_v37, %v1473_v30  ;;  %v3894_v37 = vld [vmem:[#allocation7 + $0x16c] sm:$0xf]  ;;  %v3896_v30 = vld [vmem:[#allocation7 + $0x178] sm:$0xf0] }
 0x602   :  { %v1511_v45 = vadd.f32 %v1510_v43, %v1492_v35  ;;  %v3519_v43 = vld [vmem:[#allocation7 + $0x174] sm:$0xf0] }
 0x603   :  { %v3522_v35 = vor.u32 %v3894_v37, %v3519_v43  ;;  %v3459_v37 = vld [vmem:[#allocation7 + $0xfc] sm:$0xf0]  ;;  %v3881_v43 = vld [vmem:[#allocation7 + $0x100] sm:$0xf0] }
 0x604   :  { %v1520_v46 = vadd.f32 %v1511_v45, %v4700_v55  ;;  %v1498_v55 = vpop.f32.mrf.mxu3  ;;  %v3526_v45 = vor.u32 %v3896_v30, %v3525_v44 }
 0x605   :  { %v1474_v48 = vpop.f32.mrf.mxu2  ;;  %1815 = vmatpush.bf16.msrb.mxu2 %v3522_v35  ;;  %v3445_v35 = vld [vmem:[#allocation7 + $0xd8] sm:$0xf] }
 0x606   :  { %v1475_v49 = vadd.f32 %v3986_v42, %v1474_v48  ;;  %1526 = vadd.xlane.f32.xlu2 %v1520_v46  ;;  %1834 = vmatpush.bf16.msra.mxu3 %v3526_v45  ;;  %v3877_v45 = vld [vmem:[#allocation7 + $0xe0] sm:$0xf0] }
 0x607   :  { %v1517_v9 = vpop.f32.mrf.mxu0 }
 0x608   :  { %v1494_v50 = vadd.f32 %v1493_v38, %v1475_v49  ;;  %v3505_v38 = vld [vmem:[#allocation7 + $0x150] sm:$0xf]  ;;  %v3507_v49 = vld [vmem:[#allocation7 + $0x15c] sm:$0xf0] }
 0x60a   :  { %v1513_v51 = vadd.f32 %v1512_v47, %v1494_v50  ;;  %v3891_v47 = vld [vmem:[#allocation7 + $0x154] sm:$0xf]  ;;  %v3513_v50 = vld [vmem:[#allocation7 + $0x158] sm:$0xf] }
 0x60c   :  { %v1521_v54 = vadd.f32 %v1513_v51, %v4702_v57  ;;  %v3893_v51 = vld [vmem:[#allocation7 + $0x160] sm:$0xf0] }
 0x60d   :  { %v1477_v59 = vpop.f32.mrf.mxu2 }
 0x60e   :  { %v1478_v60 = vadd.f32 %v3986_v42, %v1477_v59  ;;  %1528 = vadd.xlane.f32.xlu1 %v1521_v54  ;;  %v3493_v59 = vld [vmem:[#allocation7 + $0x138] sm:$0xf] }
 0x610   :  { %v1497_v2 = vadd.f32 %v1496_v53, %v1478_v60  ;;  %v3514_v53 = vor.u32 %v3893_v51, %v3513_v50  ;;  %v3889_v60 = vld [vmem:[#allocation7 + $0x140] sm:$0xf0] }
 0x612   :  { %v1516_v3 = vadd.f32 %v1515_v62, %v1497_v2  ;;  %1835 = vmatpush.bf16.msra.mxu3 %v3514_v53  ;;  %v3888_v62 = vld [vmem:[#allocation7 + $0x13c] sm:$0xf]  ;;  %v3494_v2 = vor.u32 %v3889_v60, %v3493_v59  ;;  %v3433_v59 = vld [vmem:[#allocation7 + $0xc0] sm:$0xf]  ;;  %v3874_v60 = vld [vmem:[#allocation7 + $0xc8] sm:$0xf0] }
 0x614   :  { %v1522_v7 = vadd.f32 %v1516_v3, %v4714_v56  ;;  %v3495_v3 = vld [vmem:[#allocation7 + $0x144] sm:$0xf0] }
 0x615   :  { %v1479_v4 = vpop.f32.mrf.mxu2 }
 0x616   :  { %v1480_v5 = vadd.f32 %v3986_v42, %v1479_v4  ;;  %1530 = vadd.xlane.f32.xlu0 %v1522_v7  ;;  %v3518_v42 = vor.u32 %v3895_v32, %v3517_v11  ;;  %v3890_v4 = vld [vmem:[#allocation7 + $0x148] sm:$0xf0]  ;;  %v3879_v11 = vld [vmem:[#allocation7 + $0xf4] sm:$0xf] }
 0x617   :  { %v3462_v44 = vor.u32 %v3879_v11, %v3459_v37 }
 0x618   :  { %v1499_v6 = vadd.f32 %v1498_v55, %v1480_v5  ;;  %1796 = vmatpush.bf16.msrb.mxu1 %v3518_v42  ;;  %v3498_v5 = vor.u32 %v3888_v62, %v3495_v3  ;;  %v3465_v42 = vld [vmem:[#allocation7 + $0xf8] sm:$0xf]  ;;  %v3434_v62 = vor.u32 %v3874_v60, %v3433_v59  ;;  %v3435_v3 = vld [vmem:[#allocation7 + $0xcc] sm:$0xf0] }
 0x619   :  { %v3466_v30 = vor.u32 %v3881_v43, %v3465_v42  ;;  %v3987_v43 = vld [vmem:[%s5097_s14] ss:$0 sm:$0xff] }
 0x61a   :  { %v1518_v1 = vadd.f32 %v1517_v9, %v1499_v6  ;;  %v3481_v6 = vld [vmem:[#allocation7 + $0x120] sm:$0xf]  ;;  %v3886_v9 = vld [vmem:[#allocation7 + $0x128] sm:$0xf0] }
 0x61c   :  { %v1523_v10 = vadd.f32 %v1518_v1, %v4729_v24  ;;  %v3885_v1 = vld [vmem:[#allocation7 + $0x124] sm:$0xf] }
 0x61e   :  { %1532 = vadd.xlane.f32.xlu2 %v1523_v10 }
 0x679   :  { %v1527_v57 = vpop.xlane.xlu2 %1526 }
 0x67a   :  { %v1534_v16 = vmul.f32 0.03125, %v1527_v57  ;;  %v3483_v57 = vld [vmem:[#allocation7 + $0x12c] sm:$0xf0] }
 0x67c   :  { %v1538_v20 = vsub.f32 %v1520_v46, %v1534_v16  ;;  %v3892_v46 = vld [vmem:[#allocation7 + $0x158] sm:$0xf0]  ;;  %v3489_v16 = vld [vmem:[#allocation7 + $0x128] sm:$0xf] }
 0x67d   :  { %v3506_v48 = vor.u32 %v3892_v46, %v3505_v38  ;;  %v3876_v38 = vld [vmem:[#allocation7 + $0xdc] sm:$0xf]  ;;  %v3446_v46 = vor.u32 %v3877_v45, %v3445_v35 }
 0x67e   :  { %v4803_v12 = vsel %vm206_vm0, %v1538_v20, 0.0  ;;  %v3887_v20 = vld [vmem:[#allocation7 + $0x130] sm:$0xf0] }
 0x67f   :  { %v1546_v56 = vmul.f32 %v4803_v12, %v4803_v12  ;;  %1797 = vmatpush.bf16.msrb.mxu1 %v3506_v48  ;;  %v3453_v48 = vld [vmem:[#allocation7 + $0xe0] sm:$0xf] }
 0x681   :  { %v1529_v13 = vpop.xlane.xlu1 %1528  ;;  %1550 = vadd.xlane.f32.xlu1 %v1546_v56  ;;  %v3486_v56 = vor.u32 %v3885_v1, %v3483_v57 }
 0x682   :  { %v1535_v14 = vmul.f32 0.03125, %v1529_v13  ;;  %v3490_v13 = vor.u32 %v3887_v20, %v3489_v16 }
 0x683   :  { %1798 = vmatpush.bf16.msrb.mxu1 %v3494_v2  ;;  %v3873_v2 = vld [vmem:[#allocation7 + $0xc4] sm:$0xf] }
 0x684   :  { %v1539_v17 = vsub.f32 %v1521_v54, %v1535_v14  ;;  %v3510_v54 = vor.u32 %v3891_v47, %v3507_v49  ;;  %v3469_v14 = vld [vmem:[#allocation7 + $0x108] sm:$0xf]  ;;  %v3878_v49 = vld [vmem:[#allocation7 + $0xe8] sm:$0xf0] }
 0x685   :  { %v3447_v47 = vld [vmem:[#allocation7 + $0xe4] sm:$0xf0]  ;;  %v3454_v51 = vor.u32 %v3878_v49, %v3453_v48 }
 0x686   :  { %v4809_v18 = vsel %vm206_vm0, %v1539_v17, 0.0  ;;  %1816 = vmatpush.bf16.msrb.mxu2 %v3510_v54  ;;  %v3883_v17 = vld [vmem:[#allocation7 + $0x110] sm:$0xf0]  ;;  %v3450_v50 = vor.u32 %v3876_v38, %v3447_v47  ;;  %v3988_v47 = vld [vmem:[#allocation13] ss:$0 sm:$0xff] }
 0x687   :  { %v1547_v24 = vmul.f32 %v4809_v18, %v4809_v18 }
 0x689   :  { %1552 = vadd.xlane.f32.xlu2 %v1547_v24  ;;  %v1531_v21 = vpop.xlane.xlu0 %1530  ;;  %v3882_v24 = vld [vmem:[#allocation7 + $0x10c] sm:$0xf] }
 0x68a   :  { %v1536_v23 = vmul.f32 0.03125, %v1531_v21  ;;  %1817 = vmatpush.bf16.msrb.mxu2 %v3498_v5  ;;  %v3470_v21 = vor.u32 %v3883_v17, %v3469_v14  ;;  %v3438_v5 = vor.u32 %v3873_v2, %v3435_v3 }
 0x68c   :  { %v1540_v25 = vsub.f32 %v1522_v7, %v1536_v23  ;;  %v3501_v7 = vld [vmem:[#allocation7 + $0x140] sm:$0xf]  ;;  %v3471_v23 = vld [vmem:[#allocation7 + $0x114] sm:$0xf0] }
 0x68d   :  { %v3502_v55 = vor.u32 %v3890_v4, %v3501_v7  ;;  %v3441_v7 = vld [vmem:[#allocation7 + $0xc8] sm:$0xf] }
 0x68e   :  { %v4815_v41 = vsel %vm206_vm0, %v1540_v25, 0.0  ;;  %1818 = vmatpush.bf16.msrb.mxu2 %v3486_v56  ;;  %v3477_v25 = vld [vmem:[#allocation7 + $0x110] sm:$0xf] }
 0x68f   :  { %v1548_v63 = vmul.f32 %v4815_v41, %v4815_v41  ;;  %1836 = vmatpush.bf16.msra.mxu3 %v3502_v55  ;;  %v3875_v55 = vld [vmem:[#allocation7 + $0xd0] sm:$0xf0] }
 0x691   :  { %v1533_v26 = vpop.xlane.xlu2 %1532  ;;  %1554 = vadd.xlane.f32.xlu0 %v1548_v63  ;;  %v3884_v63 = vld [vmem:[#allocation7 + $0x118] sm:$0xf0] }
 0x692   :  { %v1537_v27 = vmul.f32 0.03125, %v1533_v26  ;;  %v3474_v26 = vor.u32 %v3882_v24, %v3471_v23 }
 0x693   :  { %1837 = vmatpush.bf16.msra.mxu3 %v3490_v13 }
 0x694   :  { %v1541_v8 = vsub.f32 %v1523_v10, %v1537_v27  ;;  %v3482_v10 = vor.u32 %v3886_v9, %v3481_v6  ;;  %v3478_v27 = vor.u32 %v3884_v63, %v3477_v25  ;;  %1819 = vmatpush.bf16.msrb.mxu2 %v3474_v26  ;;  %v3442_v6 = vor.u32 %v3875_v55, %v3441_v7 }
 0x696   :  { %v4821_v15 = vsel %vm206_vm0, %v1541_v8, 0.0  ;;  %1799 = vmatpush.bf16.msrb.mxu1 %v3482_v10  ;;  %v3457_v8 = vld [vmem:[#allocation7 + $0xf0] sm:$0xf] }
 0x697   :  { %v1549_v28 = vmul.f32 %v4821_v15, %v4821_v15  ;;  %1838 = vmatpush.bf16.msra.mxu3 %v3478_v27 }
 0x698   :  { %1820 = vmatpush.bf16.msrb.mxu2 %v3462_v44 }
 0x699   :  { %1556 = vadd.xlane.f32.xlu1 %v1549_v28  ;;  %v3880_v28 = vld [vmem:[#allocation7 + $0xf8] sm:$0xf0] }
 0x69a   :  { %1800 = vmatpush.bf16.msrb.mxu1 %v3470_v21  ;;  %v3458_v32 = vor.u32 %v3880_v28, %v3457_v8 }
 0x69b   :  { %1839 = vmatpush.bf16.msra.mxu3 %v3466_v30 }
 0x69c   :  { %1821 = vmatpush.bf16.msrb.mxu2 %v3450_v50 }
 0x69e   :  { %1801 = vmatpush.bf16.msrb.mxu1 %v3458_v32 }
 0x69f   :  { %1840 = vmatpush.bf16.msra.mxu3 %v3454_v51 }
 0x6a0   :  { %1822 = vmatpush.bf16.msrb.mxu2 %v3438_v5 }
 0x6a2   :  { %1802 = vmatpush.bf16.msrb.mxu1 %v3446_v46 }
 0x6a3   :  { %1841 = vmatpush.bf16.msra.mxu3 %v3442_v6 }
 0x6a6   :  { %1803 = vmatpush.bf16.msrb.mxu1 %v3434_v62 }
 0x6f4   :  { %v1551_v54 = vpop.xlane.xlu1 %1550 }
 0x6f5   :  { %v1558_v53 = vmul.f32 0.03125, %v1551_v54 }
 0x6f7   :  { %v1562_v4 = vadd.f32 1e-05, %v1558_v53 }
 0x6f9   :  { %4037 = vrsqrt.f32 %v1562_v4  ;;  %vm1572_vm12 = vweird.f32 %v1562_v4 }
 0x6fc   :  { %v1553_v9 = vpop.xlane.xlu2 %1552 }
 0x6fd   :  { %v1559_v1 = vmul.f32 0.03125, %v1553_v9 }
 0x6ff   :  { %v4038_v10 = vpop.eup %4037  ;;  %v1563_v57 = vadd.f32 1e-05, %v1559_v1 }
 0x700   :  { %v1567_v16 = vmul.f32 %v4038_v10, %v1562_v4  ;;  %vm1573_vm11 = vweird.f32 %v4038_v10 }
 0x701   :  { %4039 = vrsqrt.f32 %v1563_v57  ;;  %vm1574_vm13 = vmor %vm1572_vm12, %vm1573_vm11  ;;  %vm1582_vm15 = vweird.f32 %v1563_v57 }
 0x702   :  { %v1568_v20 = vmul.f32 %v4038_v10, %v1567_v16 }
 0x704   :  { %v1569_v56 = vmul.f32 0.5, %v1568_v20  ;;  %v1555_v13 = vpop.xlane.xlu0 %1554 }
 0x705   :  { %v1560_v14 = vmul.f32 0.03125, %v1555_v13 }
 0x706   :  { %v1570_v17 = vsub.f32 1.5, %v1569_v56 }
 0x707   :  { %v4040_v24 = vpop.eup %4039  ;;  %v1564_v21 = vadd.f32 1e-05, %v1560_v14 }
 0x708   :  { %v1571_v23 = vmul.f32 %v4038_v10, %v1570_v17  ;;  %v1577_v25 = vmul.f32 %v4040_v24, %v1563_v57  ;;  %vm1583_vm14 = vweird.f32 %v4040_v24 }
 0x709   :  { %4041 = vrsqrt.f32 %v1564_v21  ;;  %vm1584_vm7 = vmor %vm1582_vm15, %vm1583_vm14  ;;  %vm1592_vm9 = vweird.f32 %v1564_v21 }
 0x70a   :  { %v1578_v63 = vmul.f32 %v4040_v24, %v1577_v25  ;;  %v1575_v26 = vsel %vm1574_vm13, %v4038_v10, %v1571_v23 }
 0x70b   :  { %v1606_v37 = vmul.f32 %v1575_v26, %v4803_v12 }
 0x70c   :  { %v1579_v27 = vmul.f32 0.5, %v1578_v63  ;;  %v1557_v8 = vpop.xlane.xlu1 %1556 }
 0x70d   :  { %v1561_v28 = vmul.f32 0.03125, %v1557_v8  ;;  %v1613_v46 = vmul.f32 %v3987_v43, %v1606_v37 }
 0x70e   :  { %v1580_v11 = vsub.f32 1.5, %v1579_v27 }
 0x70f   :  { %v4042_v32 = vpop.eup %4041  ;;  %v1565_v42 = vadd.f32 1e-05, %v1561_v28  ;;  %v4830_v51 = vadd.f32 %v3988_v47, %v1613_v46 }
 0x710   :  { %v1581_v44 = vmul.f32 %v4040_v24, %v1580_v11  ;;  %v1587_v30 = vmul.f32 %v4042_v32, %v1564_v21  ;;  %vm1593_vm8 = vweird.f32 %v4042_v32  ;;  %v3430_v21 = vld [vmem:[%s5088_s5 + $0x3] sm:$0x7] }
 0x711   :  { %4043 = vrsqrt.f32 %v1565_v42  ;;  %vm1594_vm11 = vmor %vm1592_vm9, %vm1593_vm8  ;;  %vm1602_vm13 = vweird.f32 %v1565_v42  ;;  %v1663_v23 = vperm.slane %v3430_v21, 1  ;;  %v1664_v25 = vperm.slane %v3430_v21, 2 }
 0x712   :  { %v1585_v35 = vsel %vm1584_vm7, %v4040_v24, %v1581_v44  ;;  %v1588_v45 = vmul.f32 %v4042_v32, %v1587_v30  ;;  %v1662_v63 = vperm.slane %v3430_v21, 0 }
 0x713   :  { %v1607_v38 = vmul.f32 %v1585_v35, %v4809_v18 }
 0x714   :  { %v1589_v48 = vmul.f32 0.5, %v1588_v45 }
 0x715   :  { %v1614_v49 = vmul.f32 %v3987_v43, %v1607_v38 }
 0x716   :  { %v1590_v50 = vsub.f32 1.5, %v1589_v48 }
 0x717   :  { %v4044_v12 = vpop.eup %4043  ;;  %v4832_v54 = vadd.f32 %v3988_v47, %v1614_v49 }
 0x718   :  { %v1591_v53 = vmul.f32 %v4042_v32, %v1590_v50  ;;  %v1597_v59 = vmul.f32 %v4044_v12, %v1565_v42  ;;  %vm1603_vm12 = vweird.f32 %v4044_v12 }
 0x719   :  { %v1624_v60 = vpack.c.bf16 %v4832_v54, %v4830_v51  ;;  %vm1604_vm14 = vmor %vm1602_vm13, %vm1603_vm12 }
 0x71a   :  { %v1598_v62 = vmul.f32 %v4044_v12, %v1597_v59  ;;  %v1595_v18 = vsel %vm1594_vm11, %v4042_v32, %v1591_v53 }
 0x71b   :  { %1804 = vmatmul.bf16.vlgmr.msrb.gmra.mxu1 %v1624_v60  ;;  %1823 = vmatmul.bf16.vlgmr.msrb.gmra.mxu2 %v1624_v60  ;;  %v1608_v7 = vmul.f32 %v1595_v18, %v4815_v41 }
 0x71c   :  { %v1599_v2 = vmul.f32 0.5, %v1598_v62  ;;  %1842 = vmatmul.bf16.vlgmr.msra.gmra.mxu3 %v1624_v60 }
 0x71d   :  { %v1615_v6 = vmul.f32 %v3987_v43, %v1608_v7 }
 0x71e   :  { %v1600_v3 = vsub.f32 1.5, %v1599_v2 }
 0x71f   :  { %v4838_v1 = vadd.f32 %v3988_v47, %v1615_v6 }
 0x720   :  { %v1601_v4 = vmul.f32 %v4044_v12, %v1600_v3 }
 0x722   :  { %v1605_v5 = vsel %vm1604_vm14, %v4044_v12, %v1601_v4 }
 0x723   :  { %v1609_v55 = vmul.f32 %v1605_v5, %v4821_v15 }
 0x725   :  { %v1616_v9 = vmul.f32 %v3987_v43, %v1609_v55 }
 0x727   :  { %v4840_v10 = vadd.f32 %v3988_v47, %v1616_v9 }
 0x729   :  { %v1625_v57 = vpack.c.bf16 %v4840_v10, %v4838_v1 }
 0x72b   :  { %1809 = vmatmul.bf16.gmra.mxu1 %v1625_v57  ;;  %1828 = vmatmul.bf16.gmra.mxu2 %v1625_v57 }
 0x72c   :  { %1847 = vmatmul.bf16.gmra.mxu3 %v1625_v57 }
 0x798   :  { %v1805_v16 = vpop.f32.mrf.mxu1 }
 0x799   :  { %v1806_v18 = vadd.f32 %v1805_v16, %v1662_v63 }
 0x79e   :  { %v1824_v41 = vpop.f32.mrf.mxu2 }
 0x79f   :  { %v1843_v20 = vpop.f32.mrf.mxu3  ;;  %v1825_v49 = vadd.f32 %v1824_v41, %v1663_v23 }
 0x7a0   :  { %v1807_v56 = vpop.f32.mrf.mxu1  ;;  %v1844_v30 = vadd.f32 %v1843_v20, %v1664_v25 }
 0x7a1   :  { %v1808_v50 = vadd.f32 %v1807_v56, %v1662_v63  ;;  %v1853_v5 = vpack.c.bf16 %v1825_v49, %v1806_v18 }
 0x7a2   :  { %v1854_v59 = vpack.c.bf16 %v1844_v30, %v1844_v30  ;;  %v4093_v30 = vld [vmem:[#allocation5] sm:$0xff] }
 0x7a3   :  { %v1881_v57 = vunpack.c.h.b16 %v1853_v5  ;;  %v1861_v56 = vsel %vm4531_vm4, %v1853_v5, 0 }
 0x7a4   :  { %v1958_v55 = vunpack.c.l.b16 %v1854_v59  ;;  %v4095_v59 = vld [vmem:[#allocation5 + $0x10] sm:$0xff] }
 0x7a6   :  { %v1826_v13 = vpop.f32.mrf.mxu2 }
 0x7a7   :  { %v1845_v14 = vpop.f32.mrf.mxu3  ;;  %v1827_v38 = vadd.f32 %v1826_v13, %v1663_v23  ;;  %v1995_v13 = vsel %vm4538_vm5, %v1853_v5, 0 }
 0x7a8   :  { %v1810_v17 = vpop.f32.mrf.mxu1  ;;  %v1846_v11 = vadd.f32 %v1845_v14, %v1664_v25 }
 0x7a9   :  { %v1811_v28 = vadd.f32 %v1810_v17, %v1662_v63  ;;  %v1855_v2 = vpack.c.bf16 %v1827_v38, %v1808_v50 }
 0x7aa   :  { %v1856_v47 = vpack.c.bf16 %v1846_v11, %v1846_v11 }
 0x7ab   :  { %v1882_v6 = vunpack.c.h.b16 %v1855_v2  ;;  %v1862_v41 = vsel %vm4531_vm4, %v1855_v2, 0  ;;  %v1996_v16 = vsel %vm4538_vm5, %v1855_v2, 0 }
 0x7ac   :  { %v1959_v7 = vunpack.c.l.b16 %v1856_v47  ;;  %v1870_v14 = vunpack.c.l.b16 %v1862_v41  ;;  %v2004_v17 = vunpack.c.l.b16 %v1996_v16 }
 0x7ad   :  { %v1885_v20 = vpack.c.b16 %v1882_v6, %v1881_v57 }
 0x7ae   :  { %v1829_v15 = vpop.f32.mrf.mxu2  ;;  %v1962_v9 = vpack.c.b16 %v1959_v7, %v1958_v55 }
 0x7af   :  { %v1848_v24 = vpop.f32.mrf.mxu3  ;;  %v1830_v26 = vadd.f32 %v1829_v15, %v1663_v23  ;;  %v1869_v15 = vunpack.c.l.b16 %v1861_v56 }
 0x7b0   :  { %v1849_v27 = vadd.f32 %v1848_v24, %v1664_v25  ;;  %v1812_v8 = vpop.f32.mrf.mxu1  ;;  %v2003_v24 = vunpack.c.l.b16 %v1995_v13 }
 0x7b1   :  { %v1857_v37 = vpack.c.bf16 %v1830_v26, %v1811_v28  ;;  %v1813_v42 = vadd.f32 %v1812_v8, %v1662_v63  ;;  %v1873_v21 = vpack.c.b16 %v1870_v14, %v1869_v15 }
 0x7b2   :  { %v1858_v35 = vpack.c.bf16 %v1849_v27, %v1849_v27 }
 0x7b3   :  { %v1883_v12 = vunpack.c.h.b16 %v1857_v37  ;;  %v1863_v26 = vsel %vm4531_vm4, %v1857_v37, 0  ;;  %v1997_v27 = vsel %vm4538_vm5, %v1857_v37, 0  ;;  %v4094_v37 = vld [vmem:[#allocation5 + $0x8] sm:$0xff] }
 0x7b4   :  { %v1960_v60 = vunpack.c.l.b16 %v1858_v35  ;;  %v1871_v11 = vunpack.c.l.b16 %v1863_v26 }
 0x7b6   :  { %v1831_v32 = vpop.f32.mrf.mxu2 }
 0x7b7   :  { %v1832_v43 = vadd.f32 %v1831_v32, %v1663_v23  ;;  %v1850_v44 = vpop.f32.mrf.mxu3  ;;  %v2007_v23 = vpack.c.b16 %v2004_v17, %v2003_v24  ;;  %v2005_v32 = vunpack.c.l.b16 %v1997_v27 }
 0x7b8   :  { %v1851_v45 = vadd.f32 %v1850_v44, %v1664_v25 }
 0x7b9   :  { %v1859_v46 = vpack.c.bf16 %v1832_v43, %v1813_v42 }
 0x7ba   :  { %v1860_v48 = vpack.c.bf16 %v1851_v45, %v1851_v45 }
 0x7bb   :  { %v1884_v53 = vunpack.c.h.b16 %v1859_v46  ;;  %v1864_v25 = vsel %vm4531_vm4, %v1859_v46, 0  ;;  %v1998_v63 = vsel %vm4538_vm5, %v1859_v46, 0 }
 0x7bc   :  { %v1961_v62 = vunpack.c.l.b16 %v1860_v48  ;;  %v1872_v8 = vunpack.c.l.b16 %v1864_v25  ;;  %v2006_v28 = vunpack.c.l.b16 %v1998_v63 }
 0x7bd   :  { %v1886_v3 = vpack.c.b16 %v1884_v53, %v1883_v12 }
 0x7be   :  { %v1963_v4 = vpack.c.b16 %v1961_v62, %v1960_v60  ;;  %v1874_v42 = vpack.c.b16 %v1872_v8, %v1871_v11  ;;  %v2008_v43 = vpack.c.b16 %v2006_v28, %v2005_v32 }
 0x7bf   :  { %1895 = vmatpush.bf16.xpose.msra.mxu0 %v1886_v3  ;;  %2017 = vmatpush.bf16.xpose.msra.mxu2 %v1886_v3 }
 0x7c0   :  { %1978 = vmatpush.bf16.msra.mxu1 %v1963_v4  ;;  %2088 = vmatpush.bf16.msrb.mxu3 %v1963_v4  ;;  %v4096_v4 = vld [vmem:[#allocation5 + $0x18] sm:$0xff] }
 0x7c4   :  { %1979 = vmatpush.bf16.msra.mxu1 %v1962_v9  ;;  %2089 = vmatpush.bf16.msrb.mxu3 %v1962_v9 }
 0x7c7   :  { %1896 = vmatpush.bf16.xpose.msra.mxu0 %v1885_v20  ;;  %2018 = vmatpush.bf16.xpose.msra.mxu2 %v1885_v20 }
 0x7ce   :  { %1897 = vmatmul.bf16.vlgmr.msra.gmra.mxu0 %v1873_v21  ;;  %2019 = vmatmul.bf16.vlgmr.msra.gmra.mxu2 %v2007_v23 }
 0x7de   :  { %1902 = vmatmul.bf16.gmra.mxu0 %v1874_v42  ;;  %2024 = vmatmul.bf16.gmra.mxu2 %v2008_v43 }
 0x84b   :  { %v1898_v44 = vpop.f32.mrf.mxu0 }
 0x84c   :  { %v1899_v35 = vadd.f32 %v4093_v30, %v1898_v44 }
 0x84e   :  { %v1908_v45 = vsel %vm497_vm6, %v1899_v35, -inf }
 0x84f   :  { %1909 = vmax.xlane.f32.xlu1 %v1908_v45 }
 0x851   :  { %v2020_v38 = vpop.f32.mrf.mxu2 }
 0x852   :  { %v2021_v33 = vadd.f32 %v4093_v30, %v2020_v38 }
 0x853   :  { %v1900_v46 = vpop.f32.mrf.mxu0 }
 0x854   :  { %v2030_v34 = vsel %vm497_vm6, %v2021_v33, -inf  ;;  %v1901_v47 = vadd.f32 %v4094_v37, %v1900_v46 }
 0x855   :  { %2031 = vmax.xlane.f32.xlu2 %v2030_v34 }
 0x856   :  { %v1911_v53 = vsel %vm497_vm6, %v1901_v47, -inf }
 0x859   :  { %v2022_v48 = vpop.f32.mrf.mxu2 }
 0x85a   :  { %v2023_v49 = vadd.f32 %v4094_v37, %v2022_v48 }
 0x85b   :  { %v1903_v50 = vpop.f32.mrf.mxu0 }
 0x85c   :  { %v2033_v12 = vsel %vm497_vm6, %v2023_v49, -inf  ;;  %v1904_v60 = vadd.f32 %v4095_v59, %v1903_v50 }
 0x85d   :  { %2034 = vmax.xlane.f32.xlu0 %v2033_v12  ;;  %1912 = vmax.xlane.f32.xlu2 %v1911_v53 }
 0x85e   :  { %v1914_v3 = vsel %vm497_vm6, %v1904_v60, -inf }
 0x861   :  { %v2025_v62 = vpop.f32.mrf.mxu2 }
 0x862   :  { %v2026_v18 = vadd.f32 %v4095_v59, %v2025_v62 }
 0x863   :  { %v1905_v7 = vpop.f32.mrf.mxu0 }
 0x864   :  { %v2036_v2 = vsel %vm497_vm6, %v2026_v18, -inf  ;;  %v1906_v5 = vadd.f32 %v4096_v4, %v1905_v7  ;;  %v3904_v7 = vld [vmem:[#allocation8 + $0x78] sm:$0xff] }
 0x865   :  { %2037 = vmax.xlane.f32.xlu0 %v2036_v2  ;;  %1915 = vmax.xlane.f32.xlu2 %v1914_v3 }
 0x866   :  { %v1917_v57 = vsel %vm497_vm6, %v1906_v5, -inf  ;;  %2181 = vmatpush.bf16.msrb.mxu0 %v3904_v7 }
 0x869   :  { %v2027_v55 = vpop.f32.mrf.mxu2 }
 0x86a   :  { %v2028_v6 = vadd.f32 %v4096_v4, %v2027_v55  ;;  %v3903_v4 = vld [vmem:[#allocation8 + $0x70] sm:$0xff] }
 0x86b   :  { %2182 = vmatpush.bf16.msrb.mxu0 %v3903_v4 }
 0x86c   :  { %v2039_v9 = vsel %vm497_vm6, %v2028_v6, -inf }
 0x86d   :  { %2040 = vmax.xlane.f32.xlu1 %v2039_v9  ;;  %1918 = vmax.xlane.f32.xlu0 %v1917_v57 }
 0x8c2   :  { %v1910_v41 = vpop.xlane.xlu1 %1909 }
 0x8c3   :  { %v1920_v16 = vsub.f32 %v1899_v35, %v1910_v41 }
 0x8c5   :  { %v1924_v20 = vmul.f32 1.442695, %v1920_v16 }
 0x8c7   :  { %4045 = vpow2.f32 %v1924_v20 }
 0x8c8   :  { %v2032_v56 = vpop.xlane.xlu2 %2031 }
 0x8c9   :  { %v2042_v13 = vsub.f32 %v2021_v33, %v2032_v56 }
 0x8cb   :  { %v2046_v14 = vmul.f32 1.442695, %v2042_v13 }
 0x8cd   :  { %v4871_v17 = vpop.eup %4045  ;;  %4047 = vpow2.f32 %v2046_v14 }
 0x8ce   :  { %v1932_v15 = vsel %vm497_vm6, %v4871_v17, 0.0 }
 0x8cf   :  { %1933 = vadd.xlane.f32.xlu0 %v1932_v15 }
 0x8d0   :  { %v2035_v24 = vpop.xlane.xlu0 %2034  ;;  %v1913_v21 = vpop.xlane.xlu2 %1912 }
 0x8d1   :  { %v2043_v23 = vsub.f32 %v2023_v49, %v2035_v24  ;;  %v1921_v25 = vsub.f32 %v1901_v47, %v1913_v21 }
 0x8d3   :  { %v4048_v63 = vpop.eup %4047  ;;  %v2048_v26 = vmul.f32 1.442695, %v2043_v23  ;;  %v1926_v27 = vmul.f32 1.442695, %v1921_v25 }
 0x8d4   :  { %v2054_v8 = vsel %vm497_vm6, %v4048_v63, 0.0 }
 0x8d5   :  { %4049 = vpow2.f32 %v2048_v26  ;;  %2055 = vadd.xlane.f32.xlu1 %v2054_v8 }
 0x8d6   :  { %4051 = vpow2.f32 %v1926_v27 }
 0x8d8   :  { %v2038_v28 = vpop.xlane.xlu0 %2037  ;;  %v1916_v11 = vpop.xlane.xlu2 %1915 }
 0x8d9   :  { %v2044_v32 = vsub.f32 %v2026_v18, %v2038_v28  ;;  %v1922_v42 = vsub.f32 %v1904_v60, %v1916_v11 }
 0x8db   :  { %v4050_v43 = vpop.eup %4049  ;;  %v2050_v44 = vmul.f32 1.442695, %v2044_v32  ;;  %v1928_v30 = vmul.f32 1.442695, %v1922_v42 }
 0x8dc   :  { %v4052_v35 = vpop.eup %4051  ;;  %v2057_v45 = vsel %vm497_vm6, %v4050_v43, 0.0 }
 0x8dd   :  { %4053 = vpow2.f32 %v2050_v44  ;;  %v1935_v38 = vsel %vm497_vm6, %v4052_v35, 0.0  ;;  %2058 = vadd.xlane.f32.xlu2 %v2057_v45  ;;  %v3899_v45 = vld [vmem:[#allocation8 + $0x50] sm:$0xff] }
 0x8de   :  { %4055 = vpow2.f32 %v1928_v30  ;;  %1936 = vadd.xlane.f32.xlu1 %v1935_v38  ;;  %v3901_v30 = vld [vmem:[#allocation8 + $0x60] sm:$0xff]  ;;  %v3898_v38 = vld [vmem:[#allocation8 + $0x48] sm:$0xff] }
 0x8e0   :  { %v2041_v33 = vpop.xlane.xlu1 %2040  ;;  %v1919_v46 = vpop.xlane.xlu0 %1918 }
 0x8e1   :  { %v2045_v34 = vsub.f32 %v2028_v6, %v2041_v33  ;;  %v1923_v37 = vsub.f32 %v1906_v5, %v1919_v46  ;;  %v3902_v6 = vld [vmem:[#allocation8 + $0x68] sm:$0xff]  ;;  %v3897_v33 = vld [vmem:[#allocation8 + $0x40] sm:$0xff] }
 0x8e2   :  { %2183 = vmatpush.bf16.msrb.mxu0 %v3902_v6 }
 0x8e3   :  { %v4054_v47 = vpop.eup %4053  ;;  %v2052_v48 = vmul.f32 1.442695, %v2045_v34  ;;  %v1930_v49 = vmul.f32 1.442695, %v1923_v37 }
 0x8e4   :  { %v4056_v50 = vpop.eup %4055  ;;  %v2060_v12 = vsel %vm497_vm6, %v4054_v47, 0.0 }
 0x8e5   :  { %4057 = vpow2.f32 %v2052_v48  ;;  %2061 = vadd.xlane.f32.xlu2 %v2060_v12  ;;  %v1938_v53 = vsel %vm497_vm6, %v4056_v50, 0.0 }
 0x8e6   :  { %4059 = vpow2.f32 %v1930_v49  ;;  %1939 = vadd.xlane.f32.xlu1 %v1938_v53  ;;  %2184 = vmatpush.bf16.msrb.mxu0 %v3901_v30 }
 0x8eb   :  { %v4058_v59 = vpop.eup %4057 }
 0x8ec   :  { %v4060_v60 = vpop.eup %4059  ;;  %v2063_v62 = vsel %vm497_vm6, %v4058_v59, 0.0 }
 0x8ed   :  { %2064 = vadd.xlane.f32.xlu0 %v2063_v62  ;;  %v1941_v18 = vsel %vm497_vm6, %v4060_v60, 0.0 }
 0x8ee   :  { %1942 = vadd.xlane.f32.xlu2 %v1941_v18 }
 0x942   :  { %v1934_v3 = vpop.xlane.xlu0 %1933 }
 0x948   :  { %v2056_v2 = vpop.xlane.xlu1 %2055 }
 0x949   :  { %4061 = vrcp.f32 %v2056_v2 }
 0x94a   :  { %4063 = vrcp.f32 %v1934_v3 }
 0x94f   :  { %v4062_v9 = vpop.eup %4061 }
 0x950   :  { %v2059_v5 = vpop.xlane.xlu2 %2058  ;;  %v4064_v57 = vpop.eup %4063  ;;  %v2070_v20 = vmul.f32 %v4062_v9, %v4048_v63 }
 0x951   :  { %v1937_v55 = vpop.xlane.xlu1 %1936  ;;  %4065 = vrcp.f32 %v2059_v5  ;;  %v1948_v14 = vmul.f32 %v4064_v57, %v4871_v17 }
 0x952   :  { %4067 = vrcp.f32 %v1937_v55 }
 0x957   :  { %v4066_v41 = vpop.eup %4065 }
 0x958   :  { %v4068_v16 = vpop.eup %4067  ;;  %v2071_v56 = vmul.f32 %v4066_v41, %v4050_v43  ;;  %v2062_v13 = vpop.xlane.xlu2 %2061  ;;  %v3989_v41 = vld [vmem:[%s5090_s7 + $0x1] ss:$0 sm:$0xff] }
 0x959   :  { %v1949_v15 = vmul.f32 %v4068_v16, %v4052_v35  ;;  %v1940_v23 = vpop.xlane.xlu1 %1939  ;;  %4069 = vrcp.f32 %v2062_v13  ;;  %v3900_v35 = vld [vmem:[#allocation8 + $0x58] sm:$0xff] }
 0x95a   :  { %v2074_v24 = vpack.c.bf16 %v2071_v56, %v2070_v20  ;;  %4071 = vrcp.f32 %v1940_v23  ;;  %2185 = vmatpush.bf16.msrb.mxu0 %v3900_v35 }
 0x95b   :  { %v1952_v21 = vpack.c.bf16 %v1949_v15, %v1948_v14 }
 0x95c   :  { %3529 = vmatmul.msk.bf16.vlgmr.msrb.gmra.mxu3 %vm497_vm6, %v2074_v24 }
 0x95d   :  { %3527 = vmatmul.msk.bf16.vlgmr.msra.gmra.mxu1 %vm497_vm6, %v1952_v21 }
 0x95e   :  { %2186 = vmatpush.bf16.msrb.mxu0 %v3899_v45 }
 0x95f   :  { %v4070_v27 = vpop.eup %4069 }
 0x960   :  { %v2065_v25 = vpop.xlane.xlu0 %2064  ;;  %v4072_v63 = vpop.eup %4071  ;;  %v2072_v11 = vmul.f32 %v4070_v27, %v4054_v47 }
 0x961   :  { %4073 = vrcp.f32 %v2065_v25  ;;  %v1943_v26 = vpop.xlane.xlu2 %1942  ;;  %v1950_v32 = vmul.f32 %v4072_v63, %v4056_v50 }
 0x962   :  { %4075 = vrcp.f32 %v1943_v26  ;;  %2187 = vmatpush.bf16.msrb.mxu0 %v3898_v38 }
 0x966   :  { %2188 = vmatpush.bf16.msrb.mxu0 %v3897_v33 }
 0x967   :  { %v4074_v8 = vpop.eup %4073 }
 0x968   :  { %v4076_v28 = vpop.eup %4075  ;;  %v2073_v17 = vmul.f32 %v4074_v8, %v4058_v59 }
 0x969   :  { %v1951_v42 = vmul.f32 %v4076_v28, %v4060_v60 }
 0x96a   :  { %v2075_v43 = vpack.c.bf16 %v2073_v17, %v2072_v11 }
 0x96b   :  { %v1953_v44 = vpack.c.bf16 %v1951_v42, %v1950_v32 }
 0x96c   :  { %3530 = vmatmul.msk.bf16.gmra.mxu3 %vm497_vm6, %v2075_v43 }
 0x96d   :  { %3528 = vmatmul.msk.bf16.gmra.mxu1 %vm497_vm6, %v1953_v44 }
 0x9da   :  { %v1981_v46 = vpop.f32.mrf.mxu1 }
 0x9db   :  { %v1991_v49 = vsel %vm208_vm2, %v1981_v46, 0.0 }
 0x9df   :  { %v2091_v34 = vpop.f32.mrf.mxu3 }
 0x9e0   :  { %v2101_v47 = vsel %vm4524_vm3, %v2091_v34, 0.0  ;;  %v3920_v34 = vld [vmem:[#allocation10 + $0x138] sm:$0xff] }
 0x9e1   :  { %v2105_v53 = vadd.f32 %v2101_v47, %v1991_v49  ;;  %2553 = vmatpush.bf16.msrb.mxu2 %v3920_v34  ;;  %v3918_v47 = vld [vmem:[#allocation10 + $0x128] sm:$0xff]  ;;  %v3928_v49 = vld [vmem:[#allocation10 + $0x178] sm:$0xff] }
 0x9e2   :  { %v1983_v37 = vpop.f32.mrf.mxu1  ;;  %2572 = vmatpush.bf16.msra.mxu3 %v3928_v49 }
 0x9e3   :  { %v1992_v50 = vsel %vm208_vm2, %v1983_v37, 0.0  ;;  %v3919_v37 = vld [vmem:[#allocation10 + $0x130] sm:$0xff] }
 0x9e5   :  { %2554 = vmatpush.bf16.msrb.mxu2 %v3919_v37 }
 0x9e7   :  { %v2093_v48 = vpop.f32.mrf.mxu3 }
 0x9e8   :  { %v2102_v12 = vsel %vm4524_vm3, %v2093_v48, 0.0  ;;  %v3917_v48 = vld [vmem:[#allocation10 + $0x120] sm:$0xff] }
 0x9e9   :  { %v2106_v59 = vadd.f32 %v2102_v12, %v1992_v50  ;;  %2555 = vmatpush.bf16.msrb.mxu2 %v3918_v47  ;;  %v3916_v50 = vld [vmem:[#allocation10 + $0x118] sm:$0xff]  ;;  %v3927_v12 = vld [vmem:[#allocation10 + $0x170] sm:$0xff] }
 0x9ea   :  { %v1986_v62 = vpop.f32.mrf.mxu1  ;;  %2573 = vmatpush.bf16.msra.mxu3 %v3927_v12 }
 0x9eb   :  { %v2109_v60 = vpack.c.bf16 %v2106_v59, %v2105_v53  ;;  %v1993_v4 = vsel %vm208_vm2, %v1986_v62, 0.0  ;;  %v3915_v53 = vld [vmem:[#allocation10 + $0x110] sm:$0xff]  ;;  %v3912_v59 = vld [vmem:[#allocation10 + $0xf8] sm:$0xff]  ;;  %v3914_v62 = vld [vmem:[#allocation10 + $0x108] sm:$0xff] }
 0x9ec   :  { %2534 = vmatpush.bf16.msrb.mxu1 %v3912_v59 }
 0x9ed   :  { %2189 = vmatmul.bf16.vlgmr.msrb.gmra.mxu0 %v2109_v60  ;;  %2556 = vmatpush.bf16.msrb.mxu2 %v3917_v48  ;;  %v3926_v60 = vld [vmem:[#allocation10 + $0x168] sm:$0xff] }
 0x9ee   :  { %2574 = vmatpush.bf16.msra.mxu3 %v3926_v60 }
 0x9ef   :  { %v2096_v18 = vpop.f32.mrf.mxu3 }
 0x9f0   :  { %v2103_v3 = vsel %vm4524_vm3, %v2096_v18, 0.0 }
 0x9f1   :  { %v2107_v6 = vadd.f32 %v2103_v3, %v1993_v4  ;;  %2557 = vmatpush.bf16.msrb.mxu2 %v3916_v50  ;;  %v3925_v3 = vld [vmem:[#allocation10 + $0x160] sm:$0xff] }
 0x9f2   :  { %v1988_v2 = vpop.f32.mrf.mxu1  ;;  %2575 = vmatpush.bf16.msra.mxu3 %v3925_v3  ;;  %v3991_v50 = vld [vmem:[%s5092_s9 + $0x1] ss:$0 sm:$0xff] }
 0x9f3   :  { %v1994_v5 = vsel %vm208_vm2, %v1988_v2, 0.0  ;;  %v3911_v2 = vld [vmem:[#allocation10 + $0xf0] sm:$0xff] }
 0x9f4   :  { %2535 = vmatpush.bf16.msrb.mxu1 %v3911_v2 }
 0x9f5   :  { %2558 = vmatpush.bf16.msrb.mxu2 %v3915_v53 }
 0x9f7   :  { %v2098_v7 = vpop.f32.mrf.mxu3 }
 0x9f8   :  { %v2104_v55 = vsel %vm4524_vm3, %v2098_v7, 0.0 }
 0x9f9   :  { %v2108_v9 = vadd.f32 %v2104_v55, %v1994_v5  ;;  %2559 = vmatpush.bf16.msrb.mxu2 %v3914_v62  ;;  %v3913_v5 = vld [vmem:[#allocation10 + $0x100] sm:$0xff]  ;;  %v3910_v55 = vld [vmem:[#allocation10 + $0xe8] sm:$0xff] }
 0x9fa   :  { %2536 = vmatpush.bf16.msrb.mxu1 %v3910_v55 }
 0x9fb   :  { %v2110_v57 = vpack.c.bf16 %v2108_v9, %v2107_v6  ;;  %v3924_v6 = vld [vmem:[#allocation10 + $0x158] sm:$0xff] }
 0x9fc   :  { %2576 = vmatpush.bf16.msra.mxu3 %v3924_v6 }
 0x9fd   :  { %2194 = vmatmul.bf16.gmra.mxu0 %v2110_v57  ;;  %2560 = vmatpush.bf16.msrb.mxu2 %v3913_v5  ;;  %v3909_v57 = vld [vmem:[#allocation10 + $0xe0] sm:$0xff] }
 0x9fe   :  { %2537 = vmatpush.bf16.msrb.mxu1 %v3909_v57 }
 0xa6a   :  { %v2190_v16 = vpop.f32.mrf.mxu0 }
 0xa6b   :  { %v2191_v20 = vadd.f32 %v3989_v41, %v2190_v16 }
 0xa6d   :  { %v2200_v56 = vadd.f32 %v2191_v20, %v4830_v51 }
 0xa6f   :  { %2208 = vadd.xlane.f32.xlu0 %v2200_v56 }
 0xa72   :  { %v2192_v13 = vpop.f32.mrf.mxu0 }
 0xa73   :  { %v2193_v14 = vadd.f32 %v3989_v41, %v2192_v13 }
 0xa75   :  { %v2201_v15 = vadd.f32 %v2193_v14, %v4832_v54  ;;  %v3908_v14 = vld [vmem:[#allocation10 + $0xd8] sm:$0xff] }
 0xa76   :  { %2538 = vmatpush.bf16.msrb.mxu1 %v3908_v14 }
 0xa77   :  { %2210 = vadd.xlane.f32.xlu1 %v2201_v15 }
 0xa7a   :  { %v2195_v31 = vpop.f32.mrf.mxu0 }
 0xa7b   :  { %v2196_v24 = vadd.f32 %v3989_v41, %v2195_v31 }
 0xa7d   :  { %v2202_v21 = vadd.f32 %v2196_v24, %v4838_v1  ;;  %v3907_v24 = vld [vmem:[#allocation10 + $0xd0] sm:$0xff] }
 0xa7e   :  { %2539 = vmatpush.bf16.msrb.mxu1 %v3907_v24 }
 0xa7f   :  { %2212 = vadd.xlane.f32.xlu2 %v2202_v21 }
 0xa82   :  { %v2197_v23 = vpop.f32.mrf.mxu0 }
 0xa83   :  { %v2198_v25 = vadd.f32 %v3989_v41, %v2197_v23  ;;  %v3923_v41 = vld [vmem:[#allocation10 + $0x150] sm:$0xff] }
 0xa84   :  { %2577 = vmatpush.bf16.msra.mxu3 %v3923_v41 }
 0xa85   :  { %v2203_v26 = vadd.f32 %v2198_v25, %v4840_v10 }
 0xa87   :  { %2214 = vadd.xlane.f32.xlu0 %v2203_v26 }
 0xae2   :  { %v2209_v27 = vpop.xlane.xlu0 %2208 }
 0xae3   :  { %v2216_v63 = vmul.f32 0.03125, %v2209_v27 }
 0xae5   :  { %v2220_v8 = vsub.f32 %v2200_v56, %v2216_v63 }
 0xae7   :  { %v4912_v51 = vsel %vm206_vm0, %v2220_v8, 0.0 }
 0xae8   :  { %v2228_v54 = vmul.f32 %v4912_v51, %v4912_v51 }
 0xaea   :  { %v2211_v28 = vpop.xlane.xlu1 %2210  ;;  %2232 = vadd.xlane.f32.xlu1 %v2228_v54 }
 0xaeb   :  { %v2217_v11 = vmul.f32 0.03125, %v2211_v28 }
 0xaed   :  { %v2221_v1 = vsub.f32 %v2201_v15, %v2217_v11  ;;  %v3922_v15 = vld [vmem:[#allocation10 + $0x148] sm:$0xff] }
 0xaee   :  { %2578 = vmatpush.bf16.msra.mxu3 %v3922_v15  ;;  %v3906_v11 = vld [vmem:[#allocation10 + $0xc8] sm:$0xff] }
 0xaef   :  { %v4918_v17 = vsel %vm206_vm0, %v2221_v1, 0.0  ;;  %2540 = vmatpush.bf16.msrb.mxu1 %v3906_v11 }
 0xaf0   :  { %v2229_v10 = vmul.f32 %v4918_v17, %v4918_v17 }
 0xaf2   :  { %2234 = vadd.xlane.f32.xlu2 %v2229_v10  ;;  %v2213_v32 = vpop.xlane.xlu2 %2212  ;;  %v3905_v10 = vld [vmem:[#allocation10 + $0xc0] sm:$0xff] }
 0xaf3   :  { %v2218_v42 = vmul.f32 0.03125, %v2213_v32  ;;  %2541 = vmatpush.bf16.msrb.mxu1 %v3905_v10 }
 0xaf5   :  { %v2222_v43 = vsub.f32 %v2202_v21, %v2218_v42  ;;  %v3921_v21 = vld [vmem:[#allocation10 + $0x140] sm:$0xff] }
 0xaf6   :  { %2579 = vmatpush.bf16.msra.mxu3 %v3921_v21 }
 0xaf7   :  { %v4924_v44 = vsel %vm206_vm0, %v2222_v43, 0.0 }
 0xaf8   :  { %v2230_v30 = vmul.f32 %v4924_v44, %v4924_v44 }
 0xafa   :  { %v2215_v35 = vpop.xlane.xlu0 %2214  ;;  %2236 = vadd.xlane.f32.xlu0 %v2230_v30 }
 0xafb   :  { %v2219_v45 = vmul.f32 0.03125, %v2215_v35 }
 0xafd   :  { %v2223_v38 = vsub.f32 %v2203_v26, %v2219_v45 }
 0xaff   :  { %v4930_v33 = vsel %vm206_vm0, %v2223_v38, 0.0  ;;  %v3990_v38 = vld [vmem:[%s5091_s8 + $0x1] ss:$0 sm:$0xff] }
 0xb00   :  { %v2231_v46 = vmul.f32 %v4930_v33, %v4930_v33 }
 0xb02   :  { %2238 = vadd.xlane.f32.xlu1 %v2231_v46 }
 0xb5d   :  { %v2233_v18 = vpop.xlane.xlu1 %2232 }
 0xb5e   :  { %v2240_v7 = vmul.f32 0.03125, %v2233_v18 }
 0xb60   :  { %v2244_v4 = vadd.f32 1e-05, %v2240_v7 }
 0xb62   :  { %4077 = vrsqrt.f32 %v2244_v4  ;;  %vm2254_vm3 = vweird.f32 %v2244_v4 }
 0xb65   :  { %v2235_v9 = vpop.xlane.xlu2 %2234 }
 0xb66   :  { %v2241_v16 = vmul.f32 0.03125, %v2235_v9 }
 0xb68   :  { %v4078_v20 = vpop.eup %4077  ;;  %v2245_v56 = vadd.f32 1e-05, %v2241_v16 }
 0xb69   :  { %v2249_v13 = vmul.f32 %v4078_v20, %v2244_v4  ;;  %vm2255_vm2 = vweird.f32 %v4078_v20 }
 0xb6a   :  { %4079 = vrsqrt.f32 %v2245_v56  ;;  %vm2256_vm4 = vmor %vm2254_vm3, %vm2255_vm2  ;;  %vm2264_vm6 = vweird.f32 %v2245_v56 }
 0xb6b   :  { %v2250_v31 = vmul.f32 %v4078_v20, %v2249_v13 }
 0xb6d   :  { %v2251_v23 = vmul.f32 0.5, %v2250_v31  ;;  %v2237_v25 = vpop.xlane.xlu0 %2236 }
 0xb6e   :  { %v2242_v26 = vmul.f32 0.03125, %v2237_v25 }
 0xb6f   :  { %v2252_v27 = vsub.f32 1.5, %v2251_v23 }
 0xb70   :  { %v4080_v63 = vpop.eup %4079  ;;  %v2246_v8 = vadd.f32 1e-05, %v2242_v26 }
 0xb71   :  { %v2253_v54 = vmul.f32 %v4078_v20, %v2252_v27  ;;  %v2259_v28 = vmul.f32 %v4080_v63, %v2245_v56  ;;  %vm2265_vm5 = vweird.f32 %v4080_v63 }
 0xb72   :  { %4081 = vrsqrt.f32 %v2246_v8  ;;  %vm2266_vm15 = vmor %vm2264_vm6, %vm2265_vm5  ;;  %vm2274_vm8 = vweird.f32 %v2246_v8 }
 0xb73   :  { %v2260_v1 = vmul.f32 %v4080_v63, %v2259_v28  ;;  %v2257_v32 = vsel %vm2256_vm4, %v4078_v20, %v2253_v54 }
 0xb74   :  { %v2288_v46 = vmul.f32 %v2257_v32, %v4912_v51 }
 0xb75   :  { %v2261_v42 = vmul.f32 0.5, %v2260_v1  ;;  %v2239_v43 = vpop.xlane.xlu1 %2238 }
 0xb76   :  { %v2243_v30 = vmul.f32 0.03125, %v2239_v43  ;;  %v2295_v12 = vmul.f32 %v3990_v38, %v2288_v46 }
 0xb77   :  { %v2262_v35 = vsub.f32 1.5, %v2261_v42 }
 0xb78   :  { %v4082_v45 = vpop.eup %4081  ;;  %v2247_v34 = vadd.f32 1e-05, %v2243_v30  ;;  %v4942_v18 = vadd.f32 %v3991_v50, %v2295_v12  ;;  %v3942_v12 = vld [vmem:[#allocation11 + $0x128] sm:$0xff] }
 0xb79   :  { %v2263_v37 = vmul.f32 %v4080_v63, %v2262_v35  ;;  %v2269_v47 = vmul.f32 %v4082_v45, %v2246_v8  ;;  %vm2275_vm7 = vweird.f32 %v4082_v45 }
 0xb7a   :  { %4083 = vrsqrt.f32 %v2247_v34  ;;  %vm2276_vm9 = vmor %vm2274_vm8, %vm2275_vm7  ;;  %v2320_v20 = vrot.slane %v4942_v18, 1  ;;  %vm2284_vm12 = vweird.f32 %v2247_v34 }
 0xb7b   :  { %v2267_v48 = vsel %vm2266_vm15, %v4080_v63, %v2263_v37  ;;  %v2270_v49 = vmul.f32 %v4082_v45, %v2269_v47  ;;  %v2308_v63 = vrot.slane %v4942_v18, 7 }
 0xb7c   :  { %v2289_v53 = vmul.f32 %v2267_v48, %v4918_v17 }
 0xb7d   :  { %v2271_v59 = vmul.f32 0.5, %v2270_v49  ;;  %v3944_v49 = vld [vmem:[#allocation11 + $0x138] sm:$0xff] }
 0xb7e   :  { %v2296_v60 = vmul.f32 %v3990_v38, %v2289_v53  ;;  %2842 = vmatpush.bf16.msra.mxu1 %v3944_v49  ;;  %v3941_v53 = vld [vmem:[#allocation11 + $0x120] sm:$0xff] }
 0xb7f   :  { %v2272_v62 = vsub.f32 1.5, %v2271_v59  ;;  %v3952_v59 = vld [vmem:[#allocation11 + $0x178] sm:$0xff] }
 0xb80   :  { %v4084_v51 = vpop.eup %4083  ;;  %v4944_v2 = vadd.f32 %v3991_v50, %v2296_v60  ;;  %2861 = vmatpush.bf16.msra.mxu2 %v3952_v59  ;;  %v3940_v60 = vld [vmem:[#allocation11 + $0x118] sm:$0xff] }
 0xb81   :  { %v2273_v3 = vmul.f32 %v4082_v45, %v2272_v62  ;;  %v2279_v7 = vmul.f32 %v4084_v51, %v2247_v34  ;;  %vm2285_vm11 = vweird.f32 %v4084_v51  ;;  %v3951_v62 = vld [vmem:[#allocation11 + $0x170] sm:$0xff] }
 0xb82   :  { %v2333_v4 = vpack.c.bf16 %v4944_v2, %v4942_v18  ;;  %v2321_v57 = vrot.slane %v4944_v2, 1  ;;  %vm2286_vm13 = vmor %vm2284_vm12, %vm2285_vm11  ;;  %v2309_v25 = vrot.slane %v4944_v2, 7 }
 0xb83   :  { %v2277_v5 = vsel %vm2276_vm9, %v4082_v45, %v2273_v3  ;;  %v2280_v55 = vmul.f32 %v4084_v51, %v2279_v7  ;;  %v3936_v3 = vld [vmem:[#allocation11 + $0xf8] sm:$0xff]  ;;  %v3950_v7 = vld [vmem:[#allocation11 + $0x168] sm:$0xff] }
 0xb84   :  { %v2290_v17 = vmul.f32 %v2277_v5, %v4924_v44  ;;  %2561 = vmatmul.bf16.vlgmr.msrb.gmra.mxu2 %v2333_v4  ;;  %v2326_v14 = vsel %vm941_vm1, %v2320_v20, %v2321_v57  ;;  %v2314_v54 = vsel %vm904_vm10, %v2308_v63, %v2309_v25  ;;  %2823 = vmatpush.bf16.msra.mxu0 %v3936_v3  ;;  %v3938_v4 = vld [vmem:[#allocation11 + $0x108] sm:$0xff]  ;;  %v3935_v5 = vld [vmem:[#allocation11 + $0xf0] sm:$0xff] }
 0xb85   :  { %v2281_v6 = vmul.f32 0.5, %v2280_v55  ;;  %v2328_v24 = vmul.f32 %v2326_v14, %v4704_v58  ;;  %v2317_v10 = vmul.f32 %v2314_v54, %v4727_v19  ;;  %2862 = vmatpush.bf16.msra.mxu2 %v3951_v62  ;;  %v3949_v55 = vld [vmem:[#allocation11 + $0x160] sm:$0xff]  ;;  %v3931_v14 = vld [vmem:[#allocation11 + $0xd0] sm:$0xff] }
 0xb86   :  { %v2297_v9 = vmul.f32 %v3990_v38, %v2290_v17  ;;  %v3937_v17 = vld [vmem:[#allocation11 + $0x100] sm:$0xff] }
 0xb87   :  { %v2282_v41 = vsub.f32 1.5, %v2281_v6  ;;  %v3934_v6 = vld [vmem:[#allocation11 + $0xe8] sm:$0xff] }
 0xb88   :  { %v4950_v16 = vadd.f32 %v3991_v50, %v2297_v9  ;;  %2824 = vmatpush.bf16.msra.mxu0 %v3935_v5  ;;  %v3948_v9 = vld [vmem:[#allocation11 + $0x158] sm:$0xff] }
 0xb89   :  { %v2283_v56 = vmul.f32 %v4084_v51, %v2282_v41  ;;  %2863 = vmatpush.bf16.msra.mxu2 %v3950_v7  ;;  %v3947_v41 = vld [vmem:[#allocation11 + $0x150] sm:$0xff] }
 0xb8a   :  { %v2322_v13 = vrot.slane %v4950_v16, 1  ;;  %v2310_v45 = vrot.slane %v4950_v16, 7 }
 0xb8b   :  { %v2287_v44 = vsel %vm2286_vm13, %v4084_v51, %v2283_v56  ;;  %v3939_v51 = vld [vmem:[#allocation11 + $0x110] sm:$0xff]  ;;  %v3946_v56 = vld [vmem:[#allocation11 + $0x148] sm:$0xff] }
 0xb8c   :  { %v2291_v15 = vmul.f32 %v2287_v44, %v4930_v33  ;;  %v2325_v31 = vsel %vm941_vm1, %v2321_v57, %v2322_v13  ;;  %v2313_v34 = vsel %vm904_vm10, %v2309_v25, %v2310_v45  ;;  %2825 = vmatpush.bf16.msra.mxu0 %v3934_v6  ;;  %v3933_v57 = vld [vmem:[#allocation11 + $0xe0] sm:$0xff] }
 0xb8d   :  { %v2329_v21 = vmul.f32 %v2325_v31, %v4720_v61  ;;  %v2318_v47 = vmul.f32 %v2313_v34, %v4745_v29  ;;  %2864 = vmatpush.bf16.msra.mxu2 %v3949_v55  ;;  %v3945_v44 = vld [vmem:[#allocation11 + $0x140] sm:$0xff] }
 0xb8e   :  { %v2298_v23 = vmul.f32 %v3990_v38, %v2291_v15  ;;  %v3992_v31 = vld [vmem:[%s5094_s11 + $0x1] ss:$0 sm:$0xff] }
 0xb8f   :  { %v2334_v26 = vpack.c.bf16 %v2329_v21, %v2328_v24  ;;  %v3930_v21 = vld [vmem:[#allocation11 + $0xc8] sm:$0xff]  ;;  %v3929_v25 = vld [vmem:[#allocation11 + $0xc0] sm:$0xff] }
 0xb90   :  { %v4962_v27 = vadd.f32 %v3991_v50, %v2298_v23  ;;  %v3943_v50 = vld [vmem:[#allocation11 + $0x130] sm:$0xff]  ;;  %2826 = vmatpush.bf16.msra.mxu0 %v3933_v57 }
 0xb91   :  { %2580 = vmatmul.bf16.vlgmr.msra.gmra.mxu3 %v2334_v26  ;;  %2843 = vmatpush.bf16.msra.mxu1 %v3943_v50 }
 0xb92   :  { %v2336_v8 = vpack.c.bf16 %v4962_v27, %v4950_v16  ;;  %v2311_v33 = vrot.slane %v4962_v27, 7  ;;  %v2323_v11 = vrot.slane %v4962_v27, 1  ;;  %2865 = vmatpush.bf16.msra.mxu2 %v3948_v9 }
 0xb94   :  { %2566 = vmatmul.bf16.gmra.mxu2 %v2336_v8  ;;  %v2315_v28 = vsel %vm904_vm10, %v2311_v33, %v2308_v63  ;;  %v2324_v42 = vsel %vm941_vm1, %v2322_v13, %v2323_v11  ;;  %v2327_v43 = vsel %vm941_vm1, %v2323_v11, %v2320_v20  ;;  %v2312_v46 = vsel %vm904_vm10, %v2310_v45, %v2311_v33  ;;  %v3932_v20 = vld [vmem:[#allocation11 + $0xd8] sm:$0xff] }
 0xb95   :  { %v2316_v1 = vmul.f32 %v2315_v28, %v4733_v52  ;;  %v2330_v30 = vmul.f32 %v2324_v42, %v4752_v40  ;;  %v2331_v35 = vmul.f32 %v2327_v43, %v4748_v36  ;;  %v2319_v37 = vmul.f32 %v2312_v46, %v4759_v39  ;;  %2844 = vmatpush.bf16.msra.mxu1 %v3942_v12 }
 0xb96   :  { %2866 = vmatpush.bf16.msra.mxu2 %v3947_v41  ;;  %2827 = vmatpush.bf16.msra.mxu0 %v3932_v20 }
 0xb97   :  { %v2332_v32 = vpack.c.bf16 %v2317_v10, %v2316_v1  ;;  %v2337_v38 = vpack.c.bf16 %v2331_v35, %v2330_v30  ;;  %v2335_v48 = vpack.c.bf16 %v2319_v37, %v2318_v47 }
 0xb99   :  { %2542 = vmatmul.bf16.vlgmr.msrb.gmra.mxu1 %v2332_v32 }
 0xb9a   :  { %2845 = vmatpush.bf16.msra.mxu1 %v3941_v53  ;;  %2867 = vmatpush.bf16.msra.mxu2 %v3946_v56 }
 0xb9b   :  { %2828 = vmatpush.bf16.msra.mxu0 %v3931_v14 }
 0xb9e   :  { %2846 = vmatpush.bf16.msra.mxu1 %v3940_v60  ;;  %2868 = vmatpush.bf16.msra.mxu2 %v3945_v44 }
 0xb9f   :  { %2829 = vmatpush.bf16.msra.mxu0 %v3930_v21 }
 0xba1   :  { %2585 = vmatmul.bf16.gmra.mxu3 %v2337_v38 }
 0xba2   :  { %2847 = vmatpush.bf16.msra.mxu1 %v3939_v51 }
 0xba3   :  { %2830 = vmatpush.bf16.msra.mxu0 %v3929_v25 }
 0xba6   :  { %2848 = vmatpush.bf16.msra.mxu1 %v3938_v4 }
 0xba9   :  { %2547 = vmatmul.bf16.gmra.mxu1 %v2335_v48 }
 0xbaa   :  { %2849 = vmatpush.bf16.msra.mxu1 %v3937_v17 }
 0xc07   :  { %v2562_v13 = vpop.f32.mrf.mxu2 }
 0xc0f   :  { %v2564_v26 = vpop.f32.mrf.mxu2 }
 0xc14   :  { %v2581_v15 = vpop.f32.mrf.mxu3 }
 0xc16   :  { %v2543_v24 = vpop.f32.mrf.mxu1 }
 0xc17   :  { %v2544_v23 = vadd.f32 %v3992_v31, %v2543_v24  ;;  %v2567_v42 = vpop.f32.mrf.mxu2 }
 0xc19   :  { %v2563_v63 = vadd.f32 %v2562_v13, %v2544_v23 }
 0xc1b   :  { %v2582_v28 = vadd.f32 %v2581_v15, %v2563_v63 }
 0xc1c   :  { %v2583_v8 = vpop.f32.mrf.mxu3 }
 0xc1d   :  { %v2591_v10 = vmax.f32 %v2582_v28, 0.0 }
 0xc1e   :  { %v2545_v33 = vpop.f32.mrf.mxu1 }
 0xc1f   :  { %v2546_v54 = vadd.f32 %v3992_v31, %v2545_v33  ;;  %v2609_v37 = vrot.slane %v2591_v10, 1  ;;  %v2569_v53 = vpop.f32.mrf.mxu2  ;;  %v2597_v55 = vrot.slane %v2591_v10, 7 }
 0xc21   :  { %v2565_v11 = vadd.f32 %v2564_v26, %v2546_v54 }
 0xc23   :  { %v2584_v1 = vadd.f32 %v2583_v8, %v2565_v11 }
 0xc24   :  { %v2586_v45 = vpop.f32.mrf.mxu3 }
 0xc25   :  { %v2592_v32 = vmax.f32 %v2584_v1, 0.0 }
 0xc26   :  { %v2548_v43 = vpop.f32.mrf.mxu1 }
 0xc27   :  { %v2622_v30 = vpack.c.bf16 %v2592_v32, %v2591_v10  ;;  %v2549_v35 = vadd.f32 %v3992_v31, %v2548_v43  ;;  %v2610_v46 = vrot.slane %v2592_v32, 1  ;;  %v2598_v7 = vrot.slane %v2592_v32, 7 }
 0xc29   :  { %v2568_v38 = vadd.f32 %v2567_v42, %v2549_v35  ;;  %2850 = vmatmul.bf16.vlgmr.msra.gmra.mxu1 %v2622_v30  ;;  %v2615_v49 = vsel %vm941_vm1, %v2609_v37, %v2610_v46  ;;  %v2603_v6 = vsel %vm904_vm10, %v2597_v55, %v2598_v7 }
 0xc2a   :  { %v2617_v51 = vmul.f32 %v2615_v49, %v4704_v58 }
 0xc2b   :  { %v2587_v34 = vadd.f32 %v2586_v45, %v2568_v38 }
 0xc2c   :  { %v2588_v62 = vpop.f32.mrf.mxu3 }
 0xc2d   :  { %v2593_v47 = vmax.f32 %v2587_v34, 0.0 }
 0xc2e   :  { %v2550_v48 = vpop.f32.mrf.mxu1 }
 0xc2f   :  { %v2611_v50 = vrot.slane %v2593_v47, 1  ;;  %v2551_v12 = vadd.f32 %v3992_v31, %v2550_v48  ;;  %v2599_v31 = vrot.slane %v2593_v47, 7 }
 0xc31   :  { %v2614_v59 = vsel %vm941_vm1, %v2610_v46, %v2611_v50  ;;  %v2570_v60 = vadd.f32 %v2569_v53, %v2551_v12 }
 0xc32   :  { %v2618_v3 = vmul.f32 %v2614_v59, %v4720_v61  ;;  %v2606_v61 = vmul.f32 %v2603_v6, %v4727_v19  ;;  %v2602_v19 = vsel %vm904_vm10, %v2598_v7, %v2599_v31 }
 0xc33   :  { %v2589_v4 = vadd.f32 %v2588_v62, %v2570_v60  ;;  %v2607_v23 = vmul.f32 %v2602_v19, %v4745_v29 }
 0xc34   :  { %v2623_v5 = vpack.c.bf16 %v2618_v3, %v2617_v51 }
 0xc35   :  { %v2594_v17 = vmax.f32 %v2589_v4, 0.0 }
 0xc36   :  { %2869 = vmatmul.bf16.vlgmr.msra.gmra.mxu2 %v2623_v5 }
 0xc37   :  { %v2600_v9 = vrot.slane %v2594_v17, 7  ;;  %v2625_v57 = vpack.c.bf16 %v2594_v17, %v2593_v47  ;;  %v2612_v20 = vrot.slane %v2594_v17, 1 }
 0xc39   :  { %v2604_v41 = vsel %vm904_vm10, %v2600_v9, %v2597_v55  ;;  %2855 = vmatmul.bf16.gmra.mxu1 %v2625_v57  ;;  %v2613_v13 = vsel %vm941_vm1, %v2611_v50, %v2612_v20  ;;  %v2616_v14 = vsel %vm941_vm1, %v2612_v20, %v2609_v37  ;;  %v2601_v21 = vsel %vm904_vm10, %v2599_v31, %v2600_v9 }
 0xc3a   :  { %v2605_v58 = vmul.f32 %v2604_v41, %v4733_v52  ;;  %v2619_v44 = vmul.f32 %v2613_v13, %v4752_v40  ;;  %v2620_v15 = vmul.f32 %v2616_v14, %v4748_v36  ;;  %v2608_v52 = vmul.f32 %v2601_v21, %v4759_v39  ;;  %v3993_v36 = vld [vmem:[%s5096_s13 + $0x1] ss:$0 sm:$0xff]  ;;  %v3956_v13 = vld [vmem:[%s5099_s16 + $0x18] sm:$0xff]  ;;  %v3955_v14 = vld [vmem:[%s5099_s16 + $0x10] sm:$0xff] }
 0xc3b   :  { %v3953_v21 = vld [vmem:[%s5099_s16] sm:$0xff] }
 0xc3c   :  { %v2621_v56 = vpack.c.bf16 %v2606_v61, %v2605_v58  ;;  %v2626_v24 = vpack.c.bf16 %v2620_v15, %v2619_v44  ;;  %v2624_v25 = vpack.c.bf16 %v2608_v52, %v2607_v23  ;;  %v3960_v58 = vld [vmem:[%s5099_s16 + $0x38] sm:$0xff]  ;;  %v3959_v61 = vld [vmem:[%s5099_s16 + $0x30] sm:$0xff]  ;;  %v3954_v44 = vld [vmem:[%s5099_s16 + $0x8] sm:$0xff] }
 0xc3d   :  { %3056 = vmatpush.bf16.msrb.mxu3 %v3960_v58 }
 0xc3e   :  { %2831 = vmatmul.bf16.vlgmr.msra.gmra.mxu0 %v2621_v56  ;;  %v3957_v56 = vld [vmem:[%s5099_s16 + $0x20] sm:$0xff] }
 0xc41   :  { %3057 = vmatpush.bf16.msrb.mxu3 %v3959_v61 }
 0xc45   :  { %3058 = vmatpush.bf16.msrb.mxu3 %v3958_v22  ;;  %v3996_v22 = vld [vmem:[#allocation14] ss:$0 sm:$0xff] }
 0xc46   :  { %2874 = vmatmul.bf16.gmra.mxu2 %v2626_v24 }
 0xc49   :  { %3059 = vmatpush.bf16.msrb.mxu3 %v3957_v56 }
 0xc4d   :  { %3060 = vmatpush.bf16.msrb.mxu3 %v3956_v13 }
 0xc4e   :  { %2836 = vmatmul.bf16.gmra.mxu0 %v2624_v25 }
 0xc51   :  { %3061 = vmatpush.bf16.msrb.mxu3 %v3955_v14 }
 0xc55   :  { %3062 = vmatpush.bf16.msrb.mxu3 %v3954_v44 }
 0xc59   :  { %3063 = vmatpush.bf16.msrb.mxu3 %v3953_v21 }
 0xca6   :  { %v2851_v26 = vpop.f32.mrf.mxu1 }
 0xcae   :  { %v2853_v28 = vpop.f32.mrf.mxu1 }
 0xcb6   :  { %v2856_v42 = vpop.f32.mrf.mxu1 }
 0xcb9   :  { %v2870_v40 = vpop.f32.mrf.mxu2 }
 0xcbb   :  { %v2832_v63 = vpop.f32.mrf.mxu0 }
 0xcbc   :  { %v2833_v8 = vadd.f32 %v3993_v36, %v2832_v63 }
 0xcbe   :  { %v2852_v33 = vadd.f32 %v2851_v26, %v2833_v8 }
 0xcc0   :  { %v2871_v54 = vadd.f32 %v2870_v40, %v2852_v33 }
 0xcc1   :  { %v2872_v11 = vpop.f32.mrf.mxu2 }
 0xcc2   :  { %v2880_v0 = vadd.f32 %v2871_v54, %v4942_v18  ;;  %v2858_v18 = vpop.f32.mrf.mxu1 }
 0xcc3   :  { %v2834_v1 = vpop.f32.mrf.mxu0 }
 0xcc4   :  { %v2835_v39 = vadd.f32 %v3993_v36, %v2834_v1  ;;  %2888 = vadd.xlane.f32.xlu2 %v2880_v0 }
 0xcc6   :  { %v2854_v29 = vadd.f32 %v2853_v28, %v2835_v39 }
 0xcc8   :  { %v2873_v10 = vadd.f32 %v2872_v11, %v2854_v29 }
 0xcc9   :  { %v2875_v35 = vpop.f32.mrf.mxu2 }
 0xcca   :  { %v2881_v32 = vadd.f32 %v2873_v10, %v4944_v2 }
 0xccb   :  { %v2837_v43 = vpop.f32.mrf.mxu0 }
 0xccc   :  { %v2838_v30 = vadd.f32 %v3993_v36, %v2837_v43  ;;  %2890 = vadd.xlane.f32.xlu0 %v2881_v32 }
 0xcce   :  { %v2857_v45 = vadd.f32 %v2856_v42, %v2838_v30  ;;  %v3994_v30 = vld [vmem:[%s5097_s14 + $0x1] ss:$0 sm:$0xff]  ;;  %s4342_s14 = smov [#allocation16]  }
 0xccf   :  { %s3083_s25 = sshll.u32 %s4342_s14, 4  ;;  %s3084_s25 = int_to_ptr.vmem [resolvable:$true] %s3083_s25 }
 0xcd0   :  { %v2876_v38 = vadd.f32 %v2875_v35, %v2857_v45 }
 0xcd1   :  { %v2877_v48 = vpop.f32.mrf.mxu2 }
 0xcd2   :  { %v2882_v46 = vadd.f32 %v2876_v38, %v4950_v16 }
 0xcd3   :  { %v2839_v34 = vpop.f32.mrf.mxu0 }
 0xcd4   :  { %v2840_v37 = vadd.f32 %v3993_v36, %v2839_v34  ;;  %2892 = vadd.xlane.f32.xlu1 %v2882_v46 }
 0xcd6   :  { %v2859_v47 = vadd.f32 %v2858_v18, %v2840_v37  ;;  %v3995_v18 = vld [vmem:[#allocation13 + $0x1] ss:$0 sm:$0xff] }
 0xcd8   :  { %v2878_v49 = vadd.f32 %v2877_v48, %v2859_v47 }
 0xcda   :  { %v2883_v50 = vadd.f32 %v2878_v49, %v4962_v27 }
 0xcdc   :  { %2894 = vadd.xlane.f32.xlu2 %v2883_v50 }
 0xd37   :  { %v2889_v2 = vpop.xlane.xlu2 %2888 }
 0xd38   :  { %v2896_v12 = vmul.f32 0.03125, %v2889_v2 }
 0xd3a   :  { %v2900_v53 = vsub.f32 %v2880_v0, %v2896_v12 }
 0xd3c   :  { %v5024_v59 = vsel %vm206_vm0, %v2900_v53, 0.0 }
 0xd3d   :  { %v2908_v16 = vmul.f32 %v5024_v59, %v5024_v59 }
 0xd3f   :  { %v2891_v60 = vpop.xlane.xlu0 %2890  ;;  %2912 = vadd.xlane.f32.xlu0 %v2908_v16 }
 0xd40   :  { %v2897_v62 = vmul.f32 0.03125, %v2891_v60 }
 0xd42   :  { %v2901_v51 = vsub.f32 %v2881_v32, %v2897_v62 }
 0xd44   :  { %v5030_v3 = vsel %vm206_vm0, %v2901_v51, 0.0 }
 0xd45   :  { %v2909_v27 = vmul.f32 %v5030_v3, %v5030_v3 }
 0xd47   :  { %2914 = vadd.xlane.f32.xlu1 %v2909_v27  ;;  %v2893_v7 = vpop.xlane.xlu1 %2892 }
 0xd48   :  { %v2898_v4 = vmul.f32 0.03125, %v2893_v7 }
 0xd4a   :  { %v2902_v5 = vsub.f32 %v2882_v46, %v2898_v4 }
 0xd4c   :  { %v5036_v55 = vsel %vm206_vm0, %v2902_v5, 0.0 }
 0xd4d   :  { %v2910_v17 = vmul.f32 %v5036_v55, %v5036_v55 }
 0xd4f   :  { %v2895_v6 = vpop.xlane.xlu2 %2894  ;;  %2916 = vadd.xlane.f32.xlu2 %v2910_v17 }
 0xd50   :  { %v2899_v9 = vmul.f32 0.03125, %v2895_v6 }
 0xd52   :  { %v2903_v57 = vsub.f32 %v2883_v50, %v2899_v9 }
 0xd54   :  { %v5042_v41 = vsel %vm206_vm0, %v2903_v57, 0.0 }
 0xd55   :  { %v2911_v20 = vmul.f32 %v5042_v41, %v5042_v41 }
 0xd57   :  { %2918 = vadd.xlane.f32.xlu0 %v2911_v20 }
 0xdb2   :  { %v2913_v15 = vpop.xlane.xlu0 %2912 }
 0xdb3   :  { %v2920_v31 = vmul.f32 0.03125, %v2913_v15 }
 0xdb5   :  { %v2924_v24 = vadd.f32 1e-05, %v2920_v31 }
 0xdb7   :  { %4085 = vrsqrt.f32 %v2924_v24  ;;  %vm2934_vm1 = vweird.f32 %v2924_v24 }
 0xdba   :  { %v2915_v19 = vpop.xlane.xlu1 %2914 }
 0xdbb   :  { %v2921_v52 = vmul.f32 0.03125, %v2915_v19 }
 0xdbd   :  { %v4086_v23 = vpop.eup %4085  ;;  %v2925_v25 = vadd.f32 1e-05, %v2921_v52 }
 0xdbe   :  { %v2929_v26 = vmul.f32 %v4086_v23, %v2924_v24  ;;  %vm2935_vm0 = vweird.f32 %v4086_v23 }
 0xdbf   :  { %4087 = vrsqrt.f32 %v2925_v25  ;;  %vm2936_vm10 = vmor %vm2934_vm1, %vm2935_vm0  ;;  %vm2944_vm2 = vweird.f32 %v2925_v25 }
 0xdc0   :  { %v2930_v36 = vmul.f32 %v4086_v23, %v2929_v26 }
 0xdc2   :  { %v2931_v40 = vmul.f32 0.5, %v2930_v36  ;;  %v2917_v63 = vpop.xlane.xlu2 %2916 }
 0xdc3   :  { %v2922_v8 = vmul.f32 0.03125, %v2917_v63 }
 0xdc4   :  { %v2932_v33 = vsub.f32 1.5, %v2931_v40 }
 0xdc5   :  { %v4088_v54 = vpop.eup %4087  ;;  %v2926_v28 = vadd.f32 1e-05, %v2922_v8 }
 0xdc6   :  { %v2933_v0 = vmul.f32 %v4086_v23, %v2932_v33  ;;  %v2939_v11 = vmul.f32 %v4088_v54, %v2925_v25  ;;  %vm2945_vm14 = vweird.f32 %v4088_v54 }
 0xdc7   :  { %4089 = vrsqrt.f32 %v2926_v28  ;;  %vm2946_vm3 = vmor %vm2944_vm2, %vm2945_vm14  ;;  %vm2954_vm5 = vweird.f32 %v2926_v28 }
 0xdc8   :  { %v2940_v1 = vmul.f32 %v4088_v54, %v2939_v11  ;;  %v2937_v39 = vsel %vm2936_vm10, %v4086_v23, %v2933_v0 }
 0xdc9   :  { %v2968_v35 = vmul.f32 %v2937_v39, %v5024_v59 }
 0xdca   :  { %v2941_v29 = vmul.f32 0.5, %v2940_v1  ;;  %v2919_v10 = vpop.xlane.xlu0 %2918 }
 0xdcb   :  { %v2923_v32 = vmul.f32 0.03125, %v2919_v10  ;;  %v2975_v47 = vmul.f32 %v3994_v30, %v2968_v35 }
 0xdcc   :  { %v2942_v42 = vsub.f32 1.5, %v2941_v29 }
 0xdcd   :  { %v4090_v43 = vpop.eup %4089  ;;  %v2927_v45 = vadd.f32 1e-05, %v2923_v32  ;;  %v2982_v53 = vadd.f32 %v3995_v18, %v2975_v47 }
 0xdce   :  { %v2943_v38 = vmul.f32 %v4088_v54, %v2942_v42  ;;  %v2949_v46 = vmul.f32 %v4090_v43, %v2926_v28  ;;  %vm2955_vm4 = vweird.f32 %v4090_v43 }
 0xdcf   :  { %4091 = vrsqrt.f32 %v2927_v45  ;;  %vm2956_vm6 = vmor %vm2954_vm5, %vm2955_vm4  ;;  %vm2964_vm7 = vweird.f32 %v2927_v45 }
 0xdd0   :  { %v2947_v34 = vsel %vm2946_vm3, %v4088_v54, %v2943_v38  ;;  %v2950_v37 = vmul.f32 %v4090_v43, %v2949_v46 }
 0xdd1   :  { %v2969_v48 = vmul.f32 %v2947_v34, %v5030_v3 }
 0xdd2   :  { %v2951_v49 = vmul.f32 0.5, %v2950_v37 }
 0xdd3   :  { %v2976_v50 = vmul.f32 %v3994_v30, %v2969_v48 }
 0xdd4   :  { %v2952_v2 = vsub.f32 1.5, %v2951_v49 }
 0xdd5   :  { %v4092_v12 = vpop.eup %4091  ;;  %v2983_v16 = vadd.f32 %v3995_v18, %v2976_v50 }
 0xdd6   :  { %v2953_v60 = vmul.f32 %v4090_v43, %v2952_v2  ;;  %v2959_v59 = vmul.f32 %v4092_v12, %v2927_v45  ;;  %vm2965_vm15 = vweird.f32 %v4092_v12 }
 0xdd7   :  { %v2986_v62 = vpack.c.bf16 %v2983_v16, %v2982_v53  ;;  %vm2966_vm8 = vmor %vm2964_vm7, %vm2965_vm15 }
 0xdd8   :  { %v2960_v51 = vmul.f32 %v4092_v12, %v2959_v59  ;;  %v2957_v27 = vsel %vm2956_vm6, %v4090_v43, %v2953_v60 }
 0xdd9   :  { %3064 = vmatmul.bf16.vlgmr.msrb.gmra.mxu3 %v2986_v62  ;;  %v2970_v3 = vmul.f32 %v2957_v27, %v5036_v55 }
 0xdda   :  { %v2961_v7 = vmul.f32 0.5, %v2960_v51 }
 0xddb   :  { %v2977_v9 = vmul.f32 %v3994_v30, %v2970_v3 }
 0xddc   :  { %v2962_v4 = vsub.f32 1.5, %v2961_v7 }
 0xddd   :  { %v2984_v20 = vadd.f32 %v3995_v18, %v2977_v9 }
 0xdde   :  { %v2963_v5 = vmul.f32 %v4092_v12, %v2962_v4 }
 0xde0   :  { %v2967_v17 = vsel %vm2966_vm8, %v4092_v12, %v2963_v5 }
 0xde1   :  { %v2971_v6 = vmul.f32 %v2967_v17, %v5042_v41 }
 0xde3   :  { %v2978_v57 = vmul.f32 %v3994_v30, %v2971_v6 }
 0xde5   :  { %v2985_v58 = vadd.f32 %v3995_v18, %v2978_v57 }
 0xde7   :  { %v2987_v61 = vpack.c.bf16 %v2985_v58, %v2984_v20 }
 0xde9   :  { %3069 = vmatmul.bf16.gmra.mxu3 %v2987_v61 }
 0xe5c   :  { %v3065_v56 = vpop.f32.mrf.mxu3 }
 0xe5d   :  { %v3066_v13 = vadd.f32 %v3996_v22, %v3065_v56 }
 0xe5f   :  { %3075 = vst [vmem:[#allocation16] sm:$0xff] %v3066_v13 }
 0xe64   :  { %v3067_v14 = vpop.f32.mrf.mxu3 }
 0xe65   :  { %v3068_v44 = vadd.f32 %v3996_v22, %v3067_v14 }
 0xe67   :  { %3076 = vst [vmem:[#allocation16 + $0x8] sm:$0xff] %v3068_v44 }
 0xe6c   :  { %v3070_v55 = vpop.f32.mrf.mxu3 }
 0xe6d   :  { %v3071_v15 = vadd.f32 %v3996_v22, %v3070_v55 }
 0xe6f   :  { %3077 = vst [vmem:[#allocation16 + $0x10] sm:$0xff] %v3071_v15 }
 0xe74   :  { %v3072_v41 = vpop.f32.mrf.mxu3 }
 0xe75   :  { %v3073_v31 = vadd.f32 %v3996_v22, %v3072_v41 }
 0xe77   :  { %3078 = vst [vmem:[#allocation16 + $0x18] sm:$0xff] %v3073_v31 }
 0xe78   :  { %3091 = dma.vmem_to_hbm [thread:$0]  %s3084_s25, 512, %s3086_s6, [#allocation4], %s5111_s12, %s5111_s12, %s4327_s2  }
 0xe79   :  { %4323 = dma.done.wait [#allocation4], 512  }
 0xe7a   :  { %4324 = vsyncadd [#allocation4], 4294966784 }
 0xe7b   :  { %3096 = vsyncpa [#allocation3], 1 }
 0xe7c   :  { %3097 = vsyncpa [#allocation6], 1 }
 0xe7d   :  { %3098 = vsyncpa [#allocation9], 1 }
 0xe7e   :  { %3099 = vsyncpa [#allocation12], 1 }
 0xe7f   :  { %3100 = vsyncpa [#allocation15], 1 }
 0xe80   :  { %3101 = vsyncpa [#allocation4], 1 }

</bundles_post_ra>
